<compile_context>
chip_gen: v6e
topology: v6e:2x2x1
jax: 0.10.0
libtpu: 0.0.40
codegen_flags: <defaults>
</compile_context>

<pallas_src>
import math
import jax
import jax.numpy as jnp
import numpy as np
from jax.experimental import pallas as pl
from jax.experimental.pallas import tpu as pltpu

# ---------------- small config consistent with the module's __init__ -------
BATCH = 2
IN_CH = 3
IMG = 16
PATCH = 4
GRID_HW = IMG // PATCH              # 4
N_PATCHES = GRID_HW * GRID_HW       # 16
SEQ = N_PATCHES + 1                 # 17  (cls token + patches)
BS = BATCH * SEQ                    # 34  (batch stacked on sublanes)
HIDDEN = 32
NUM_HEADS = 4
HEAD_DIM = HIDDEN // NUM_HEADS      # 8
MLP_DIM = 64
NUM_LAYERS = 2
NUM_CLASSES = 16
CPP = IN_CH * PATCH * PATCH         # 48 (flattened conv patch)
EPS = 1e-6
NEG_INF = -1e30
# NOTE: the torch forward only type-checks when bottleneck == hidden_size
# (head = weightNorm(Linear(bottleneck, num_classes)) applied to x[:, 0] of
# width hidden_size), so bottleneck == HIDDEN here.

_SQRT_2_OVER_PI = math.sqrt(2.0 / math.pi)


# ----------------------------- kernel helpers -------------------------------
def _layernorm(x, g, b):
    # torch.nn.LayerNorm semantics (biased variance, eps inside sqrt)
    mu = jnp.mean(x, axis=-1, keepdims=True)
    var = jnp.mean((x - mu) * (x - mu), axis=-1, keepdims=True)
    return (x - mu) * jax.lax.rsqrt(var + EPS) * g + b


def _gelu_tanh(x):
    # tanh-form GELU: the transcendental lands on the EUP slot instead of a
    # long VALU erf polynomial.
    # TODO(synk): torch uses the exact erf GELU; tanh form differs by <~3e-4.
    return 0.5 * x * (1.0 + jnp.tanh(_SQRT_2_OVER_PI * (x + 0.044715 * x * x * x)))


def _bf16(x):
    return x.astype(jnp.bfloat16)


# ----------------------------- the fused kernel ------------------------------
def vit_kernel(patches_ref, pw_ref, pb_ref, cls_ref, pos_ref, bmask_ref,
               wqkv_ref, bqkv_ref, wo_ref, small_ref, w1_ref, b1_ref, w2_ref,
               enc_g_ref, enc_b_ref, head_w_ref, head_b_ref,
               logits_ref):
    # ---- Embeddings: one batched (B*NP, CPP) @ (CPP, H) matmul, then the
    #      (B*SEQ, H) activation slab is assembled once (cls row + patch rows).
    pe = jnp.dot(patches_ref[...], pw_ref[...],
                 preferred_element_type=jnp.float32) + pb_ref[...]   # (B*NP, H)
    pos = pos_ref[...]                                                # (SEQ, H)
    cls_row = cls_ref[...] + pos[0:1, :]                              # (1, H)
    pos_patch = pos[1:SEQ, :]                                         # (NP, H)
    pieces = []
    for b in range(BATCH):
        pieces.append(cls_row)
        pieces.append(pe[b * N_PATCHES:(b + 1) * N_PATCHES, :] + pos_patch)
    x = jnp.concatenate(pieces, axis=0)                               # (BS, H) f32

    bmask = bmask_ref[...]                                            # (BS, BS)

    # ---- NUM_LAYERS transformer blocks, fully unrolled, weights indexed from
    #      the stacked (L, ...) refs (everything resident in VMEM).
    for l in range(NUM_LAYERS):
        sm = small_ref[l]                                             # (6, H)
        ln1_g, ln1_b = sm[0:1, :], sm[1:2, :]
        bo = sm[2:3, :]
        ln2_g, ln2_b = sm[3:4, :], sm[4:5, :]
        b2 = sm[5:6, :]
        wqkv = wqkv_ref[l]                                            # (H, 3H) bf16
        bqkv = bqkv_ref[l]                                            # (1, 3H) f32
        wo = wo_ref[l]                                                # (H, H)  bf16
        w1, b1 = w1_ref[l], b1_ref[l]                                 # (H,MLP) bf16 / (1,MLP)
        w2 = w2_ref[l]                                                # (MLP,H) bf16

        # ---------- attention sub-block (batch stacked on sublanes) ----------
        xn = _layernorm(x, ln1_g, ln1_b)
        qkv = jnp.dot(_bf16(xn), wqkv,
                      preferred_element_type=jnp.float32) + bqkv      # (BS, 3H)
        # 1/sqrt(HEAD_DIM) is already folded into the Q columns/bias of wqkv.
        q = _bf16(qkv[:, 0:HIDDEN])
        k = _bf16(qkv[:, HIDDEN:2 * HIDDEN])
        v = _bf16(qkv[:, 2 * HIDDEN:3 * HIDDEN])

        attn = jnp.zeros((BS, HIDDEN), jnp.float32)
        for h in range(NUM_HEADS):
            lo = h * HEAD_DIM
            # scores over BOTH batches at once; the additive cross-batch mask
            # (-1e30 off the per-sample diagonal blocks) keeps softmax/context
            # strictly per-sample.  q @ k^T via dot_general contracting the
            # last dims (no transpose).
            s = jax.lax.dot_general(q[:, lo:lo + HEAD_DIM], k[:, lo:lo + HEAD_DIM],
                                    (((1,), (1,)), ((), ())),
                                    preferred_element_type=jnp.float32)  # (BS, BS)
            s = s + bmask
            s = s - jnp.max(s, axis=-1, keepdims=True)
            e = jnp.exp(s)
            p = e * pl.reciprocal(jnp.sum(e, axis=-1, keepdims=True), approx=True)
            ctx = jnp.dot(_bf16(p), v[:, lo:lo + HEAD_DIM],
                          preferred_element_type=jnp.float32)            # (BS, HD)
            # fold the head-concat into the output projection: accumulate into
            # a lane-dense (BS, H) slab instead of concatenating 8-wide pieces.
            attn = attn + jnp.dot(_bf16(ctx), wo[lo:lo + HEAD_DIM, :],
                                  preferred_element_type=jnp.float32)    # (BS, H)
        x = x + attn + bo

        # ---------- MLP sub-block ----------
        xn = _layernorm(x, ln2_g, ln2_b)
        y = jnp.dot(_bf16(xn), w1, preferred_element_type=jnp.float32) + b1
        y = _gelu_tanh(y)
        x = x + jnp.dot(_bf16(y), w2, preferred_element_type=jnp.float32) + b2

    # ---- encoder LayerNorm on the CLS rows + weight-normed head, batched.
    cls2 = jnp.concatenate([x[b * SEQ:b * SEQ + 1, :] for b in range(BATCH)],
                           axis=0)                                     # (B, H)
    enc = _layernorm(cls2, enc_g_ref[...], enc_b_ref[...])
    logits_ref[...] = jnp.dot(enc, head_w_ref[...],
                              preferred_element_type=jnp.float32) + head_b_ref[...]


# ----------------------------- wrapper ---------------------------------------
def _extract_patches(x):
    """(B, C, H, W) -> (B, n_patches, C*P*P); matches Conv2d(kernel=stride=P)."""
    B, C, H, W = x.shape
    gh, gw = H // PATCH, W // PATCH
    x = x.reshape(B, C, gh, PATCH, gw, PATCH)
    x = x.transpose(0, 2, 4, 1, 3, 5)              # (B, gh, gw, C, p, p)
    return x.reshape(B, gh * gw, C * PATCH * PATCH)


def vit_forward(x_img, params, vis=False):
    # ---- wrapper-side parameter / data prep (layout plumbing only) ----------
    patches = _extract_patches(x_img).reshape(BATCH * N_PATCHES, CPP)
    patches = patches.astype(jnp.bfloat16)                         # (B*NP, CPP)
    pw = params["patch_w"].reshape(HIDDEN, CPP).T.astype(jnp.bfloat16)  # (CPP, H)
    pb = params["patch_b"].reshape(1, HIDDEN)
    cls = params["cls"].reshape(1, HIDDEN)
    pos = params["pos"].reshape(SEQ, HIDDEN)

    # fused QKV projection, with 1/sqrt(HEAD_DIM) folded into the Q columns/bias
    scale = 1.0 / math.sqrt(HEAD_DIM)
    wqkv = jnp.concatenate([params["wq"] * scale, params["wk"], params["wv"]],
                           axis=-1).astype(jnp.bfloat16)            # (L, H, 3H)
    bqkv = jnp.concatenate([params["bq"] * scale, params["bk"], params["bv"]],
                           axis=-1)                                  # (L, 1, 3H)
    # pack the six HIDDEN-width per-layer params into one (L, 6, H) array
    small = jnp.concatenate([params["ln1_g"], params["ln1_b"], params["bo"],
                             params["ln2_g"], params["ln2_b"], params["b2"]],
                            axis=1)                                  # (L, 6, H)

    # weight_norm head: effective weight g * v / ||v|| (parametrization)
    hv, hg = params["head_v"], params["head_g"]
    head_w = (hg * hv / jnp.sqrt(jnp.sum(hv * hv, axis=1, keepdims=True))).T  # (H, NC)
    head_b = params["head_b"].reshape(1, NUM_CLASSES)

    # constant cross-batch additive mask (numpy at trace time, zero runtime cost)
    rb = np.arange(BS) // SEQ
    bmask = jnp.asarray(np.where(rb[:, None] == rb[None, :], 0.0, NEG_INF),
                        dtype=jnp.float32)                           # (BS, BS)

    inputs = (patches, pw, pb, cls, pos, bmask,
              wqkv, bqkv, params["wo"].astype(jnp.bfloat16), small,
              params["w1"].astype(jnp.bfloat16), params["b1"],
              params["w2"].astype(jnp.bfloat16),
              params["enc_g"], params["enc_b"], head_w, head_b)

    # Single program, no grid: every array is a whole-block VMEM ref (total
    # footprint < 0.2 MiB, thousands of times under VMEM on v5e/v6e/v7x).
    logits = pl.pallas_call(
        vit_kernel,
        out_shape=jax.ShapeDtypeStruct((BATCH, NUM_CLASSES), jnp.float32),
    )(*inputs)

    attn_weights = []            # vis=False -> stays empty (matches torch path)
    return logits, attn_weights


# ----------------------------- reference (plain JAX, exact f32 math) ---------
def _ln_ref(x, g, b):
    mu = jnp.mean(x, axis=-1, keepdims=True)
    var = jnp.mean((x - mu) ** 2, axis=-1, keepdims=True)
    return (x - mu) / jnp.sqrt(var + EPS) * g + b


def vit_ref(x_img, params):
    feat = jax.lax.conv_general_dilated(
        x_img, params["patch_w"], window_strides=(PATCH, PATCH), padding="VALID",
        dimension_numbers=("NCHW", "OIHW", "NCHW"))                # (B, H, gh, gw)
    feat = feat + params["patch_b"].reshape(1, HIDDEN, 1, 1)
    feat = feat.reshape(BATCH, HIDDEN, N_PATCHES).transpose(0, 2, 1)
    cls = jnp.broadcast_to(params["cls"], (BATCH, 1, HIDDEN))
    x = jnp.concatenate([cls, feat], axis=1) + params["pos"]       # (B, S, H)

    for li in range(NUM_LAYERS):
        h = x
        xn = _ln_ref(x, params["ln1_g"][li], params["ln1_b"][li])
        q = xn @ params["wq"][li] + params["bq"][li]
        k = xn @ params["wk"][li] + params["bk"][li]
        v = xn @ params["wv"][li] + params["bv"][li]

        def split(t):
            return t.reshape(BATCH, SEQ, NUM_HEADS, HEAD_DIM).transpose(0, 2, 1, 3)

        qh, kh, vh = split(q), split(k), split(v)
        s = jnp.einsum("bhqd,bhkd->bhqk", qh, kh) / math.sqrt(HEAD_DIM)
        p = jax.nn.softmax(s, axis=-1)
        ctx = jnp.einsum("bhqk,bhkd->bhqd", p, vh)
        ctx = ctx.transpose(0, 2, 1, 3).reshape(BATCH, SEQ, HIDDEN)
        x = ctx @ params["wo"][li] + params["bo"][li] + h

        h = x
        xn = _ln_ref(x, params["ln2_g"][li], params["ln2_b"][li])
        y = xn @ params["w1"][li] + params["b1"][li]
        y = 0.5 * y * (1.0 + jax.lax.erf(y / math.sqrt(2.0)))      # exact gelu
        x = y @ params["w2"][li] + params["b2"][li] + h

    encoded = _ln_ref(x, params["enc_g"], params["enc_b"])
    hv, hg = params["head_v"], params["head_g"]
    w_eff = hg * hv / jnp.sqrt(jnp.sum(hv * hv, axis=1, keepdims=True))
    logits = encoded[:, 0] @ w_eff.T + params["head_b"].reshape(1, NUM_CLASSES)
    return logits


# ----------------------------- parameter init --------------------------------
def init_params(key):
    def nrm(k, shape, scale):
        return scale * jax.random.normal(k, shape, jnp.float32)

    ks = iter(jax.random.split(key, 40))
    L = NUM_LAYERS
    p = {
        "patch_w": nrm(next(ks), (HIDDEN, IN_CH, PATCH, PATCH), 0.1),
        "patch_b": nrm(next(ks), (HIDDEN,), 0.01),
        "cls": nrm(next(ks), (1, 1, HIDDEN), 0.02),
        "pos": nrm(next(ks), (1, SEQ, HIDDEN), 0.02),
        "ln1_g": 1.0 + nrm(next(ks), (L, 1, HIDDEN), 0.01),
        "ln1_b": nrm(next(ks), (L, 1, HIDDEN), 0.01),
        "wq": nrm(next(ks), (L, HIDDEN, HIDDEN), 0.1),
        "bq": nrm(next(ks), (L, 1, HIDDEN), 0.01),
        "wk": nrm(next(ks), (L, HIDDEN, HIDDEN), 0.1),
        "bk": nrm(next(ks), (L, 1, HIDDEN), 0.01),
        "wv": nrm(next(ks), (L, HIDDEN, HIDDEN), 0.1),
        "bv": nrm(next(ks), (L, 1, HIDDEN), 0.01),
        "wo": nrm(next(ks), (L, HIDDEN, HIDDEN), 0.1),
        "bo": nrm(next(ks), (L, 1, HIDDEN), 0.01),
        "ln2_g": 1.0 + nrm(next(ks), (L, 1, HIDDEN), 0.01),
        "ln2_b": nrm(next(ks), (L, 1, HIDDEN), 0.01),
        "w1": nrm(next(ks), (L, HIDDEN, MLP_DIM), 0.1),
        "b1": nrm(next(ks), (L, 1, MLP_DIM), 1e-3),
        "w2": nrm(next(ks), (L, MLP_DIM, HIDDEN), 0.1),
        "b2": nrm(next(ks), (L, 1, HIDDEN), 1e-3),
        "enc_g": 1.0 + nrm(next(ks), (1, HIDDEN), 0.01),
        "enc_b": nrm(next(ks), (1, HIDDEN), 0.01),
        "head_v": nrm(next(ks), (NUM_CLASSES, HIDDEN), 0.1),
        "head_g": 1.0 + jnp.abs(nrm(next(ks), (NUM_CLASSES, 1), 0.1)),
        "head_b": nrm(next(ks), (1, NUM_CLASSES), 0.01),
    }
    return p


# ----------------------------- main -------------------------------------------
if __name__ == "__main__":
    key = jax.random.PRNGKey(0)
    kx, kp = jax.random.split(key)
    x_img = jax.random.normal(kx, (BATCH, IN_CH, IMG, IMG), jnp.float32)
    params = init_params(kp)

    logits, attn_w = vit_forward(x_img, params, vis=False)
    logits = jax.block_until_ready(logits)

    ref = jax.block_until_ready(vit_ref(x_img, params))
    assert logits.shape == (BATCH, NUM_CLASSES)
    assert attn_w == []
    # Tolerance accounts for bf16 matmul operands (f32 accumulation), the
    # tanh-form GELU and the approx-reciprocal softmax vs the exact f32 ref.
    assert np.allclose(np.asarray(logits), np.asarray(ref), atol=4e-2, rtol=4e-2), (
        "mismatch vs reference: max abs err "
        f"{np.max(np.abs(np.asarray(logits) - np.asarray(ref)))}")

    print("KERNEL_OK")
</pallas_src>

<mosaic_0001>
module attributes {stable_mosaic.version = 11 : i64} {
  func.func @vit_kernel(%arg0: memref<32x48xbf16, #tpu.memory_space<vmem>>, %arg1: memref<48x32xbf16, #tpu.memory_space<vmem>>, %arg2: memref<1x32xf32, #tpu.memory_space<vmem>>, %arg3: memref<1x32xf32, #tpu.memory_space<vmem>>, %arg4: memref<17x32xf32, #tpu.memory_space<vmem>>, %arg5: memref<34x34xf32, #tpu.memory_space<vmem>>, %arg6: memref<2x32x96xbf16, #tpu.memory_space<vmem>>, %arg7: memref<2x1x96xf32, #tpu.memory_space<vmem>>, %arg8: memref<2x32x32xbf16, #tpu.memory_space<vmem>>, %arg9: memref<2x6x32xf32, #tpu.memory_space<vmem>>, %arg10: memref<2x32x64xbf16, #tpu.memory_space<vmem>>, %arg11: memref<2x1x64xf32, #tpu.memory_space<vmem>>, %arg12: memref<2x64x32xbf16, #tpu.memory_space<vmem>>, %arg13: memref<1x32xf32, #tpu.memory_space<vmem>>, %arg14: memref<1x32xf32, #tpu.memory_space<vmem>>, %arg15: memref<32x16xf32, #tpu.memory_space<vmem>>, %arg16: memref<1x16xf32, #tpu.memory_space<vmem>>, %arg17: memref<2x16xf32, #tpu.memory_space<vmem>>) attributes {dimension_semantics = [], scalar_prefetch = 0 : i64, scratch_operands = 0 : i64, tpu.core_type = #tpu.core_type<tc>} {
    %c0 = arith.constant 0 : index
    %c0_0 = arith.constant 0 : index
    %0 = vector.load %arg0[%c0, %c0_0] : memref<32x48xbf16, #tpu.memory_space<vmem>>, vector<32x48xbf16>
    %c0_1 = arith.constant 0 : index
    %c0_2 = arith.constant 0 : index
    %1 = vector.load %arg1[%c0_1, %c0_2] : memref<48x32xbf16, #tpu.memory_space<vmem>>, vector<48x32xbf16>
    %cst = arith.constant dense<0.000000e+00> : vector<32x32xf32>
    %2 = tpu.matmul %0, %1, %cst {dimension_numbers = #tpu.dot_dimension_numbers<[1], [0], [0], [1], [0, 0, 1, 1], [], []>} : vector<32x48xbf16>, vector<48x32xbf16>, vector<32x32xf32> -> vector<32x32xf32>
    %c0_3 = arith.constant 0 : index
    %c0_4 = arith.constant 0 : index
    %3 = vector.load %arg2[%c0_3, %c0_4] : memref<1x32xf32, #tpu.memory_space<vmem>>, vector<1x32xf32>
    %4 = vector.broadcast %3 : vector<1x32xf32> to vector<32x32xf32>
    %5 = arith.addf %2, %4 : vector<32x32xf32>
    %c0_5 = arith.constant 0 : index
    %c0_6 = arith.constant 0 : index
    %6 = vector.load %arg4[%c0_5, %c0_6] : memref<17x32xf32, #tpu.memory_space<vmem>>, vector<17x32xf32>
    %c0_7 = arith.constant 0 : index
    %c0_8 = arith.constant 0 : index
    %7 = vector.load %arg3[%c0_7, %c0_8] : memref<1x32xf32, #tpu.memory_space<vmem>>, vector<1x32xf32>
    %8 = vector.extract_strided_slice %6 {offsets = [0, 0], sizes = [1, 32], strides = [1, 1]} : vector<17x32xf32> to vector<1x32xf32>
    %9 = arith.addf %7, %8 : vector<1x32xf32>
    %10 = vector.extract_strided_slice %6 {offsets = [1, 0], sizes = [16, 32], strides = [1, 1]} : vector<17x32xf32> to vector<16x32xf32>
    %11 = vector.extract_strided_slice %5 {offsets = [0, 0], sizes = [16, 32], strides = [1, 1]} : vector<32x32xf32> to vector<16x32xf32>
    %12 = arith.addf %11, %10 : vector<16x32xf32>
    %13 = vector.extract_strided_slice %5 {offsets = [16, 0], sizes = [16, 32], strides = [1, 1]} : vector<32x32xf32> to vector<16x32xf32>
    %14 = arith.addf %13, %10 : vector<16x32xf32>
    %15 = tpu.concatenate %9, %12, %9, %14 in 0 : vector<1x32xf32>, vector<16x32xf32>, vector<1x32xf32>, vector<16x32xf32> -> vector<34x32xf32>
    %c0_9 = arith.constant 0 : index
    %c0_10 = arith.constant 0 : index
    %16 = vector.load %arg5[%c0_9, %c0_10] : memref<34x34xf32, #tpu.memory_space<vmem>>, vector<34x34xf32>
    %c0_11 = arith.constant 0 : index
    %c0_12 = arith.constant 0 : index
    %c0_13 = arith.constant 0 : index
    %17 = vector.load %arg9[%c0_11, %c0_12, %c0_13] : memref<2x6x32xf32, #tpu.memory_space<vmem>>, vector<1x6x32xf32>
    %18 = vector.shape_cast %17 : vector<1x6x32xf32> to vector<6x32xf32>
    %19 = vector.extract_strided_slice %18 {offsets = [0, 0], sizes = [1, 32], strides = [1, 1]} : vector<6x32xf32> to vector<1x32xf32>
    %20 = vector.extract_strided_slice %18 {offsets = [1, 0], sizes = [1, 32], strides = [1, 1]} : vector<6x32xf32> to vector<1x32xf32>
    %21 = vector.extract_strided_slice %18 {offsets = [2, 0], sizes = [1, 32], strides = [1, 1]} : vector<6x32xf32> to vector<1x32xf32>
    %22 = vector.extract_strided_slice %18 {offsets = [3, 0], sizes = [1, 32], strides = [1, 1]} : vector<6x32xf32> to vector<1x32xf32>
    %23 = vector.extract_strided_slice %18 {offsets = [4, 0], sizes = [1, 32], strides = [1, 1]} : vector<6x32xf32> to vector<1x32xf32>
    %24 = vector.extract_strided_slice %18 {offsets = [5, 0], sizes = [1, 32], strides = [1, 1]} : vector<6x32xf32> to vector<1x32xf32>
    %c0_14 = arith.constant 0 : index
    %c0_15 = arith.constant 0 : index
    %c0_16 = arith.constant 0 : index
    %25 = vector.load %arg6[%c0_14, %c0_15, %c0_16] : memref<2x32x96xbf16, #tpu.memory_space<vmem>>, vector<1x32x96xbf16>
    %26 = vector.shape_cast %25 : vector<1x32x96xbf16> to vector<32x96xbf16>
    %c0_17 = arith.constant 0 : index
    %c0_18 = arith.constant 0 : index
    %c0_19 = arith.constant 0 : index
    %27 = vector.load %arg7[%c0_17, %c0_18, %c0_19] : memref<2x1x96xf32, #tpu.memory_space<vmem>>, vector<1x1x96xf32>
    %28 = vector.shape_cast %27 : vector<1x1x96xf32> to vector<1x96xf32>
    %c0_20 = arith.constant 0 : index
    %c0_21 = arith.constant 0 : index
    %c0_22 = arith.constant 0 : index
    %29 = vector.load %arg8[%c0_20, %c0_21, %c0_22] : memref<2x32x32xbf16, #tpu.memory_space<vmem>>, vector<1x32x32xbf16>
    %30 = vector.shape_cast %29 : vector<1x32x32xbf16> to vector<32x32xbf16>
    %c0_23 = arith.constant 0 : index
    %c0_24 = arith.constant 0 : index
    %c0_25 = arith.constant 0 : index
    %31 = vector.load %arg10[%c0_23, %c0_24, %c0_25] : memref<2x32x64xbf16, #tpu.memory_space<vmem>>, vector<1x32x64xbf16>
    %32 = vector.shape_cast %31 : vector<1x32x64xbf16> to vector<32x64xbf16>
    %c0_26 = arith.constant 0 : index
    %c0_27 = arith.constant 0 : index
    %c0_28 = arith.constant 0 : index
    %33 = vector.load %arg11[%c0_26, %c0_27, %c0_28] : memref<2x1x64xf32, #tpu.memory_space<vmem>>, vector<1x1x64xf32>
    %34 = vector.shape_cast %33 : vector<1x1x64xf32> to vector<1x64xf32>
    %c0_29 = arith.constant 0 : index
    %c0_30 = arith.constant 0 : index
    %c0_31 = arith.constant 0 : index
    %35 = vector.load %arg12[%c0_29, %c0_30, %c0_31] : memref<2x64x32xbf16, #tpu.memory_space<vmem>>, vector<1x64x32xbf16>
    %36 = vector.shape_cast %35 : vector<1x64x32xbf16> to vector<64x32xbf16>
    %cst_32 = arith.constant dense<0.000000e+00> : vector<34xf32>
    %37 = vector.multi_reduction <add>, %15, %cst_32 [1] : vector<34x32xf32> to vector<34xf32>
    %38 = vector.shape_cast %37 : vector<34xf32> to vector<34x1xf32>
    %cst_33 = arith.constant 3.200000e+01 : f32
    %39 = vector.broadcast %cst_33 : f32 to vector<34x1xf32>
    %40 = arith.divf %38, %39 : vector<34x1xf32>
    %41 = vector.broadcast %40 : vector<34x1xf32> to vector<34x32xf32>
    %42 = arith.subf %15, %41 : vector<34x32xf32>
    %43 = vector.broadcast %40 : vector<34x1xf32> to vector<34x32xf32>
    %44 = arith.subf %15, %43 : vector<34x32xf32>
    %45 = arith.mulf %42, %44 : vector<34x32xf32>
    %cst_34 = arith.constant dense<0.000000e+00> : vector<34xf32>
    %46 = vector.multi_reduction <add>, %45, %cst_34 [1] : vector<34x32xf32> to vector<34xf32>
    %47 = vector.shape_cast %46 : vector<34xf32> to vector<34x1xf32>
    %cst_35 = arith.constant 3.200000e+01 : f32
    %48 = vector.broadcast %cst_35 : f32 to vector<34x1xf32>
    %49 = arith.divf %47, %48 : vector<34x1xf32>
    %50 = vector.broadcast %40 : vector<34x1xf32> to vector<34x32xf32>
    %51 = arith.subf %15, %50 : vector<34x32xf32>
    %cst_36 = arith.constant 9.99999997E-7 : f32
    %52 = vector.broadcast %cst_36 : f32 to vector<34x1xf32>
    %53 = arith.addf %49, %52 : vector<34x1xf32>
    %54 = math.rsqrt %53 : vector<34x1xf32>
    %55 = vector.broadcast %54 : vector<34x1xf32> to vector<34x32xf32>
    %56 = arith.mulf %51, %55 : vector<34x32xf32>
    %57 = vector.broadcast %19 : vector<1x32xf32> to vector<34x32xf32>
    %58 = arith.mulf %56, %57 : vector<34x32xf32>
    %59 = vector.broadcast %20 : vector<1x32xf32> to vector<34x32xf32>
    %60 = arith.addf %58, %59 : vector<34x32xf32>
    %61 = arith.truncf %60 : vector<34x32xf32> to vector<34x32xbf16>
    %cst_37 = arith.constant dense<0.000000e+00> : vector<34x96xf32>
    %62 = tpu.matmul %61, %26, %cst_37 {dimension_numbers = #tpu.dot_dimension_numbers<[1], [0], [0], [1], [0, 0, 1, 1], [], []>} : vector<34x32xbf16>, vector<32x96xbf16>, vector<34x96xf32> -> vector<34x96xf32>
    %63 = vector.broadcast %28 : vector<1x96xf32> to vector<34x96xf32>
    %64 = arith.addf %62, %63 : vector<34x96xf32>
    %65 = vector.extract_strided_slice %64 {offsets = [0, 0], sizes = [34, 32], strides = [1, 1]} : vector<34x96xf32> to vector<34x32xf32>
    %66 = arith.truncf %65 : vector<34x32xf32> to vector<34x32xbf16>
    %67 = vector.extract_strided_slice %64 {offsets = [0, 32], sizes = [34, 32], strides = [1, 1]} : vector<34x96xf32> to vector<34x32xf32>
    %68 = arith.truncf %67 : vector<34x32xf32> to vector<34x32xbf16>
    %69 = vector.extract_strided_slice %64 {offsets = [0, 64], sizes = [34, 32], strides = [1, 1]} : vector<34x96xf32> to vector<34x32xf32>
    %70 = arith.truncf %69 : vector<34x32xf32> to vector<34x32xbf16>
    %cst_38 = arith.constant 0.000000e+00 : f32
    %71 = vector.broadcast %cst_38 : f32 to vector<34x32xf32>
    %72 = vector.extract_strided_slice %66 {offsets = [0, 0], sizes = [34, 8], strides = [1, 1]} : vector<34x32xbf16> to vector<34x8xbf16>
    %73 = vector.extract_strided_slice %68 {offsets = [0, 0], sizes = [34, 8], strides = [1, 1]} : vector<34x32xbf16> to vector<34x8xbf16>
    %cst_39 = arith.constant dense<0.000000e+00> : vector<34x34xf32>
    %74 = tpu.matmul %72, %73, %cst_39 {dimension_numbers = #tpu.dot_dimension_numbers<[1], [1], [0], [0], [0, 0, 1, 0], [], []>} : vector<34x8xbf16>, vector<34x8xbf16>, vector<34x34xf32> -> vector<34x34xf32>
    %75 = arith.addf %74, %16 : vector<34x34xf32>
    %cst_40 = arith.constant dense<0xFF800000> : vector<34xf32>
    %76 = vector.multi_reduction <maximumf>, %75, %cst_40 [1] : vector<34x34xf32> to vector<34xf32>
    %77 = vector.shape_cast %76 : vector<34xf32> to vector<34x1xf32>
    %78 = vector.broadcast %77 : vector<34x1xf32> to vector<34x34xf32>
    %79 = arith.subf %75, %78 : vector<34x34xf32>
    %80 = math.exp %79 : vector<34x34xf32>
    %cst_41 = arith.constant dense<0.000000e+00> : vector<34xf32>
    %81 = vector.multi_reduction <add>, %80, %cst_41 [1] : vector<34x34xf32> to vector<34xf32>
    %82 = vector.shape_cast %81 : vector<34xf32> to vector<34x1xf32>
    %83 = tpu.reciprocal %82 {approx = true} : vector<34x1xf32> -> vector<34x1xf32>
    %84 = vector.broadcast %83 : vector<34x1xf32> to vector<34x34xf32>
    %85 = arith.mulf %80, %84 : vector<34x34xf32>
    %86 = arith.truncf %85 : vector<34x34xf32> to vector<34x34xbf16>
    %87 = vector.extract_strided_slice %70 {offsets = [0, 0], sizes = [34, 8], strides = [1, 1]} : vector<34x32xbf16> to vector<34x8xbf16>
    %cst_42 = arith.constant dense<0.000000e+00> : vector<34x8xf32>
    %88 = tpu.matmul %86, %87, %cst_42 {dimension_numbers = #tpu.dot_dimension_numbers<[1], [0], [0], [1], [0, 0, 1, 1], [], []>} : vector<34x34xbf16>, vector<34x8xbf16>, vector<34x8xf32> -> vector<34x8xf32>
    %89 = arith.truncf %88 : vector<34x8xf32> to vector<34x8xbf16>
    %90 = vector.extract_strided_slice %30 {offsets = [0, 0], sizes = [8, 32], strides = [1, 1]} : vector<32x32xbf16> to vector<8x32xbf16>
    %cst_43 = arith.constant dense<0.000000e+00> : vector<34x32xf32>
    %91 = tpu.matmul %89, %90, %cst_43 {dimension_numbers = #tpu.dot_dimension_numbers<[1], [0], [0], [1], [0, 0, 1, 1], [], []>} : vector<34x8xbf16>, vector<8x32xbf16>, vector<34x32xf32> -> vector<34x32xf32>
    %92 = arith.addf %71, %91 : vector<34x32xf32>
    %93 = vector.extract_strided_slice %66 {offsets = [0, 8], sizes = [34, 8], strides = [1, 1]} : vector<34x32xbf16> to vector<34x8xbf16>
    %94 = vector.extract_strided_slice %68 {offsets = [0, 8], sizes = [34, 8], strides = [1, 1]} : vector<34x32xbf16> to vector<34x8xbf16>
    %cst_44 = arith.constant dense<0.000000e+00> : vector<34x34xf32>
    %95 = tpu.matmul %93, %94, %cst_44 {dimension_numbers = #tpu.dot_dimension_numbers<[1], [1], [0], [0], [0, 0, 1, 0], [], []>} : vector<34x8xbf16>, vector<34x8xbf16>, vector<34x34xf32> -> vector<34x34xf32>
    %96 = arith.addf %95, %16 : vector<34x34xf32>
    %cst_45 = arith.constant dense<0xFF800000> : vector<34xf32>
    %97 = vector.multi_reduction <maximumf>, %96, %cst_45 [1] : vector<34x34xf32> to vector<34xf32>
    %98 = vector.shape_cast %97 : vector<34xf32> to vector<34x1xf32>
    %99 = vector.broadcast %98 : vector<34x1xf32> to vector<34x34xf32>
    %100 = arith.subf %96, %99 : vector<34x34xf32>
    %101 = math.exp %100 : vector<34x34xf32>
    %cst_46 = arith.constant dense<0.000000e+00> : vector<34xf32>
    %102 = vector.multi_reduction <add>, %101, %cst_46 [1] : vector<34x34xf32> to vector<34xf32>
    %103 = vector.shape_cast %102 : vector<34xf32> to vector<34x1xf32>
    %104 = tpu.reciprocal %103 {approx = true} : vector<34x1xf32> -> vector<34x1xf32>
    %105 = vector.broadcast %104 : vector<34x1xf32> to vector<34x34xf32>
    %106 = arith.mulf %101, %105 : vector<34x34xf32>
    %107 = arith.truncf %106 : vector<34x34xf32> to vector<34x34xbf16>
    %108 = vector.extract_strided_slice %70 {offsets = [0, 8], sizes = [34, 8], strides = [1, 1]} : vector<34x32xbf16> to vector<34x8xbf16>
    %cst_47 = arith.constant dense<0.000000e+00> : vector<34x8xf32>
    %109 = tpu.matmul %107, %108, %cst_47 {dimension_numbers = #tpu.dot_dimension_numbers<[1], [0], [0], [1], [0, 0, 1, 1], [], []>} : vector<34x34xbf16>, vector<34x8xbf16>, vector<34x8xf32> -> vector<34x8xf32>
    %110 = arith.truncf %109 : vector<34x8xf32> to vector<34x8xbf16>
    %111 = vector.extract_strided_slice %30 {offsets = [8, 0], sizes = [8, 32], strides = [1, 1]} : vector<32x32xbf16> to vector<8x32xbf16>
    %cst_48 = arith.constant dense<0.000000e+00> : vector<34x32xf32>
    %112 = tpu.matmul %110, %111, %cst_48 {dimension_numbers = #tpu.dot_dimension_numbers<[1], [0], [0], [1], [0, 0, 1, 1], [], []>} : vector<34x8xbf16>, vector<8x32xbf16>, vector<34x32xf32> -> vector<34x32xf32>
    %113 = arith.addf %92, %112 : vector<34x32xf32>
    %114 = vector.extract_strided_slice %66 {offsets = [0, 16], sizes = [34, 8], strides = [1, 1]} : vector<34x32xbf16> to vector<34x8xbf16>
    %115 = vector.extract_strided_slice %68 {offsets = [0, 16], sizes = [34, 8], strides = [1, 1]} : vector<34x32xbf16> to vector<34x8xbf16>
    %cst_49 = arith.constant dense<0.000000e+00> : vector<34x34xf32>
    %116 = tpu.matmul %114, %115, %cst_49 {dimension_numbers = #tpu.dot_dimension_numbers<[1], [1], [0], [0], [0, 0, 1, 0], [], []>} : vector<34x8xbf16>, vector<34x8xbf16>, vector<34x34xf32> -> vector<34x34xf32>
    %117 = arith.addf %116, %16 : vector<34x34xf32>
    %cst_50 = arith.constant dense<0xFF800000> : vector<34xf32>
    %118 = vector.multi_reduction <maximumf>, %117, %cst_50 [1] : vector<34x34xf32> to vector<34xf32>
    %119 = vector.shape_cast %118 : vector<34xf32> to vector<34x1xf32>
    %120 = vector.broadcast %119 : vector<34x1xf32> to vector<34x34xf32>
    %121 = arith.subf %117, %120 : vector<34x34xf32>
    %122 = math.exp %121 : vector<34x34xf32>
    %cst_51 = arith.constant dense<0.000000e+00> : vector<34xf32>
    %123 = vector.multi_reduction <add>, %122, %cst_51 [1] : vector<34x34xf32> to vector<34xf32>
    %124 = vector.shape_cast %123 : vector<34xf32> to vector<34x1xf32>
    %125 = tpu.reciprocal %124 {approx = true} : vector<34x1xf32> -> vector<34x1xf32>
    %126 = vector.broadcast %125 : vector<34x1xf32> to vector<34x34xf32>
    %127 = arith.mulf %122, %126 : vector<34x34xf32>
    %128 = arith.truncf %127 : vector<34x34xf32> to vector<34x34xbf16>
    %129 = vector.extract_strided_slice %70 {offsets = [0, 16], sizes = [34, 8], strides = [1, 1]} : vector<34x32xbf16> to vector<34x8xbf16>
    %cst_52 = arith.constant dense<0.000000e+00> : vector<34x8xf32>
    %130 = tpu.matmul %128, %129, %cst_52 {dimension_numbers = #tpu.dot_dimension_numbers<[1], [0], [0], [1], [0, 0, 1, 1], [], []>} : vector<34x34xbf16>, vector<34x8xbf16>, vector<34x8xf32> -> vector<34x8xf32>
    %131 = arith.truncf %130 : vector<34x8xf32> to vector<34x8xbf16>
    %132 = vector.extract_strided_slice %30 {offsets = [16, 0], sizes = [8, 32], strides = [1, 1]} : vector<32x32xbf16> to vector<8x32xbf16>
    %cst_53 = arith.constant dense<0.000000e+00> : vector<34x32xf32>
    %133 = tpu.matmul %131, %132, %cst_53 {dimension_numbers = #tpu.dot_dimension_numbers<[1], [0], [0], [1], [0, 0, 1, 1], [], []>} : vector<34x8xbf16>, vector<8x32xbf16>, vector<34x32xf32> -> vector<34x32xf32>
    %134 = arith.addf %113, %133 : vector<34x32xf32>
    %135 = vector.extract_strided_slice %66 {offsets = [0, 24], sizes = [34, 8], strides = [1, 1]} : vector<34x32xbf16> to vector<34x8xbf16>
    %136 = vector.extract_strided_slice %68 {offsets = [0, 24], sizes = [34, 8], strides = [1, 1]} : vector<34x32xbf16> to vector<34x8xbf16>
    %cst_54 = arith.constant dense<0.000000e+00> : vector<34x34xf32>
    %137 = tpu.matmul %135, %136, %cst_54 {dimension_numbers = #tpu.dot_dimension_numbers<[1], [1], [0], [0], [0, 0, 1, 0], [], []>} : vector<34x8xbf16>, vector<34x8xbf16>, vector<34x34xf32> -> vector<34x34xf32>
    %138 = arith.addf %137, %16 : vector<34x34xf32>
    %cst_55 = arith.constant dense<0xFF800000> : vector<34xf32>
    %139 = vector.multi_reduction <maximumf>, %138, %cst_55 [1] : vector<34x34xf32> to vector<34xf32>
    %140 = vector.shape_cast %139 : vector<34xf32> to vector<34x1xf32>
    %141 = vector.broadcast %140 : vector<34x1xf32> to vector<34x34xf32>
    %142 = arith.subf %138, %141 : vector<34x34xf32>
    %143 = math.exp %142 : vector<34x34xf32>
    %cst_56 = arith.constant dense<0.000000e+00> : vector<34xf32>
    %144 = vector.multi_reduction <add>, %143, %cst_56 [1] : vector<34x34xf32> to vector<34xf32>
    %145 = vector.shape_cast %144 : vector<34xf32> to vector<34x1xf32>
    %146 = tpu.reciprocal %145 {approx = true} : vector<34x1xf32> -> vector<34x1xf32>
    %147 = vector.broadcast %146 : vector<34x1xf32> to vector<34x34xf32>
    %148 = arith.mulf %143, %147 : vector<34x34xf32>
    %149 = arith.truncf %148 : vector<34x34xf32> to vector<34x34xbf16>
    %150 = vector.extract_strided_slice %70 {offsets = [0, 24], sizes = [34, 8], strides = [1, 1]} : vector<34x32xbf16> to vector<34x8xbf16>
    %cst_57 = arith.constant dense<0.000000e+00> : vector<34x8xf32>
    %151 = tpu.matmul %149, %150, %cst_57 {dimension_numbers = #tpu.dot_dimension_numbers<[1], [0], [0], [1], [0, 0, 1, 1], [], []>} : vector<34x34xbf16>, vector<34x8xbf16>, vector<34x8xf32> -> vector<34x8xf32>
    %152 = arith.truncf %151 : vector<34x8xf32> to vector<34x8xbf16>
    %153 = vector.extract_strided_slice %30 {offsets = [24, 0], sizes = [8, 32], strides = [1, 1]} : vector<32x32xbf16> to vector<8x32xbf16>
    %cst_58 = arith.constant dense<0.000000e+00> : vector<34x32xf32>
    %154 = tpu.matmul %152, %153, %cst_58 {dimension_numbers = #tpu.dot_dimension_numbers<[1], [0], [0], [1], [0, 0, 1, 1], [], []>} : vector<34x8xbf16>, vector<8x32xbf16>, vector<34x32xf32> -> vector<34x32xf32>
    %155 = arith.addf %134, %154 : vector<34x32xf32>
    %156 = arith.addf %15, %155 : vector<34x32xf32>
    %157 = vector.broadcast %21 : vector<1x32xf32> to vector<34x32xf32>
    %158 = arith.addf %156, %157 : vector<34x32xf32>
    %cst_59 = arith.constant dense<0.000000e+00> : vector<34xf32>
    %159 = vector.multi_reduction <add>, %158, %cst_59 [1] : vector<34x32xf32> to vector<34xf32>
    %160 = vector.shape_cast %159 : vector<34xf32> to vector<34x1xf32>
    %cst_60 = arith.constant 3.200000e+01 : f32
    %161 = vector.broadcast %cst_60 : f32 to vector<34x1xf32>
    %162 = arith.divf %160, %161 : vector<34x1xf32>
    %163 = vector.broadcast %162 : vector<34x1xf32> to vector<34x32xf32>
    %164 = arith.subf %158, %163 : vector<34x32xf32>
    %165 = vector.broadcast %162 : vector<34x1xf32> to vector<34x32xf32>
    %166 = arith.subf %158, %165 : vector<34x32xf32>
    %167 = arith.mulf %164, %166 : vector<34x32xf32>
    %cst_61 = arith.constant dense<0.000000e+00> : vector<34xf32>
    %168 = vector.multi_reduction <add>, %167, %cst_61 [1] : vector<34x32xf32> to vector<34xf32>
    %169 = vector.shape_cast %168 : vector<34xf32> to vector<34x1xf32>
    %cst_62 = arith.constant 3.200000e+01 : f32
    %170 = vector.broadcast %cst_62 : f32 to vector<34x1xf32>
    %171 = arith.divf %169, %170 : vector<34x1xf32>
    %172 = vector.broadcast %162 : vector<34x1xf32> to vector<34x32xf32>
    %173 = arith.subf %158, %172 : vector<34x32xf32>
    %cst_63 = arith.constant 9.99999997E-7 : f32
    %174 = vector.broadcast %cst_63 : f32 to vector<34x1xf32>
    %175 = arith.addf %171, %174 : vector<34x1xf32>
    %176 = math.rsqrt %175 : vector<34x1xf32>
    %177 = vector.broadcast %176 : vector<34x1xf32> to vector<34x32xf32>
    %178 = arith.mulf %173, %177 : vector<34x32xf32>
    %179 = vector.broadcast %22 : vector<1x32xf32> to vector<34x32xf32>
    %180 = arith.mulf %178, %179 : vector<34x32xf32>
    %181 = vector.broadcast %23 : vector<1x32xf32> to vector<34x32xf32>
    %182 = arith.addf %180, %181 : vector<34x32xf32>
    %183 = arith.truncf %182 : vector<34x32xf32> to vector<34x32xbf16>
    %cst_64 = arith.constant dense<0.000000e+00> : vector<34x64xf32>
    %184 = tpu.matmul %183, %32, %cst_64 {dimension_numbers = #tpu.dot_dimension_numbers<[1], [0], [0], [1], [0, 0, 1, 1], [], []>} : vector<34x32xbf16>, vector<32x64xbf16>, vector<34x64xf32> -> vector<34x64xf32>
    %185 = vector.broadcast %34 : vector<1x64xf32> to vector<34x64xf32>
    %186 = arith.addf %184, %185 : vector<34x64xf32>
    %cst_65 = arith.constant 5.000000e-01 : f32
    %187 = vector.broadcast %cst_65 : f32 to vector<34x64xf32>
    %188 = arith.mulf %187, %186 : vector<34x64xf32>
    %cst_66 = arith.constant 4.471500e-02 : f32
    %189 = vector.broadcast %cst_66 : f32 to vector<34x64xf32>
    %190 = arith.mulf %189, %186 : vector<34x64xf32>
    %191 = arith.mulf %190, %186 : vector<34x64xf32>
    %192 = arith.mulf %191, %186 : vector<34x64xf32>
    %193 = arith.addf %186, %192 : vector<34x64xf32>
    %cst_67 = arith.constant 0.797884583 : f32
    %194 = vector.broadcast %cst_67 : f32 to vector<34x64xf32>
    %195 = arith.mulf %194, %193 : vector<34x64xf32>
    %196 = math.tanh %195 : vector<34x64xf32>
    %cst_68 = arith.constant 1.000000e+00 : f32
    %197 = vector.broadcast %cst_68 : f32 to vector<34x64xf32>
    %198 = arith.addf %197, %196 : vector<34x64xf32>
    %199 = arith.mulf %188, %198 : vector<34x64xf32>
    %200 = arith.truncf %199 : vector<34x64xf32> to vector<34x64xbf16>
    %cst_69 = arith.constant dense<0.000000e+00> : vector<34x32xf32>
    %201 = tpu.matmul %200, %36, %cst_69 {dimension_numbers = #tpu.dot_dimension_numbers<[1], [0], [0], [1], [0, 0, 1, 1], [], []>} : vector<34x64xbf16>, vector<64x32xbf16>, vector<34x32xf32> -> vector<34x32xf32>
    %202 = arith.addf %158, %201 : vector<34x32xf32>
    %203 = vector.broadcast %24 : vector<1x32xf32> to vector<34x32xf32>
    %204 = arith.addf %202, %203 : vector<34x32xf32>
    %c1 = arith.constant 1 : index
    %c0_70 = arith.constant 0 : index
    %c0_71 = arith.constant 0 : index
    %205 = vector.load %arg9[%c1, %c0_70, %c0_71] : memref<2x6x32xf32, #tpu.memory_space<vmem>>, vector<1x6x32xf32>
    %206 = vector.shape_cast %205 : vector<1x6x32xf32> to vector<6x32xf32>
    %207 = vector.extract_strided_slice %206 {offsets = [0, 0], sizes = [1, 32], strides = [1, 1]} : vector<6x32xf32> to vector<1x32xf32>
    %208 = vector.extract_strided_slice %206 {offsets = [1, 0], sizes = [1, 32], strides = [1, 1]} : vector<6x32xf32> to vector<1x32xf32>
    %209 = vector.extract_strided_slice %206 {offsets = [2, 0], sizes = [1, 32], strides = [1, 1]} : vector<6x32xf32> to vector<1x32xf32>
    %210 = vector.extract_strided_slice %206 {offsets = [3, 0], sizes = [1, 32], strides = [1, 1]} : vector<6x32xf32> to vector<1x32xf32>
    %211 = vector.extract_strided_slice %206 {offsets = [4, 0], sizes = [1, 32], strides = [1, 1]} : vector<6x32xf32> to vector<1x32xf32>
    %212 = vector.extract_strided_slice %206 {offsets = [5, 0], sizes = [1, 32], strides = [1, 1]} : vector<6x32xf32> to vector<1x32xf32>
    %c1_72 = arith.constant 1 : index
    %c0_73 = arith.constant 0 : index
    %c0_74 = arith.constant 0 : index
    %213 = vector.load %arg6[%c1_72, %c0_73, %c0_74] : memref<2x32x96xbf16, #tpu.memory_space<vmem>>, vector<1x32x96xbf16>
    %214 = vector.shape_cast %213 : vector<1x32x96xbf16> to vector<32x96xbf16>
    %c1_75 = arith.constant 1 : index
    %c0_76 = arith.constant 0 : index
    %c0_77 = arith.constant 0 : index
    %215 = vector.load %arg7[%c1_75, %c0_76, %c0_77] : memref<2x1x96xf32, #tpu.memory_space<vmem>>, vector<1x1x96xf32>
    %216 = vector.shape_cast %215 : vector<1x1x96xf32> to vector<1x96xf32>
    %c1_78 = arith.constant 1 : index
    %c0_79 = arith.constant 0 : index
    %c0_80 = arith.constant 0 : index
    %217 = vector.load %arg8[%c1_78, %c0_79, %c0_80] : memref<2x32x32xbf16, #tpu.memory_space<vmem>>, vector<1x32x32xbf16>
    %218 = vector.shape_cast %217 : vector<1x32x32xbf16> to vector<32x32xbf16>
    %c1_81 = arith.constant 1 : index
    %c0_82 = arith.constant 0 : index
    %c0_83 = arith.constant 0 : index
    %219 = vector.load %arg10[%c1_81, %c0_82, %c0_83] : memref<2x32x64xbf16, #tpu.memory_space<vmem>>, vector<1x32x64xbf16>
    %220 = vector.shape_cast %219 : vector<1x32x64xbf16> to vector<32x64xbf16>
    %c1_84 = arith.constant 1 : index
    %c0_85 = arith.constant 0 : index
    %c0_86 = arith.constant 0 : index
    %221 = vector.load %arg11[%c1_84, %c0_85, %c0_86] : memref<2x1x64xf32, #tpu.memory_space<vmem>>, vector<1x1x64xf32>
    %222 = vector.shape_cast %221 : vector<1x1x64xf32> to vector<1x64xf32>
    %c1_87 = arith.constant 1 : index
    %c0_88 = arith.constant 0 : index
    %c0_89 = arith.constant 0 : index
    %223 = vector.load %arg12[%c1_87, %c0_88, %c0_89] : memref<2x64x32xbf16, #tpu.memory_space<vmem>>, vector<1x64x32xbf16>
    %224 = vector.shape_cast %223 : vector<1x64x32xbf16> to vector<64x32xbf16>
    %cst_90 = arith.constant dense<0.000000e+00> : vector<34xf32>
    %225 = vector.multi_reduction <add>, %204, %cst_90 [1] : vector<34x32xf32> to vector<34xf32>
    %226 = vector.shape_cast %225 : vector<34xf32> to vector<34x1xf32>
    %cst_91 = arith.constant 3.200000e+01 : f32
    %227 = vector.broadcast %cst_91 : f32 to vector<34x1xf32>
    %228 = arith.divf %226, %227 : vector<34x1xf32>
    %229 = vector.broadcast %228 : vector<34x1xf32> to vector<34x32xf32>
    %230 = arith.subf %204, %229 : vector<34x32xf32>
    %231 = vector.broadcast %228 : vector<34x1xf32> to vector<34x32xf32>
    %232 = arith.subf %204, %231 : vector<34x32xf32>
    %233 = arith.mulf %230, %232 : vector<34x32xf32>
    %cst_92 = arith.constant dense<0.000000e+00> : vector<34xf32>
    %234 = vector.multi_reduction <add>, %233, %cst_92 [1] : vector<34x32xf32> to vector<34xf32>
    %235 = vector.shape_cast %234 : vector<34xf32> to vector<34x1xf32>
    %cst_93 = arith.constant 3.200000e+01 : f32
    %236 = vector.broadcast %cst_93 : f32 to vector<34x1xf32>
    %237 = arith.divf %235, %236 : vector<34x1xf32>
    %238 = vector.broadcast %228 : vector<34x1xf32> to vector<34x32xf32>
    %239 = arith.subf %204, %238 : vector<34x32xf32>
    %cst_94 = arith.constant 9.99999997E-7 : f32
    %240 = vector.broadcast %cst_94 : f32 to vector<34x1xf32>
    %241 = arith.addf %237, %240 : vector<34x1xf32>
    %242 = math.rsqrt %241 : vector<34x1xf32>
    %243 = vector.broadcast %242 : vector<34x1xf32> to vector<34x32xf32>
    %244 = arith.mulf %239, %243 : vector<34x32xf32>
    %245 = vector.broadcast %207 : vector<1x32xf32> to vector<34x32xf32>
    %246 = arith.mulf %244, %245 : vector<34x32xf32>
    %247 = vector.broadcast %208 : vector<1x32xf32> to vector<34x32xf32>
    %248 = arith.addf %246, %247 : vector<34x32xf32>
    %249 = arith.truncf %248 : vector<34x32xf32> to vector<34x32xbf16>
    %cst_95 = arith.constant dense<0.000000e+00> : vector<34x96xf32>
    %250 = tpu.matmul %249, %214, %cst_95 {dimension_numbers = #tpu.dot_dimension_numbers<[1], [0], [0], [1], [0, 0, 1, 1], [], []>} : vector<34x32xbf16>, vector<32x96xbf16>, vector<34x96xf32> -> vector<34x96xf32>
    %251 = vector.broadcast %216 : vector<1x96xf32> to vector<34x96xf32>
    %252 = arith.addf %250, %251 : vector<34x96xf32>
    %253 = vector.extract_strided_slice %252 {offsets = [0, 0], sizes = [34, 32], strides = [1, 1]} : vector<34x96xf32> to vector<34x32xf32>
    %254 = arith.truncf %253 : vector<34x32xf32> to vector<34x32xbf16>
    %255 = vector.extract_strided_slice %252 {offsets = [0, 32], sizes = [34, 32], strides = [1, 1]} : vector<34x96xf32> to vector<34x32xf32>
    %256 = arith.truncf %255 : vector<34x32xf32> to vector<34x32xbf16>
    %257 = vector.extract_strided_slice %252 {offsets = [0, 64], sizes = [34, 32], strides = [1, 1]} : vector<34x96xf32> to vector<34x32xf32>
    %258 = arith.truncf %257 : vector<34x32xf32> to vector<34x32xbf16>
    %cst_96 = arith.constant 0.000000e+00 : f32
    %259 = vector.broadcast %cst_96 : f32 to vector<34x32xf32>
    %260 = vector.extract_strided_slice %254 {offsets = [0, 0], sizes = [34, 8], strides = [1, 1]} : vector<34x32xbf16> to vector<34x8xbf16>
    %261 = vector.extract_strided_slice %256 {offsets = [0, 0], sizes = [34, 8], strides = [1, 1]} : vector<34x32xbf16> to vector<34x8xbf16>
    %cst_97 = arith.constant dense<0.000000e+00> : vector<34x34xf32>
    %262 = tpu.matmul %260, %261, %cst_97 {dimension_numbers = #tpu.dot_dimension_numbers<[1], [1], [0], [0], [0, 0, 1, 0], [], []>} : vector<34x8xbf16>, vector<34x8xbf16>, vector<34x34xf32> -> vector<34x34xf32>
    %263 = arith.addf %262, %16 : vector<34x34xf32>
    %cst_98 = arith.constant dense<0xFF800000> : vector<34xf32>
    %264 = vector.multi_reduction <maximumf>, %263, %cst_98 [1] : vector<34x34xf32> to vector<34xf32>
    %265 = vector.shape_cast %264 : vector<34xf32> to vector<34x1xf32>
    %266 = vector.broadcast %265 : vector<34x1xf32> to vector<34x34xf32>
    %267 = arith.subf %263, %266 : vector<34x34xf32>
    %268 = math.exp %267 : vector<34x34xf32>
    %cst_99 = arith.constant dense<0.000000e+00> : vector<34xf32>
    %269 = vector.multi_reduction <add>, %268, %cst_99 [1] : vector<34x34xf32> to vector<34xf32>
    %270 = vector.shape_cast %269 : vector<34xf32> to vector<34x1xf32>
    %271 = tpu.reciprocal %270 {approx = true} : vector<34x1xf32> -> vector<34x1xf32>
    %272 = vector.broadcast %271 : vector<34x1xf32> to vector<34x34xf32>
    %273 = arith.mulf %268, %272 : vector<34x34xf32>
    %274 = arith.truncf %273 : vector<34x34xf32> to vector<34x34xbf16>
    %275 = vector.extract_strided_slice %258 {offsets = [0, 0], sizes = [34, 8], strides = [1, 1]} : vector<34x32xbf16> to vector<34x8xbf16>
    %cst_100 = arith.constant dense<0.000000e+00> : vector<34x8xf32>
    %276 = tpu.matmul %274, %275, %cst_100 {dimension_numbers = #tpu.dot_dimension_numbers<[1], [0], [0], [1], [0, 0, 1, 1], [], []>} : vector<34x34xbf16>, vector<34x8xbf16>, vector<34x8xf32> -> vector<34x8xf32>
    %277 = arith.truncf %276 : vector<34x8xf32> to vector<34x8xbf16>
    %278 = vector.extract_strided_slice %218 {offsets = [0, 0], sizes = [8, 32], strides = [1, 1]} : vector<32x32xbf16> to vector<8x32xbf16>
    %cst_101 = arith.constant dense<0.000000e+00> : vector<34x32xf32>
    %279 = tpu.matmul %277, %278, %cst_101 {dimension_numbers = #tpu.dot_dimension_numbers<[1], [0], [0], [1], [0, 0, 1, 1], [], []>} : vector<34x8xbf16>, vector<8x32xbf16>, vector<34x32xf32> -> vector<34x32xf32>
    %280 = arith.addf %259, %279 : vector<34x32xf32>
    %281 = vector.extract_strided_slice %254 {offsets = [0, 8], sizes = [34, 8], strides = [1, 1]} : vector<34x32xbf16> to vector<34x8xbf16>
    %282 = vector.extract_strided_slice %256 {offsets = [0, 8], sizes = [34, 8], strides = [1, 1]} : vector<34x32xbf16> to vector<34x8xbf16>
    %cst_102 = arith.constant dense<0.000000e+00> : vector<34x34xf32>
    %283 = tpu.matmul %281, %282, %cst_102 {dimension_numbers = #tpu.dot_dimension_numbers<[1], [1], [0], [0], [0, 0, 1, 0], [], []>} : vector<34x8xbf16>, vector<34x8xbf16>, vector<34x34xf32> -> vector<34x34xf32>
    %284 = arith.addf %283, %16 : vector<34x34xf32>
    %cst_103 = arith.constant dense<0xFF800000> : vector<34xf32>
    %285 = vector.multi_reduction <maximumf>, %284, %cst_103 [1] : vector<34x34xf32> to vector<34xf32>
    %286 = vector.shape_cast %285 : vector<34xf32> to vector<34x1xf32>
    %287 = vector.broadcast %286 : vector<34x1xf32> to vector<34x34xf32>
    %288 = arith.subf %284, %287 : vector<34x34xf32>
    %289 = math.exp %288 : vector<34x34xf32>
    %cst_104 = arith.constant dense<0.000000e+00> : vector<34xf32>
    %290 = vector.multi_reduction <add>, %289, %cst_104 [1] : vector<34x34xf32> to vector<34xf32>
    %291 = vector.shape_cast %290 : vector<34xf32> to vector<34x1xf32>
    %292 = tpu.reciprocal %291 {approx = true} : vector<34x1xf32> -> vector<34x1xf32>
    %293 = vector.broadcast %292 : vector<34x1xf32> to vector<34x34xf32>
    %294 = arith.mulf %289, %293 : vector<34x34xf32>
    %295 = arith.truncf %294 : vector<34x34xf32> to vector<34x34xbf16>
    %296 = vector.extract_strided_slice %258 {offsets = [0, 8], sizes = [34, 8], strides = [1, 1]} : vector<34x32xbf16> to vector<34x8xbf16>
    %cst_105 = arith.constant dense<0.000000e+00> : vector<34x8xf32>
    %297 = tpu.matmul %295, %296, %cst_105 {dimension_numbers = #tpu.dot_dimension_numbers<[1], [0], [0], [1], [0, 0, 1, 1], [], []>} : vector<34x34xbf16>, vector<34x8xbf16>, vector<34x8xf32> -> vector<34x8xf32>
    %298 = arith.truncf %297 : vector<34x8xf32> to vector<34x8xbf16>
    %299 = vector.extract_strided_slice %218 {offsets = [8, 0], sizes = [8, 32], strides = [1, 1]} : vector<32x32xbf16> to vector<8x32xbf16>
    %cst_106 = arith.constant dense<0.000000e+00> : vector<34x32xf32>
    %300 = tpu.matmul %298, %299, %cst_106 {dimension_numbers = #tpu.dot_dimension_numbers<[1], [0], [0], [1], [0, 0, 1, 1], [], []>} : vector<34x8xbf16>, vector<8x32xbf16>, vector<34x32xf32> -> vector<34x32xf32>
    %301 = arith.addf %280, %300 : vector<34x32xf32>
    %302 = vector.extract_strided_slice %254 {offsets = [0, 16], sizes = [34, 8], strides = [1, 1]} : vector<34x32xbf16> to vector<34x8xbf16>
    %303 = vector.extract_strided_slice %256 {offsets = [0, 16], sizes = [34, 8], strides = [1, 1]} : vector<34x32xbf16> to vector<34x8xbf16>
    %cst_107 = arith.constant dense<0.000000e+00> : vector<34x34xf32>
    %304 = tpu.matmul %302, %303, %cst_107 {dimension_numbers = #tpu.dot_dimension_numbers<[1], [1], [0], [0], [0, 0, 1, 0], [], []>} : vector<34x8xbf16>, vector<34x8xbf16>, vector<34x34xf32> -> vector<34x34xf32>
    %305 = arith.addf %304, %16 : vector<34x34xf32>
    %cst_108 = arith.constant dense<0xFF800000> : vector<34xf32>
    %306 = vector.multi_reduction <maximumf>, %305, %cst_108 [1] : vector<34x34xf32> to vector<34xf32>
    %307 = vector.shape_cast %306 : vector<34xf32> to vector<34x1xf32>
    %308 = vector.broadcast %307 : vector<34x1xf32> to vector<34x34xf32>
    %309 = arith.subf %305, %308 : vector<34x34xf32>
    %310 = math.exp %309 : vector<34x34xf32>
    %cst_109 = arith.constant dense<0.000000e+00> : vector<34xf32>
    %311 = vector.multi_reduction <add>, %310, %cst_109 [1] : vector<34x34xf32> to vector<34xf32>
    %312 = vector.shape_cast %311 : vector<34xf32> to vector<34x1xf32>
    %313 = tpu.reciprocal %312 {approx = true} : vector<34x1xf32> -> vector<34x1xf32>
    %314 = vector.broadcast %313 : vector<34x1xf32> to vector<34x34xf32>
    %315 = arith.mulf %310, %314 : vector<34x34xf32>
    %316 = arith.truncf %315 : vector<34x34xf32> to vector<34x34xbf16>
    %317 = vector.extract_strided_slice %258 {offsets = [0, 16], sizes = [34, 8], strides = [1, 1]} : vector<34x32xbf16> to vector<34x8xbf16>
    %cst_110 = arith.constant dense<0.000000e+00> : vector<34x8xf32>
    %318 = tpu.matmul %316, %317, %cst_110 {dimension_numbers = #tpu.dot_dimension_numbers<[1], [0], [0], [1], [0, 0, 1, 1], [], []>} : vector<34x34xbf16>, vector<34x8xbf16>, vector<34x8xf32> -> vector<34x8xf32>
    %319 = arith.truncf %318 : vector<34x8xf32> to vector<34x8xbf16>
    %320 = vector.extract_strided_slice %218 {offsets = [16, 0], sizes = [8, 32], strides = [1, 1]} : vector<32x32xbf16> to vector<8x32xbf16>
    %cst_111 = arith.constant dense<0.000000e+00> : vector<34x32xf32>
    %321 = tpu.matmul %319, %320, %cst_111 {dimension_numbers = #tpu.dot_dimension_numbers<[1], [0], [0], [1], [0, 0, 1, 1], [], []>} : vector<34x8xbf16>, vector<8x32xbf16>, vector<34x32xf32> -> vector<34x32xf32>
    %322 = arith.addf %301, %321 : vector<34x32xf32>
    %323 = vector.extract_strided_slice %254 {offsets = [0, 24], sizes = [34, 8], strides = [1, 1]} : vector<34x32xbf16> to vector<34x8xbf16>
    %324 = vector.extract_strided_slice %256 {offsets = [0, 24], sizes = [34, 8], strides = [1, 1]} : vector<34x32xbf16> to vector<34x8xbf16>
    %cst_112 = arith.constant dense<0.000000e+00> : vector<34x34xf32>
    %325 = tpu.matmul %323, %324, %cst_112 {dimension_numbers = #tpu.dot_dimension_numbers<[1], [1], [0], [0], [0, 0, 1, 0], [], []>} : vector<34x8xbf16>, vector<34x8xbf16>, vector<34x34xf32> -> vector<34x34xf32>
    %326 = arith.addf %325, %16 : vector<34x34xf32>
    %cst_113 = arith.constant dense<0xFF800000> : vector<34xf32>
    %327 = vector.multi_reduction <maximumf>, %326, %cst_113 [1] : vector<34x34xf32> to vector<34xf32>
    %328 = vector.shape_cast %327 : vector<34xf32> to vector<34x1xf32>
    %329 = vector.broadcast %328 : vector<34x1xf32> to vector<34x34xf32>
    %330 = arith.subf %326, %329 : vector<34x34xf32>
    %331 = math.exp %330 : vector<34x34xf32>
    %cst_114 = arith.constant dense<0.000000e+00> : vector<34xf32>
    %332 = vector.multi_reduction <add>, %331, %cst_114 [1] : vector<34x34xf32> to vector<34xf32>
    %333 = vector.shape_cast %332 : vector<34xf32> to vector<34x1xf32>
    %334 = tpu.reciprocal %333 {approx = true} : vector<34x1xf32> -> vector<34x1xf32>
    %335 = vector.broadcast %334 : vector<34x1xf32> to vector<34x34xf32>
    %336 = arith.mulf %331, %335 : vector<34x34xf32>
    %337 = arith.truncf %336 : vector<34x34xf32> to vector<34x34xbf16>
    %338 = vector.extract_strided_slice %258 {offsets = [0, 24], sizes = [34, 8], strides = [1, 1]} : vector<34x32xbf16> to vector<34x8xbf16>
    %cst_115 = arith.constant dense<0.000000e+00> : vector<34x8xf32>
    %339 = tpu.matmul %337, %338, %cst_115 {dimension_numbers = #tpu.dot_dimension_numbers<[1], [0], [0], [1], [0, 0, 1, 1], [], []>} : vector<34x34xbf16>, vector<34x8xbf16>, vector<34x8xf32> -> vector<34x8xf32>
    %340 = arith.truncf %339 : vector<34x8xf32> to vector<34x8xbf16>
    %341 = vector.extract_strided_slice %218 {offsets = [24, 0], sizes = [8, 32], strides = [1, 1]} : vector<32x32xbf16> to vector<8x32xbf16>
    %cst_116 = arith.constant dense<0.000000e+00> : vector<34x32xf32>
    %342 = tpu.matmul %340, %341, %cst_116 {dimension_numbers = #tpu.dot_dimension_numbers<[1], [0], [0], [1], [0, 0, 1, 1], [], []>} : vector<34x8xbf16>, vector<8x32xbf16>, vector<34x32xf32> -> vector<34x32xf32>
    %343 = arith.addf %322, %342 : vector<34x32xf32>
    %344 = arith.addf %204, %343 : vector<34x32xf32>
    %345 = vector.broadcast %209 : vector<1x32xf32> to vector<34x32xf32>
    %346 = arith.addf %344, %345 : vector<34x32xf32>
    %cst_117 = arith.constant dense<0.000000e+00> : vector<34xf32>
    %347 = vector.multi_reduction <add>, %346, %cst_117 [1] : vector<34x32xf32> to vector<34xf32>
    %348 = vector.shape_cast %347 : vector<34xf32> to vector<34x1xf32>
    %cst_118 = arith.constant 3.200000e+01 : f32
    %349 = vector.broadcast %cst_118 : f32 to vector<34x1xf32>
    %350 = arith.divf %348, %349 : vector<34x1xf32>
    %351 = vector.broadcast %350 : vector<34x1xf32> to vector<34x32xf32>
    %352 = arith.subf %346, %351 : vector<34x32xf32>
    %353 = vector.broadcast %350 : vector<34x1xf32> to vector<34x32xf32>
    %354 = arith.subf %346, %353 : vector<34x32xf32>
    %355 = arith.mulf %352, %354 : vector<34x32xf32>
    %cst_119 = arith.constant dense<0.000000e+00> : vector<34xf32>
    %356 = vector.multi_reduction <add>, %355, %cst_119 [1] : vector<34x32xf32> to vector<34xf32>
    %357 = vector.shape_cast %356 : vector<34xf32> to vector<34x1xf32>
    %cst_120 = arith.constant 3.200000e+01 : f32
    %358 = vector.broadcast %cst_120 : f32 to vector<34x1xf32>
    %359 = arith.divf %357, %358 : vector<34x1xf32>
    %360 = vector.broadcast %350 : vector<34x1xf32> to vector<34x32xf32>
    %361 = arith.subf %346, %360 : vector<34x32xf32>
    %cst_121 = arith.constant 9.99999997E-7 : f32
    %362 = vector.broadcast %cst_121 : f32 to vector<34x1xf32>
    %363 = arith.addf %359, %362 : vector<34x1xf32>
    %364 = math.rsqrt %363 : vector<34x1xf32>
    %365 = vector.broadcast %364 : vector<34x1xf32> to vector<34x32xf32>
    %366 = arith.mulf %361, %365 : vector<34x32xf32>
    %367 = vector.broadcast %210 : vector<1x32xf32> to vector<34x32xf32>
    %368 = arith.mulf %366, %367 : vector<34x32xf32>
    %369 = vector.broadcast %211 : vector<1x32xf32> to vector<34x32xf32>
    %370 = arith.addf %368, %369 : vector<34x32xf32>
    %371 = arith.truncf %370 : vector<34x32xf32> to vector<34x32xbf16>
    %cst_122 = arith.constant dense<0.000000e+00> : vector<34x64xf32>
    %372 = tpu.matmul %371, %220, %cst_122 {dimension_numbers = #tpu.dot_dimension_numbers<[1], [0], [0], [1], [0, 0, 1, 1], [], []>} : vector<34x32xbf16>, vector<32x64xbf16>, vector<34x64xf32> -> vector<34x64xf32>
    %373 = vector.broadcast %222 : vector<1x64xf32> to vector<34x64xf32>
    %374 = arith.addf %372, %373 : vector<34x64xf32>
    %cst_123 = arith.constant 5.000000e-01 : f32
    %375 = vector.broadcast %cst_123 : f32 to vector<34x64xf32>
    %376 = arith.mulf %375, %374 : vector<34x64xf32>
    %cst_124 = arith.constant 4.471500e-02 : f32
    %377 = vector.broadcast %cst_124 : f32 to vector<34x64xf32>
    %378 = arith.mulf %377, %374 : vector<34x64xf32>
    %379 = arith.mulf %378, %374 : vector<34x64xf32>
    %380 = arith.mulf %379, %374 : vector<34x64xf32>
    %381 = arith.addf %374, %380 : vector<34x64xf32>
    %cst_125 = arith.constant 0.797884583 : f32
    %382 = vector.broadcast %cst_125 : f32 to vector<34x64xf32>
    %383 = arith.mulf %382, %381 : vector<34x64xf32>
    %384 = math.tanh %383 : vector<34x64xf32>
    %cst_126 = arith.constant 1.000000e+00 : f32
    %385 = vector.broadcast %cst_126 : f32 to vector<34x64xf32>
    %386 = arith.addf %385, %384 : vector<34x64xf32>
    %387 = arith.mulf %376, %386 : vector<34x64xf32>
    %388 = arith.truncf %387 : vector<34x64xf32> to vector<34x64xbf16>
    %cst_127 = arith.constant dense<0.000000e+00> : vector<34x32xf32>
    %389 = tpu.matmul %388, %224, %cst_127 {dimension_numbers = #tpu.dot_dimension_numbers<[1], [0], [0], [1], [0, 0, 1, 1], [], []>} : vector<34x64xbf16>, vector<64x32xbf16>, vector<34x32xf32> -> vector<34x32xf32>
    %390 = arith.addf %346, %389 : vector<34x32xf32>
    %391 = vector.broadcast %212 : vector<1x32xf32> to vector<34x32xf32>
    %392 = arith.addf %390, %391 : vector<34x32xf32>
    %393 = vector.extract_strided_slice %392 {offsets = [0, 0], sizes = [1, 32], strides = [1, 1]} : vector<34x32xf32> to vector<1x32xf32>
    %394 = vector.extract_strided_slice %392 {offsets = [17, 0], sizes = [1, 32], strides = [1, 1]} : vector<34x32xf32> to vector<1x32xf32>
    %395 = tpu.concatenate %393, %394 in 0 : vector<1x32xf32>, vector<1x32xf32> -> vector<2x32xf32>
    %c0_128 = arith.constant 0 : index
    %c0_129 = arith.constant 0 : index
    %396 = vector.load %arg13[%c0_128, %c0_129] : memref<1x32xf32, #tpu.memory_space<vmem>>, vector<1x32xf32>
    %c0_130 = arith.constant 0 : index
    %c0_131 = arith.constant 0 : index
    %397 = vector.load %arg14[%c0_130, %c0_131] : memref<1x32xf32, #tpu.memory_space<vmem>>, vector<1x32xf32>
    %cst_132 = arith.constant dense<0.000000e+00> : vector<2xf32>
    %398 = vector.multi_reduction <add>, %395, %cst_132 [1] : vector<2x32xf32> to vector<2xf32>
    %399 = vector.shape_cast %398 : vector<2xf32> to vector<2x1xf32>
    %cst_133 = arith.constant 3.200000e+01 : f32
    %400 = vector.broadcast %cst_133 : f32 to vector<2x1xf32>
    %401 = arith.divf %399, %400 : vector<2x1xf32>
    %402 = vector.broadcast %401 : vector<2x1xf32> to vector<2x32xf32>
    %403 = arith.subf %395, %402 : vector<2x32xf32>
    %404 = vector.broadcast %401 : vector<2x1xf32> to vector<2x32xf32>
    %405 = arith.subf %395, %404 : vector<2x32xf32>
    %406 = arith.mulf %403, %405 : vector<2x32xf32>
    %cst_134 = arith.constant dense<0.000000e+00> : vector<2xf32>
    %407 = vector.multi_reduction <add>, %406, %cst_134 [1] : vector<2x32xf32> to vector<2xf32>
    %408 = vector.shape_cast %407 : vector<2xf32> to vector<2x1xf32>
    %cst_135 = arith.constant 3.200000e+01 : f32
    %409 = vector.broadcast %cst_135 : f32 to vector<2x1xf32>
    %410 = arith.divf %408, %409 : vector<2x1xf32>
    %411 = vector.broadcast %401 : vector<2x1xf32> to vector<2x32xf32>
    %412 = arith.subf %395, %411 : vector<2x32xf32>
    %cst_136 = arith.constant 9.99999997E-7 : f32
    %413 = vector.broadcast %cst_136 : f32 to vector<2x1xf32>
    %414 = arith.addf %410, %413 : vector<2x1xf32>
    %415 = math.rsqrt %414 : vector<2x1xf32>
    %416 = vector.broadcast %415 : vector<2x1xf32> to vector<2x32xf32>
    %417 = arith.mulf %412, %416 : vector<2x32xf32>
    %418 = vector.broadcast %396 : vector<1x32xf32> to vector<2x32xf32>
    %419 = arith.mulf %417, %418 : vector<2x32xf32>
    %420 = vector.broadcast %397 : vector<1x32xf32> to vector<2x32xf32>
    %421 = arith.addf %419, %420 : vector<2x32xf32>
    %c0_137 = arith.constant 0 : index
    %c0_138 = arith.constant 0 : index
    %422 = vector.load %arg15[%c0_137, %c0_138] : memref<32x16xf32, #tpu.memory_space<vmem>>, vector<32x16xf32>
    %cst_139 = arith.constant dense<0.000000e+00> : vector<2x16xf32>
    %423 = tpu.matmul %421, %422, %cst_139 {dimension_numbers = #tpu.dot_dimension_numbers<[1], [0], [0], [1], [0, 0, 1, 1], [], []>} : vector<2x32xf32>, vector<32x16xf32>, vector<2x16xf32> -> vector<2x16xf32>
    %c0_140 = arith.constant 0 : index
    %c0_141 = arith.constant 0 : index
    %424 = vector.load %arg16[%c0_140, %c0_141] : memref<1x16xf32, #tpu.memory_space<vmem>>, vector<1x16xf32>
    %425 = vector.broadcast %424 : vector<1x16xf32> to vector<2x16xf32>
    %426 = arith.addf %423, %425 : vector<2x16xf32>
    %c0_142 = arith.constant 0 : index
    %c0_143 = arith.constant 0 : index
    %427 = vector.load %arg17[%c0_142, %c0_143] : memref<2x16xf32, #tpu.memory_space<vmem>>, vector<2x16xf32>
    tpu.vector_store %arg17[%c0_142, %c0_143], %426 {strides = array<i32>} : memref<2x16xf32, #tpu.memory_space<vmem>>, vector<2x16xf32>,
    return
  }
}

</mosaic_0001>

<bundles_post_ra>
// kernel: tpu_custom_call.1
= control target key start
LH: loop header
LB: loop body
LE: loop exit
PB: predicated region body
PF: predicated region fallthrough
CT: control target
= control target key end

     0   :  { %s6382_s0 = inlined_call_operand.hbm [shape: bf16[32,48], index: 0, kind: input, shape index: {}]   ;;  %s6383_s1 = inlined_call_operand.vmem [shape: bf16[48,32], index: 1, kind: input, shape index: {}]   ;;  %s6384_s2 = inlined_call_operand.hbm [shape: f32[1,32], index: 2, kind: input, shape index: {}]   ;;  %s6385_s3 = inlined_call_operand.hbm [shape: f32[1,32], index: 3, kind: input, shape index: {}]   ;;  %s6386_s4 = inlined_call_operand.vmem [shape: f32[17,32], index: 4, kind: input, shape index: {}]   ;;  %s6387_s5 = inlined_call_operand.vmem [shape: f32[34,34], index: 5, kind: input, shape index: {}]   ;;  %s6388_s6 = inlined_call_operand.vmem [shape: bf16[2,32,96], index: 6, kind: input, shape index: {}]   ;;  %s6389_s7 = inlined_call_operand.hbm [shape: f32[2,1,96], index: 7, kind: input, shape index: {}]   ;;  %s6390_s8 = inlined_call_operand.vmem [shape: bf16[2,32,32], index: 8, kind: input, shape index: {}]   ;;  %s6391_s9 = inlined_call_operand.vmem [shape: f32[2,6,32], index: 9, kind: input, shape index: {}]   ;;  %s6392_s10 = inlined_call_operand.vmem [shape: bf16[2,32,64], index: 10, kind: input, shape index: {}]   ;;  %s6393_s11 = inlined_call_operand.vmem [shape: f32[2,1,64], index: 11, kind: input, shape index: {}]   ;;  %s6394_s12 = inlined_call_operand.vmem [shape: bf16[2,64,32], index: 12, kind: input, shape index: {}]   ;;  %s6395_s13 = inlined_call_operand.vmem [shape: f32[1,32], index: 13, kind: input, shape index: {}]   ;;  %s6396_s14 = inlined_call_operand.vmem [shape: f32[1,32], index: 14, kind: input, shape index: {}]   ;;  %s6397_s15 = inlined_call_operand.vmem [shape: f32[32,16], index: 15, kind: input, shape index: {}]   ;;  %s6398_s16 = inlined_call_operand.vmem [shape: f32[1,16], index: 16, kind: input, shape index: {}]   ;;  %s6399_s17 = inlined_call_operand.hbm [shape: f32[2,16], index: 17, kind: output, shape index: {}]  }
   0x1   :  { %6401 = sst [smem:[#allocation15_spill]] %s6382_s0 }
   0x2   :  { %6402 = sst [smem:[#allocation16_spill]] %s6383_s1 }
   0x3   :  { %22 = vsyncpa [#allocation3], 0 }
   0x4   :  { %23 = vsyncpa [#allocation6], 0 }
   0x5   :  { %24 = vsyncpa [#allocation9], 0 }
   0x6   :  { %25 = vsyncpa [#allocation4], 0  ;;  %s5024_s24 = smov [#allocation5]   ;;  %s5025_s26 = smov [#allocation2]  }
   0x7   :  { %s46_s25 = sshll.u32 %s5024_s24, 4  ;;  %s31_s27 = sshll.u32 %s5025_s26, 4  ;;  %s47_s25 = int_to_ptr.vmem [resolvable:$true] %s46_s25  ;;  %s32_s27 = int_to_ptr.vmem [resolvable:$true] %s31_s27 }
   0x8   :  { %s4924_s28 = scalar_lea.vmem %s47_s25, 16  ;;  %s4928_s29 = scalar_lea.vmem %s47_s25, 32 }
   0x9   :  { %p4925_p0 = scmp.ne.s32.totalorder %s47_s25, %s4924_s28  ;;  %p4929_p1 = scmp.lt.s32.totalorder %s47_s25, %s47_s25 }
   0xa   :  { %p4930_p2 = scmp.lt.s32.totalorder %s4928_s29, %s4924_s28 }
   0xc   :  { %p4931_p3 = por %p4930_p2, %p4929_p1 }
   0xe   :  { %p4932_p4 = pnand %p4931_p3, %p4925_p0 }
  0x10   :  { %4935 = shalt.err (!%p4932_p4)
}
  0x11   :  { %49 = dma.hbm_to_vmem [thread:$0]  %s6384_s2, 16, %s47_s25, [#allocation6]  }
  0x12   :  { %s4944_s18 = scalar_lea.vmem %s32_s27, 256  ;;  %p4949_p6 = scmp.lt.s32.totalorder %s32_s27, %s32_s27 }
  0x13   :  { %p4945_p5 = scmp.ne.s32.totalorder %s32_s27, %s4944_s18  ;;  %p4950_p7 = scmp.lt.s32.totalorder %s4944_s18, %s4944_s18 }
  0x15   :  { %p4951_p8 = por %p4950_p7, %p4949_p6 }
  0x17   :  { %p4952_p9 = pnand %p4951_p8, %p4945_p5 }
  0x19   :  { %4955 = shalt.err (!%p4952_p9)
}
  0x1a   :  { %s5026_s19 = smov 64   ;;  %s5027_s1 = smov 4  }
  0x1b   :  { %s6403_s22 = sld [smem:[#allocation15_spill]]  ;;  %s5028_s23 = smov [#allocation7]  }
  0x1c   :  { %s56_s24 = sshll.u32 %s5028_s23, 4  ;;  %s5029_s26 = smov [#allocation8]   ;;  %s57_s24 = int_to_ptr.vmem [resolvable:$true] %s56_s24 }
  0x1d   :  { %s71_s28 = sshll.u32 %s5029_s26, 4  ;;  %s4964_s2 = scalar_lea.vmem %s57_s24, 16  ;;  %s72_s28 = int_to_ptr.vmem [resolvable:$true] %s71_s28 }
  0x1e   :  { %p4965_p10 = scmp.ne.s32.totalorder %s57_s24, %s4964_s2  ;;  %s4968_s25 = scalar_lea.vmem %s57_s24, 32 }
  0x1f   :  { %p4969_p11 = scmp.lt.s32.totalorder %s57_s24, %s57_s24  ;;  %p4970_p12 = scmp.lt.s32.totalorder %s4968_s25, %s4964_s2 }
  0x21   :  { %37 = dma.hbm_to_vmem [thread:$0]  %s6403_s22, 256, %s32_s27, [#allocation3], %s5026_s19, %s5026_s19, %s5027_s1  }
  0x22   :  { %p4971_p13 = por %p4970_p12, %p4969_p11 }
  0x24   :  { %p4972_p0 = pnand %p4971_p13, %p4965_p10 }
  0x26   :  { %4975 = shalt.err (!%p4972_p0)
}
  0x27   :  { %59 = dma.hbm_to_vmem [thread:$0]  %s6385_s3, 16, %s57_s24, [#allocation6]  }
  0x28   :  { %s4984_s30 = scalar_lea.vmem %s72_s28, 32  ;;  %p4989_p2 = scmp.lt.s32.totalorder %s72_s28, %s72_s28 }
  0x29   :  { %p4985_p1 = scmp.ne.s32.totalorder %s72_s28, %s4984_s30  ;;  %p4990_p3 = scmp.lt.s32.totalorder %s4984_s30, %s4984_s30 }
  0x2b   :  { %p4991_p4 = por %p4990_p3, %p4989_p2 }
  0x2d   :  { %p4992_p5 = pnand %p4991_p4, %p4985_p1 }
  0x2f   :  { %4995 = shalt.err (!%p4992_p5)
}
  0x30   :  { %s5030_s27 = smov 16   ;;  %s5031_s18 = smov 1  }
  0x31   :  { %77 = dma.hbm_to_vmem [thread:$0]  %s6389_s7, 32, %s72_s28, [#allocation9], %s5030_s27, %s5030_s27, %s5031_s18  }
  0x32   :  { %5016 = dma.done.wait [#allocation3], 256  }
  0x33   :  { %5017 = vsyncadd [#allocation3], 4294967040 }
  0x34   :  { %5018 = dma.done.wait [#allocation6], 32  }
  0x35   :  { %5019 = vsyncadd [#allocation6], 4294967264 }
  0x36   :  { %5020 = dma.done.wait [#allocation9], 32  }
  0x37   :  { %5021 = vsyncadd [#allocation9], 4294967264  ;;  %s6404_s22 = sld [smem:[#allocation16_spill]]  ;;  %vm154_vm0 = vcmask 392192   ;;  %v4668_v2 = vld [vmem:[#allocation2] sm:$0xff]   ;;  %v4669_v4 = vld [vmem:[#allocation2 + $0x8] sm:$0xff]   ;;  %v240_v8 = vlaneseq }
  0x38   :  { %4123 = vmatprep.mubr.msk.bf16.mxu0 %vm154_vm0, %v4668_v2  ;;  %v210_v5 = vld [vmem:[%s6386_s4] sm:$0xff]  ;;  %v211_v6 = vld [vmem:[%s6386_s4 + $0x8] sm:$0xff]  ;;  %v212_v7 = vld [vmem:[%s6386_s4 + $0x10] sm:$0x1]  ;;  %vm218_vm1 = vcmask 1046528   ;;  %vm232_vm2 = vcmask 1040384  }
  0x39   :  { %v219_v10 = vrot.slane %v210_v5, 1  ;;  %v220_v11 = vrot.slane %v211_v6, 1  ;;  %v222_v12 = vrot.slane %v212_v7, 1  ;;  %v3801_v13 = vld [vmem:[#allocation5] ss:$0 sm:$0xff]  ;;  %v5167_v14 = vshrl.u32 %v240_v8, 7 }
  0x3a   :  { %v213_v16 = vld [vmem:[#allocation7] sm:$0x1]  ;;  %vm285_vm3 = vcmask 261120   ;;  %vm247_vm4 = vcmask 1041408   ;;  %vm298_vm5 = vcmask 254976   ;;  %v4670_v7 = vld [vmem:[%s6388_s6 + $0x8] sm:$0xff]  }
  0x3b   :  { %v221_v19 = vsel %vm218_vm1, %v219_v10, %v220_v11  ;;  %v223_v21 = vsel %vm218_vm1, %v220_v11, %v222_v12  ;;  %v214_v24 = vadd.f32 %v213_v16, %v210_v5  ;;  %v5170_v25 = vsub.s32 0, %v5167_v14  ;;  %s5034_s21 = smov 96   ;;  %s5035_s30 = smov 88  }
  0x3c   :  { %v5032_v8 = vmov 0.0   ;;  %vm5033_vm6 = vmmov 0   ;;  %vm469_vm7 = vcmask 64512   ;;  %vm544_vm8 = vcmask 277504   ;;  %s5036_s4 = smov 120   ;;  %s5037_s27 = smov 56  }
  0x3d   :  { %v4665_v0 = vld [vmem:[%s6404_s22 + $0x10] sm:$0xff]   ;;  %v4666_v1 = vld [vmem:[%s6404_s22 + $0x8] sm:$0xff]   ;;  %v4667_v3 = vld [vmem:[%s6404_s22] sm:$0xff]   ;;  %v243_v32 = vrot.slane %v214_v24, %v5170_v25  ;;  %4127 = vmatprep.subr.bf16.mxu1 %v5032_v8  ;;  %4131 = vmatprep.mubr.msk.bf16.mxu1 %vm5033_vm6, %v5032_v8  ;;  %vm557_vm9 = vcmask 271360   ;;  %s5038_s18 = smov 80   ;;  %s5039_s1 = smov 112  }
  0x3e   :  { %4117 = vmatprep.subr.bf16.mxu0 %v4665_v0  ;;  %4128 = vmatpush3.bf16.msra.mxu1 %v4670_v7  ;;  %vm915_vm10 = vcmask 1043456   ;;  %s5040_s24 = smov 48   ;;  %s5041_s7 = smov 72   ;;  %vm1890_vm11 = vcmask 523264   ;;  %vm3782_vm12 = vcmask 123904  }
  0x3f   :  { %4118 = vmatpush3.bf16.msra.mxu0 %v4665_v0  ;;  %4129 = vmatprep.subr.bf16.mxu1 %v5032_v8  ;;  %s5042_s26 = smov 104   ;;  %s5043_s25 = smov 40  }
  0x40   :  { %4119 = vmatprep.subr.bf16.mxu0 %v4666_v1 }
  0x43   :  { %4120 = vmatpush3.bf16.msra.mxu0 %v4666_v1 }
  0x44   :  { %4121 = vmatprep.subr.bf16.mxu0 %v4667_v3 }
  0x47   :  { %4122 = vmatpush3.bf16.msra.mxu0 %v4667_v3 }
  0x48   :  { %4161 = vmatprep.subr.bf16.mxu0 %v5032_v8 }
  0x4a   :  { %4124 = vmatmul.mubr.msk.bf16.vlgmr.msra.gmra.mxu0 %vm154_vm0, %v4669_v4 }
  0x4b   :  { %4167 = vmatprep.mubr.msk.bf16.mxu0 %vm5033_vm6, %v5032_v8 }
 0x10a   :  { %v4125_v9 = vpop.f32.mrf.mxu0 }
 0x10b   :  { %v204_v18 = vadd.f32 %v4125_v9, %v3801_v13  ;;  %v4671_v9 = vld [vmem:[%s6388_s6] sm:$0xff]  }
 0x10c   :  { %v195_v15 = vpop.f32.mrf.mxu0  ;;  %4130 = vmatpush3.bf16.msra.mxu1 %v4671_v9 }
 0x10d   :  { %v196_v17 = vadd.f32 %v3801_v13, %v195_v15  ;;  %v228_v29 = vadd.f32 %v221_v19, %v204_v18  ;;  %4143 = vmatprep.subr.bf16.mxu1 %v5032_v8 }
 0x10e   :  { %v4126_v20 = vpop.f32.mrf.mxu0 }
 0x10f   :  { %v226_v22 = vadd.f32 %v221_v19, %v196_v17  ;;  %v207_v23 = vadd.f32 %v4126_v20, %v3801_v13  ;;  %v248_v36 = vrot.slane %v228_v29, 6 }
 0x110   :  { %v198_v26 = vpop.f32.mrf.mxu0 }
 0x111   :  { %v233_v27 = vrot.slane %v226_v22, 7  ;;  %v199_v28 = vadd.f32 %v3801_v13, %v198_v26  ;;  %v229_v30 = vadd.f32 %v223_v21, %v207_v23 }
 0x113   :  { %v227_v31 = vadd.f32 %v223_v21, %v199_v28  ;;  %v5174_v33 = vsel %vm232_vm2, %v214_v24, %v233_v27  ;;  %v5178_v37 = vrot.slane %v229_v30, 6 }
 0x114   :  { %v286_v34 = vsel %vm285_vm3, %v5174_v33, 0.0 }
 0x115   :  { %v234_v35 = vrot.slane %v227_v31, 7  ;;  %287 = vadd.xlane.f32.xlu0 %v286_v34  ;;  %v5191_v43 = vsel %vm247_vm4, %v248_v36, %v5178_v37  ;;  %v299_v44 = vsel %vm298_vm5, %v5178_v37, 0.0  ;;  %v364_v31 = vsub.s32 1, %v5167_v14 }
 0x116   :  { %v295_v45 = vsel %vm285_vm3, %v5191_v43, 0.0 }
 0x117   :  { %v5181_v38 = vsel %vm232_vm2, %v233_v27, %v234_v35  ;;  %v255_v39 = vsel %vm232_vm2, %v234_v35, %v243_v32  ;;  %v262_v27 = vld [vmem:[%s6391_s9] sm:$0x3f] }
 0x118   :  { %v289_v40 = vsel %vm285_vm3, %v5181_v38, 0.0  ;;  %v5186_v41 = vsel %vm247_vm4, %v255_v39, %v248_v36  ;;  %v356_v29 = vrot.slane %v262_v27, %v5170_v25  ;;  %v365_v36 = vrot.slane %v262_v27, %v364_v31 }
 0x119   :  { %290 = vadd.xlane.f32.xlu0 %v289_v40  ;;  %v292_v42 = vsel %vm285_vm3, %v5186_v41, 0.0 }
 0x11a   :  { %293 = vadd.xlane.f32.xlu1 %v292_v42 }
 0x11d   :  { %300 = vadd.xlane.f32.xlu0 %v299_v44 }
 0x11e   :  { %296 = vadd.xlane.f32.xlu1 %v295_v45 }
 0x19e   :  { %v288_v46 = vpop.xlane.xlu0 %287 }
 0x19f   :  { %v303_v47 = vmul.f32 0.03125, %v288_v46 }
 0x1a1   :  { %v5198_v48 = vsub.f32 %v5174_v33, %v303_v47 }
 0x1a2   :  { %v291_v49 = vpop.xlane.xlu0 %290 }
 0x1a3   :  { %v304_v50 = vmul.f32 0.03125, %v291_v49  ;;  %v294_v51 = vpop.xlane.xlu1 %293  ;;  %v313_v52 = vmul.f32 %v5198_v48, %v5198_v48 }
 0x1a4   :  { %v305_v53 = vmul.f32 0.03125, %v294_v51 }
 0x1a5   :  { %v309_v54 = vsub.f32 %v5181_v38, %v304_v50  ;;  %v318_v55 = vsel %vm285_vm3, %v313_v52, 0.0 }
 0x1a6   :  { %v5205_v56 = vsub.f32 %v5186_v41, %v305_v53  ;;  %319 = vadd.xlane.f32.xlu1 %v318_v55  ;;  %v301_v57 = vpop.xlane.xlu0 %300 }
 0x1a7   :  { %v307_v58 = vmul.f32 0.03125, %v301_v57  ;;  %v297_v59 = vpop.xlane.xlu1 %296  ;;  %v314_v60 = vmul.f32 %v309_v54, %v309_v54 }
 0x1a8   :  { %v306_v61 = vmul.f32 0.03125, %v297_v59  ;;  %v315_v62 = vmul.f32 %v5205_v56, %v5205_v56 }
 0x1a9   :  { %v5210_v63 = vsub.f32 %v5178_v37, %v307_v58  ;;  %v321_v0 = vsel %vm285_vm3, %v314_v60, 0.0 }
 0x1aa   :  { %v311_v1 = vsub.f32 %v5191_v43, %v306_v61  ;;  %322 = vadd.xlane.f32.xlu0 %v321_v0  ;;  %v324_v2 = vsel %vm285_vm3, %v315_v62, 0.0 }
 0x1ab   :  { %325 = vadd.xlane.f32.xlu1 %v324_v2  ;;  %v317_v3 = vmul.f32 %v5210_v63, %v5210_v63 }
 0x1ac   :  { %v316_v4 = vmul.f32 %v311_v1, %v311_v1 }
 0x1ad   :  { %v330_v5 = vsel %vm298_vm5, %v317_v3, 0.0 }
 0x1ae   :  { %v327_v6 = vsel %vm285_vm3, %v316_v4, 0.0 }
 0x1af   :  { %328 = vadd.xlane.f32.xlu0 %v327_v6  ;;  %331 = vadd.xlane.f32.xlu1 %v330_v5 }
 0x22f   :  { %v320_v10 = vpop.xlane.xlu1 %319 }
 0x230   :  { %v333_v11 = vmul.f32 0.03125, %v320_v10 }
 0x232   :  { %v338_v12 = vadd.f32 1e-06, %v333_v11 }
 0x233   :  { %v323_v13 = vpop.xlane.xlu0 %322 }
 0x234   :  { %4686 = vrsqrt.f32 %v338_v12  ;;  %v334_v15 = vmul.f32 0.03125, %v323_v13  ;;  %v326_v16 = vpop.xlane.xlu1 %325 }
 0x235   :  { %v335_v17 = vmul.f32 0.03125, %v326_v16 }
 0x236   :  { %v339_v18 = vadd.f32 1e-06, %v334_v15 }
 0x237   :  { %v340_v19 = vadd.f32 1e-06, %v335_v17 }
 0x238   :  { %4688 = vrsqrt.f32 %v339_v18  ;;  %v332_v20 = vpop.xlane.xlu1 %331  ;;  %v329_v21 = vpop.xlane.xlu0 %328 }
 0x239   :  { %v337_v22 = vmul.f32 0.03125, %v332_v20  ;;  %v336_v23 = vmul.f32 0.03125, %v329_v21  ;;  %4690 = vrsqrt.f32 %v340_v19 }
 0x23b   :  { %v341_v24 = vadd.f32 1e-06, %v336_v23  ;;  %v342_v26 = vadd.f32 1e-06, %v337_v22 }
 0x23d   :  { %4692 = vrsqrt.f32 %v341_v24  ;;  %v5285_v24 = vld [vmem:[%s6387_s5] sm:$0xff] }
 0x23e   :  { %4694 = vrsqrt.f32 %v342_v26 }
 0x241   :  { %v4687_v28 = vpop.eup %4686 }
 0x242   :  { %v348_v30 = vmul.f32 %v4687_v28, %v5198_v48 }
 0x244   :  { %v357_v35 = vmul.f32 %v356_v29, %v348_v30 }
 0x245   :  { %v4689_v32 = vpop.eup %4688 }
 0x246   :  { %v349_v34 = vmul.f32 %v4689_v32, %v309_v54  ;;  %v4691_v39 = vpop.eup %4690  ;;  %v366_v42 = vadd.f32 %v365_v36, %v357_v35 }
 0x247   :  { %v350_v45 = vmul.f32 %v4691_v39, %v5205_v56 }
 0x248   :  { %v358_v40 = vmul.f32 %v356_v29, %v349_v34 }
 0x249   :  { %v359_v48 = vmul.f32 %v356_v29, %v350_v45  ;;  %v5305_v45 = vld [vmem:[%s6387_s5 + $0x18] sm:$0xff] }
 0x24a   :  { %v367_v44 = vadd.f32 %v365_v36, %v358_v40  ;;  %v4693_v46 = vpop.eup %4692 }
 0x24b   :  { %v351_v49 = vmul.f32 %v4693_v46, %v311_v1  ;;  %v4695_v50 = vpop.eup %4694  ;;  %v368_v54 = vadd.f32 %v365_v36, %v359_v48  ;;  %v3809_v1 = vld [vmem:[#allocation8] ss:$0 sm:$0xff]  ;;  %v5312_v48 = vld [vmem:[%s6387_s5 + $0x20] sm:$0x3] }
 0x24c   :  { %v371_v47 = vpack.c.bf16 %v367_v44, %v366_v42  ;;  %v352_v53 = vmul.f32 %v4695_v50, %v5210_v63 }
 0x24d   :  { %v360_v51 = vmul.f32 %v356_v29, %v351_v49 }
 0x24e   :  { %4132 = vmatmul.mubr.msk.bf16.vlgmr.msra.gmra.mxu1 %vm285_vm3, %v371_v47  ;;  %v361_v57 = vmul.f32 %v356_v29, %v352_v53  ;;  %v5291_v29 = vld [vmem:[%s6387_s5 + $0x8] sm:$0xff] }
 0x24f   :  { %4135 = vmatprep.mubr.msk.bf16.mxu1 %vm5033_vm6, %v5032_v8  ;;  %v369_v52 = vadd.f32 %v365_v36, %v360_v51 }
 0x250   :  { %v370_v56 = vadd.f32 %v365_v36, %v361_v57  ;;  %v5298_v36 = vld [vmem:[%s6387_s5 + $0x10] sm:$0xff] }
 0x251   :  { %v372_v55 = vpack.c.bf16 %v369_v52, %v368_v54 }
 0x252   :  { %v373_v58 = vpack.c.bf16 %v370_v56, %v370_v56 }
 0x256   :  { %4136 = vmatmul.mubr.msk.bf16.gmra.mxu1 %vm285_vm3, %v372_v55 }
 0x257   :  { %4139 = vmatprep.mubr.msk.bf16.mxu1 %vm5033_vm6, %v5032_v8 }
 0x25e   :  { %4140 = vmatmul.mubr.msk.bf16.gmra.mxu1 %vm285_vm3, %v373_v58 }
 0x25f   :  { %4149 = vmatprep.mubr.msk.bf16.mxu1 %vm5033_vm6, %v5032_v8 }
 0x30e   :  { %v435_v59 = vpop.f32.mrf.mxu1 }
 0x30f   :  { %v436_v10 = vadd.f32 %v3809_v1, %v435_v59 }
 0x310   :  { %v4133_v60 = vpop.f32.mrf.mxu1 }
 0x312   :  { %v438_v61 = vpop.f32.mrf.mxu1 }
 0x313   :  { %v439_v6 = vadd.f32 %v3809_v1, %v438_v61 }
 0x314   :  { %v4134_v62 = vpop.f32.mrf.mxu1 }
 0x315   :  { %v5256_v13 = vpack.c.bf16 %v439_v6, %v436_v10 }
 0x316   :  { %v443_v63 = vpop.f32.mrf.mxu1 }
 0x317   :  { %v444_v3 = vadd.f32 %v3809_v1, %v443_v63 }
 0x318   :  { %v4137_v0 = vpop.f32.mrf.mxu1 }
 0x31a   :  { %v446_v2 = vpop.f32.mrf.mxu1 }
 0x31b   :  { %v447_v4 = vadd.f32 %v3809_v1, %v446_v2 }
 0x31c   :  { %v4138_v5 = vpop.f32.mrf.mxu1 }
 0x31d   :  { %v5252_v7 = vpack.c.bf16 %v447_v4, %v444_v3 }
 0x31e   :  { %v451_v9 = vpop.f32.mrf.mxu1 }
 0x31f   :  { %v452_v11 = vadd.f32 %v3809_v1, %v451_v9  ;;  %465 = vrot.lane.b32.xlu1 %v5252_v7, %s5034_s21 }
 0x320   :  { %v4141_v12 = vpop.f32.mrf.mxu1 }
 0x321   :  { %v5258_v15 = vpack.c.bf16 %v452_v11, %v452_v11 }
 0x322   :  { %v454_v16 = vpop.f32.mrf.mxu1 }
 0x323   :  { %463 = vrot.lane.b32.xlu1 %v5256_v13, %s5034_s21  ;;  %467 = vrot.lane.b32.xlu0 %v5258_v15, %s5034_s21 }
 0x324   :  { %v4142_v17 = vpop.f32.mrf.mxu1 }
 0x391   :  { %v466_v20 = vpop.permute.xlu1 %465 }
 0x392   :  { %v483_v21 = vsel %vm469_vm7, %v466_v20, 0 }
 0x395   :  { %v468_v18 = vpop.permute.xlu0 %467  ;;  %v464_v22 = vpop.permute.xlu1 %463 }
 0x396   :  { %v486_v19 = vsel %vm469_vm7, %v468_v18, 0  ;;  %v480_v23 = vsel %vm469_vm7, %v464_v22, 0 }
 0x397   :  { %4144 = vmatpush3.bf16.xpose.msra.mxu1 %v486_v19 }
 0x398   :  { %4145 = vmatprep.subr.bf16.mxu1 %v5032_v8 }
 0x39f   :  { %4146 = vmatpush3.bf16.xpose.msra.mxu1 %v483_v21 }
 0x3a0   :  { %4147 = vmatprep.subr.bf16.mxu1 %v5032_v8 }
 0x3a7   :  { %4148 = vmatpush3.bf16.xpose.msra.mxu1 %v480_v23 }
 0x3a8   :  { %4197 = vmatprep.subr.bf16.mxu1 %v5032_v8 }
 0x3ae   :  { %4150 = vmatmul.mubr.msk.bf16.vlgmr.msra.gmra.mxu1 %vm469_vm7, %v5256_v13 }
 0x3af   :  { %4153 = vmatprep.mubr.msk.bf16.mxu1 %vm5033_vm6, %v5032_v8 }
 0x3b6   :  { %4154 = vmatmul.mubr.msk.bf16.gmra.mxu1 %vm469_vm7, %v5252_v7 }
 0x3b7   :  { %4157 = vmatprep.mubr.msk.bf16.mxu1 %vm5033_vm6, %v5032_v8 }
 0x3be   :  { %4158 = vmatmul.mubr.msk.bf16.gmra.mxu1 %vm469_vm7, %v5258_v15 }
 0x3bf   :  { %4203 = vmatprep.mubr.msk.bf16.mxu1 %vm5033_vm6, %v5032_v8 }
 0x46e   :  { %v522_v26 = vpop.f32.mrf.mxu1 }
 0x46f   :  { %v523_v27 = vadd.f32 %v522_v26, %v5285_v24 }
 0x470   :  { %v4151_v28 = vpop.f32.mrf.mxu1 }
 0x471   :  { %v545_v30 = vsel %vm544_vm8, %v523_v27, -inf }
 0x472   :  { %546 = vmax.xlane.f32.xlu1 %v545_v30  ;;  %v525_v32 = vpop.f32.mrf.mxu1 }
 0x473   :  { %v526_v34 = vadd.f32 %v525_v32, %v5291_v29 }
 0x474   :  { %v4152_v35 = vpop.f32.mrf.mxu1 }
 0x475   :  { %v548_v39 = vsel %vm544_vm8, %v526_v34, -inf }
 0x476   :  { %549 = vmax.xlane.f32.xlu0 %v548_v39  ;;  %v530_v40 = vpop.f32.mrf.mxu1 }
 0x477   :  { %v531_v42 = vadd.f32 %v530_v40, %v5298_v36 }
 0x478   :  { %v4155_v44 = vpop.f32.mrf.mxu1 }
 0x479   :  { %v551_v46 = vsel %vm544_vm8, %v531_v42, -inf }
 0x47a   :  { %552 = vmax.xlane.f32.xlu0 %v551_v46  ;;  %v533_v47 = vpop.f32.mrf.mxu1 }
 0x47b   :  { %v534_v49 = vadd.f32 %v533_v47, %v5305_v45 }
 0x47c   :  { %v4156_v50 = vpop.f32.mrf.mxu1 }
 0x47d   :  { %v554_v51 = vsel %vm544_vm8, %v534_v49, -inf }
 0x47e   :  { %555 = vmax.xlane.f32.xlu0 %v554_v51  ;;  %v538_v52 = vpop.f32.mrf.mxu1 }
 0x47f   :  { %v539_v53 = vadd.f32 %v538_v52, %v5312_v48 }
 0x480   :  { %v4159_v54 = vpop.f32.mrf.mxu1 }
 0x481   :  { %v558_v55 = vsel %vm557_vm9, %v539_v53, -inf }
 0x482   :  { %559 = vmax.xlane.f32.xlu1 %v558_v55  ;;  %v541_v57 = vpop.f32.mrf.mxu1 }
 0x484   :  { %v4160_v56 = vpop.f32.mrf.mxu1 }
 0x493   :  { %608 = vrot.lane.b32.xlu1 %v5258_v15, %s5026_s19 }
 0x4fb   :  { %v547_v58 = vpop.xlane.xlu1 %546 }
 0x4fc   :  { %v561_v59 = vsub.f32 %v523_v27, %v547_v58 }
 0x4fe   :  { %v566_v60 = vmul.f32 1.442695, %v561_v59 }
 0x4ff   :  { %v550_v61 = vpop.xlane.xlu0 %549 }
 0x500   :  { %4696 = vpow2.f32 %v566_v60  ;;  %v562_v62 = vsub.f32 %v526_v34, %v550_v61 }
 0x502   :  { %v568_v63 = vmul.f32 1.442695, %v562_v62 }
 0x503   :  { %v553_v0 = vpop.xlane.xlu0 %552 }
 0x504   :  { %4698 = vpow2.f32 %v568_v63  ;;  %v563_v1 = vsub.f32 %v531_v42, %v553_v0 }
 0x506   :  { %v570_v2 = vmul.f32 1.442695, %v563_v1 }
 0x507   :  { %v556_v17 = vpop.xlane.xlu0 %555 }
 0x508   :  { %4700 = vpow2.f32 %v570_v2  ;;  %v564_v18 = vsub.f32 %v534_v49, %v556_v17 }
 0x50a   :  { %v572_v20 = vmul.f32 1.442695, %v564_v18 }
 0x50b   :  { %v560_v3 = vpop.xlane.xlu1 %559 }
 0x50c   :  { %v565_v19 = vsub.f32 %v539_v53, %v560_v3  ;;  %4702 = vpow2.f32 %v572_v20 }
 0x50d   :  { %v4697_v4 = vpop.eup %4696 }
 0x50e   :  { %v576_v5 = vsel %vm544_vm8, %v4697_v4, 0.0  ;;  %v574_v21 = vmul.f32 1.442695, %v565_v19 }
 0x50f   :  { %577 = vadd.xlane.f32.xlu0 %v576_v5  ;;  %v609_v6 = vpop.permute.xlu1 %608 }
 0x510   :  { %v622_v9 = vsel %vm232_vm2, %v609_v6, 0  ;;  %4704 = vpow2.f32 %v574_v21 }
 0x511   :  { %v4699_v10 = vpop.eup %4698  ;;  %4162 = vmatpush3.bf16.msra.mxu0 %v622_v9 }
 0x512   :  { %v579_v11 = vsel %vm544_vm8, %v4699_v10, 0.0  ;;  %4163 = vmatprep.subr.bf16.mxu0 %v5032_v8 }
 0x513   :  { %580 = vadd.xlane.f32.xlu1 %v579_v11 }
 0x515   :  { %v5323_v12 = vpop.eup %4700 }
 0x516   :  { %v582_v16 = vsel %vm544_vm8, %v5323_v12, 0.0 }
 0x517   :  { %583 = vadd.xlane.f32.xlu0 %v582_v16 }
 0x519   :  { %v4703_v22 = vpop.eup %4702 }
 0x51a   :  { %v585_v26 = vsel %vm544_vm8, %v4703_v22, 0.0 }
 0x51d   :  { %v4705_v23 = vpop.eup %4704 }
 0x51e   :  { %v588_v27 = vsel %vm557_vm9, %v4705_v23, 0.0 }
 0x524   :  { %604 = vrot.lane.b32.xlu1 %v5256_v13, %s5026_s19 }
 0x528   :  { %693 = vrot.lane.b32.xlu1 %v5258_v15, %s5035_s30 }
 0x52d   :  { %606 = vrot.lane.b32.xlu0 %v5252_v7, %s5026_s19 }
 0x54c   :  { %586 = vadd.xlane.f32.xlu1 %v585_v26  ;;  %589 = vadd.xlane.f32.xlu0 %v588_v27 }
 0x55d   :  { %691 = vrot.lane.b32.xlu1 %v5252_v7, %s5035_s30 }
 0x561   :  { %683 = vrot.lane.b32.xlu1 %v5256_v13, %s5036_s4 }
 0x562   :  { %689 = vrot.lane.b32.xlu0 %v5256_v13, %s5035_s30 }
 0x565   :  { %687 = vrot.lane.b32.xlu1 %v5258_v15, %s5036_s4 }
 0x566   :  { %685 = vrot.lane.b32.xlu0 %v5252_v7, %s5036_s4 }
 0x598   :  { %v578_v28 = vpop.xlane.xlu0 %577 }
 0x599   :  { %4706 = vrcp.f32 %v578_v28 }
 0x59c   :  { %v581_v30 = vpop.xlane.xlu1 %580 }
 0x59d   :  { %4708 = vrcp.f32 %v581_v30 }
 0x5a0   :  { %v584_v32 = vpop.xlane.xlu0 %583  ;;  %v605_v35 = vpop.permute.xlu1 %604 }
 0x5a1   :  { %4710 = vrcp.f32 %v584_v32 }
 0x5a4   :  { %v607_v34 = vpop.permute.xlu0 %606  ;;  %v694_v46 = vpop.permute.xlu1 %693 }
 0x5a5   :  { %4164 = vmatpush3.bf16.msra.mxu0 %v607_v34  ;;  %v711_v49 = vsel %vm469_vm7, %v694_v46, 0 }
 0x5a6   :  { %4165 = vmatprep.subr.bf16.mxu0 %v5032_v8  ;;  %v4707_v39 = vpop.eup %4706 }
 0x5a7   :  { %v596_v42 = vmul.f32 %v4707_v39, %v4697_v4 }
 0x5a9   :  { %4166 = vmatpush3.bf16.msra.mxu0 %v605_v35 }
 0x5aa   :  { %v4709_v40 = vpop.eup %4708  ;;  %4179 = vmatprep.subr.bf16.mxu0 %v5032_v8 }
 0x5ab   :  { %v597_v44 = vmul.f32 %v4709_v40, %v4699_v10 }
 0x5ad   :  { %v601_v47 = vpack.c.bf16 %v597_v44, %v596_v42 }
 0x5ae   :  { %v4711_v55 = vpop.eup %4710 }
 0x5af   :  { %4168 = vmatmul.mubr.msk.bf16.vlgmr.msra.gmra.mxu0 %vm544_vm8, %v601_v47  ;;  %v598_v58 = vmul.f32 %v4711_v55, %v5323_v12 }
 0x5b0   :  { %4180 = vmatpush3.bf16.xpose.msra.mxu0 %v711_v49  ;;  %4171 = vmatprep.mubr.msk.bf16.mxu0 %vm5033_vm6, %v5032_v8 }
 0x5b1   :  { %4181 = vmatprep.subr.bf16.mxu0 %v5032_v8 }
 0x5d5   :  { %v587_v50 = vpop.xlane.xlu1 %586  ;;  %v590_v51 = vpop.xlane.xlu0 %589 }
 0x5d6   :  { %4712 = vrcp.f32 %v587_v50 }
 0x5d7   :  { %4714 = vrcp.f32 %v590_v51 }
 0x5d9   :  { %v692_v52 = vpop.permute.xlu1 %691  ;;  %v690_v54 = vpop.permute.xlu0 %689 }
 0x5da   :  { %v708_v53 = vsel %vm469_vm7, %v692_v52, 0  ;;  %v705_v57 = vsel %vm469_vm7, %v690_v54, 0 }
 0x5db   :  { %4182 = vmatpush3.bf16.xpose.msra.mxu0 %v708_v53 }
 0x5dc   :  { %4183 = vmatprep.subr.bf16.mxu0 %v5032_v8 }
 0x5dd   :  { %v684_v0 = vpop.permute.xlu1 %683  ;;  %v686_v1 = vpop.permute.xlu0 %685 }
 0x5e1   :  { %v688_v2 = vpop.permute.xlu1 %687 }
 0x5e3   :  { %4184 = vmatpush3.bf16.xpose.msra.mxu0 %v705_v57  ;;  %v4713_v56 = vpop.eup %4712 }
 0x5e4   :  { %4215 = vmatprep.subr.bf16.mxu0 %v5032_v8  ;;  %v599_v59 = vmul.f32 %v4713_v56, %v4703_v22  ;;  %v4715_v61 = vpop.eup %4714 }
 0x5e5   :  { %v600_v62 = vmul.f32 %v4715_v61, %v4705_v23 }
 0x5e6   :  { %v602_v60 = vpack.c.bf16 %v599_v59, %v598_v58 }
 0x5e7   :  { %v603_v63 = vpack.c.bf16 %v600_v62, %v600_v62 }
 0x5e8   :  { %4172 = vmatmul.mubr.msk.bf16.gmra.mxu0 %vm544_vm8, %v602_v60 }
 0x5e9   :  { %4175 = vmatprep.mubr.msk.bf16.mxu0 %vm5033_vm6, %v5032_v8 }
 0x5f0   :  { %4176 = vmatmul.mubr.msk.bf16.gmra.mxu0 %vm544_vm8, %v603_v63 }
 0x5f1   :  { %4185 = vmatprep.mubr.msk.bf16.mxu0 %vm5033_vm6, %v5032_v8 }
 0x5f8   :  { %4186 = vmatmul.mubr.msk.bf16.vlgmr.msra.gmra.mxu0 %vm469_vm7, %v684_v0 }
 0x5f9   :  { %4189 = vmatprep.mubr.msk.bf16.mxu0 %vm5033_vm6, %v5032_v8 }
 0x600   :  { %4190 = vmatmul.mubr.msk.bf16.gmra.mxu0 %vm469_vm7, %v686_v1 }
 0x601   :  { %4193 = vmatprep.mubr.msk.bf16.mxu0 %vm5033_vm6, %v5032_v8 }
 0x608   :  { %4194 = vmatmul.mubr.msk.bf16.gmra.mxu0 %vm469_vm7, %v688_v2 }
 0x609   :  { %4217 = vmatprep.mubr.msk.bf16.mxu0 %vm5033_vm6, %v5032_v8 }
 0x66f   :  { %v5372_v3 = vpop.f32.mrf.mxu0 }
 0x671   :  { %v4169_v4 = vpop.f32.mrf.mxu0 }
 0x673   :  { %v5374_v5 = vpop.f32.mrf.mxu0 }
 0x674   :  { %v680_v6 = vpack.c.bf16 %v5374_v5, %v5372_v3 }
 0x675   :  { %v4170_v9 = vpop.f32.mrf.mxu0 }
 0x6a8   :  { %v5378_v10 = vpop.f32.mrf.mxu0 }
 0x6aa   :  { %v4173_v11 = vpop.f32.mrf.mxu0 }
 0x6ac   :  { %v5380_v12 = vpop.f32.mrf.mxu0 }
 0x6ad   :  { %v681_v16 = vpack.c.bf16 %v5380_v12, %v5378_v10 }
 0x6ae   :  { %v4174_v17 = vpop.f32.mrf.mxu0 }
 0x6b0   :  { %v5384_v18 = vpop.f32.mrf.mxu0 }
 0x6b2   :  { %v4177_v19 = vpop.f32.mrf.mxu0 }
 0x6b4   :  { %v677_v20 = vpop.f32.mrf.mxu0 }
 0x6b6   :  { %v4178_v21 = vpop.f32.mrf.mxu0 }
 0x6b8   :  { %v747_v22 = vpop.f32.mrf.mxu0 }
 0x6b9   :  { %v748_v23 = vadd.f32 %v747_v22, %v5285_v24 }
 0x6ba   :  { %v4187_v26 = vpop.f32.mrf.mxu0 }
 0x6bb   :  { %v769_v27 = vsel %vm544_vm8, %v748_v23, -inf }
 0x6bc   :  { %770 = vmax.xlane.f32.xlu0 %v769_v27  ;;  %v750_v28 = vpop.f32.mrf.mxu0 }
 0x6bd   :  { %v751_v30 = vadd.f32 %v750_v28, %v5291_v29 }
 0x6be   :  { %v4188_v32 = vpop.f32.mrf.mxu0 }
 0x6bf   :  { %v772_v34 = vsel %vm544_vm8, %v751_v30, -inf }
 0x6c0   :  { %773 = vmax.xlane.f32.xlu1 %v772_v34  ;;  %v755_v35 = vpop.f32.mrf.mxu0 }
 0x6c1   :  { %v756_v39 = vadd.f32 %v755_v35, %v5298_v36 }
 0x6c2   :  { %v4191_v40 = vpop.f32.mrf.mxu0 }
 0x6c3   :  { %v775_v42 = vsel %vm544_vm8, %v756_v39, -inf }
 0x6c4   :  { %776 = vmax.xlane.f32.xlu0 %v775_v42  ;;  %v758_v44 = vpop.f32.mrf.mxu0 }
 0x6c5   :  { %v759_v46 = vadd.f32 %v758_v44, %v5305_v45 }
 0x6c6   :  { %v4192_v47 = vpop.f32.mrf.mxu0 }
 0x6c7   :  { %v778_v49 = vsel %vm544_vm8, %v759_v46, -inf }
 0x6c8   :  { %779 = vmax.xlane.f32.xlu0 %v778_v49  ;;  %v763_v50 = vpop.f32.mrf.mxu0 }
 0x6c9   :  { %v764_v51 = vadd.f32 %v763_v50, %v5312_v48 }
 0x6ca   :  { %v4195_v52 = vpop.f32.mrf.mxu0 }
 0x6cb   :  { %v781_v53 = vsel %vm557_vm9, %v764_v51, -inf }
 0x6cc   :  { %782 = vmax.xlane.f32.xlu0 %v781_v53  ;;  %v766_v54 = vpop.f32.mrf.mxu0 }
 0x6cd   :  { %v268_v54 = vld [vmem:[%s6390_s8] sm:$0xf] }
 0x6ce   :  { %v4196_v55 = vpop.f32.mrf.mxu0 }
 0x6d1   :  { %831 = vrot.lane.b32.xlu1 %v5258_v15, %s5037_s27 }
 0x745   :  { %v771_v57 = vpop.xlane.xlu0 %770 }
 0x746   :  { %v784_v56 = vsub.f32 %v748_v23, %v771_v57 }
 0x748   :  { %v789_v58 = vmul.f32 1.442695, %v784_v56 }
 0x749   :  { %v774_v59 = vpop.xlane.xlu1 %773 }
 0x74a   :  { %4716 = vpow2.f32 %v789_v58  ;;  %v785_v60 = vsub.f32 %v751_v30, %v774_v59  ;;  %v985_v58 = vsel %vm915_vm10, %v268_v54, 0 }
 0x74c   :  { %v791_v61 = vmul.f32 1.442695, %v785_v60 }
 0x74d   :  { %v777_v62 = vpop.xlane.xlu0 %776  ;;  %v832_v63 = vpop.permute.xlu1 %831 }
 0x74e   :  { %4718 = vpow2.f32 %v791_v61  ;;  %v786_v0 = vsub.f32 %v756_v39, %v777_v62  ;;  %v845_v1 = vsel %vm232_vm2, %v832_v63, 0  ;;  %v269_v39 = vld [vmem:[%s6390_s8 + $0x4] sm:$0xf] }
 0x74f   :  { %4198 = vmatpush3.bf16.msra.mxu1 %v845_v1  ;;  %v917_v40 = vsel %vm915_vm10, %v269_v39, 0 }
 0x750   :  { %v793_v2 = vmul.f32 1.442695, %v786_v0  ;;  %4199 = vmatprep.subr.bf16.mxu1 %v5032_v8  ;;  %4216 = vmatpush3.bf16.msra.mxu0 %v917_v40 }
 0x751   :  { %v780_v4 = vpop.xlane.xlu0 %779  ;;  %4243 = vmatprep.subr.bf16.mxu0 %v5032_v8 }
 0x752   :  { %4720 = vpow2.f32 %v793_v2  ;;  %v787_v9 = vsub.f32 %v759_v46, %v780_v4  ;;  %v682_v4 = vpack.c.bf16 %v5384_v18, %v5384_v18 }
 0x754   :  { %v795_v11 = vmul.f32 1.442695, %v787_v9 }
 0x755   :  { %v783_v17 = vpop.xlane.xlu0 %782 }
 0x756   :  { %4722 = vpow2.f32 %v795_v11  ;;  %v788_v19 = vsub.f32 %v764_v51, %v783_v17 }
 0x757   :  { %v4717_v20 = vpop.eup %4716 }
 0x758   :  { %v797_v21 = vmul.f32 1.442695, %v788_v19  ;;  %v799_v22 = vsel %vm544_vm8, %v4717_v20, 0.0 }
 0x759   :  { %800 = vadd.xlane.f32.xlu1 %v799_v22 }
 0x75a   :  { %4724 = vpow2.f32 %v797_v21 }
 0x75b   :  { %v4719_v23 = vpop.eup %4718 }
 0x75c   :  { %v802_v26 = vsel %vm544_vm8, %v4719_v23, 0.0 }
 0x75d   :  { %803 = vadd.xlane.f32.xlu0 %v802_v26 }
 0x75f   :  { %v4721_v27 = vpop.eup %4720 }
 0x760   :  { %v805_v28 = vsel %vm544_vm8, %v4721_v27, 0.0 }
 0x761   :  { %806 = vadd.xlane.f32.xlu1 %v805_v28 }
 0x763   :  { %v4723_v30 = vpop.eup %4722 }
 0x764   :  { %v808_v32 = vsel %vm544_vm8, %v4723_v30, 0.0 }
 0x765   :  { %809 = vadd.xlane.f32.xlu0 %v808_v32 }
 0x767   :  { %v4725_v34 = vpop.eup %4724 }
 0x768   :  { %v811_v35 = vsel %vm557_vm9, %v4725_v34, 0.0 }
 0x769   :  { %812 = vadd.xlane.f32.xlu0 %v811_v35 }
 0x772   :  { %827 = vrot.lane.b32.xlu1 %v5256_v13, %s5037_s27 }
 0x776   :  { %1053 = vrot.lane.b32.xlu1 %v5258_v15, %s5038_s18 }
 0x77a   :  { %1051 = vrot.lane.b32.xlu1 %v5252_v7, %s5038_s18 }
 0x77e   :  { %1049 = vrot.lane.b32.xlu1 %v5256_v13, %s5038_s18 }
 0x77f   :  { %829 = vrot.lane.b32.xlu0 %v5252_v7, %s5037_s27 }
 0x782   :  { %1045 = vrot.lane.b32.xlu1 %v5252_v7, %s5039_s1 }
 0x783   :  { %1043 = vrot.lane.b32.xlu0 %v5256_v13, %s5039_s1 }
 0x787   :  { %1047 = vrot.lane.b32.xlu0 %v5258_v15, %s5039_s1 }
 0x7e2   :  { %v801_v44 = vpop.xlane.xlu1 %800 }
 0x7e6   :  { %v804_v42 = vpop.xlane.xlu0 %803 }
 0x7e7   :  { %4726 = vrcp.f32 %v804_v42 }
 0x7e8   :  { %4728 = vrcp.f32 %v801_v44 }
 0x7ea   :  { %v807_v47 = vpop.xlane.xlu1 %806 }
 0x7ee   :  { %v810_v46 = vpop.xlane.xlu0 %809  ;;  %v828_v57 = vpop.permute.xlu1 %827 }
 0x7ef   :  { %4730 = vrcp.f32 %v810_v46 }
 0x7f0   :  { %4732 = vrcp.f32 %v807_v47 }
 0x7f2   :  { %v813_v49 = vpop.xlane.xlu0 %812 }
 0x7f3   :  { %4734 = vrcp.f32 %v813_v49 }
 0x7f4   :  { %v4727_v50 = vpop.eup %4726 }
 0x7f5   :  { %v4729_v52 = vpop.eup %4728  ;;  %v820_v53 = vmul.f32 %v4727_v50, %v4719_v23 }
 0x7f6   :  { %v830_v51 = vpop.permute.xlu0 %829  ;;  %v819_v55 = vmul.f32 %v4729_v52, %v4717_v20 }
 0x7f7   :  { %4200 = vmatpush3.bf16.msra.mxu1 %v830_v51 }
 0x7f8   :  { %4201 = vmatprep.subr.bf16.mxu1 %v5032_v8  ;;  %v824_v56 = vpack.c.bf16 %v820_v53, %v819_v55 }
 0x7fa   :  { %v1044_v42 = vpop.permute.xlu0 %1043 }
 0x7fb   :  { %4202 = vmatpush3.bf16.msra.mxu1 %v828_v57 }
 0x7fc   :  { %4229 = vmatprep.subr.bf16.mxu1 %v5032_v8  ;;  %v4731_v59 = vpop.eup %4730 }
 0x7fd   :  { %v4733_v60 = vpop.eup %4732  ;;  %v822_v61 = vmul.f32 %v4731_v59, %v4723_v30 }
 0x7fe   :  { %4204 = vmatmul.mubr.msk.bf16.vlgmr.msra.gmra.mxu1 %vm544_vm8, %v824_v56  ;;  %v821_v62 = vmul.f32 %v4733_v60, %v4721_v27  ;;  %v1048_v55 = vpop.permute.xlu0 %1047 }
 0x7ff   :  { %4207 = vmatprep.mubr.msk.bf16.mxu1 %vm5033_vm6, %v5032_v8  ;;  %4230 = vmatpush3.bf16.msra.mxu1 %v985_v58 }
 0x800   :  { %4261 = vmatprep.subr.bf16.mxu1 %v5032_v8  ;;  %v825_v63 = vpack.c.bf16 %v822_v61, %v821_v62  ;;  %v4735_v0 = vpop.eup %4734 }
 0x801   :  { %v823_v1 = vmul.f32 %v4735_v0, %v4725_v34 }
 0x803   :  { %v826_v2 = vpack.c.bf16 %v823_v1, %v823_v1 }
 0x806   :  { %4208 = vmatmul.mubr.msk.bf16.gmra.mxu1 %vm544_vm8, %v825_v63 }
 0x807   :  { %4211 = vmatprep.mubr.msk.bf16.mxu1 %vm5033_vm6, %v5032_v8 }
 0x80e   :  { %4212 = vmatmul.mubr.msk.bf16.gmra.mxu1 %vm544_vm8, %v826_v2 }
 0x80f   :  { %4231 = vmatprep.mubr.msk.bf16.mxu1 %vm5033_vm6, %v5032_v8 }
 0x816   :  { %4232 = vmatmul.mubr.msk.bf16.vlgmr.msra.gmra.mxu1 %vm469_vm7, %v680_v6  ;;  %v1054_v6 = vpop.permute.xlu1 %1053 }
 0x817   :  { %4235 = vmatprep.mubr.msk.bf16.mxu1 %vm5033_vm6, %v5032_v8  ;;  %v1071_v10 = vsel %vm469_vm7, %v1054_v6, 0 }
 0x81a   :  { %v1052_v18 = vpop.permute.xlu1 %1051 }
 0x81b   :  { %v1068_v22 = vsel %vm469_vm7, %v1052_v18, 0 }
 0x81e   :  { %4236 = vmatmul.mubr.msk.bf16.gmra.mxu1 %vm469_vm7, %v681_v16  ;;  %v1050_v27 = vpop.permute.xlu1 %1049 }
 0x81f   :  { %4239 = vmatprep.mubr.msk.bf16.mxu1 %vm5033_vm6, %v5032_v8  ;;  %v1065_v34 = vsel %vm469_vm7, %v1050_v27, 0 }
 0x822   :  { %v1046_v50 = vpop.permute.xlu1 %1045 }
 0x826   :  { %4240 = vmatmul.mubr.msk.bf16.gmra.mxu1 %vm469_vm7, %v682_v4 }
 0x827   :  { %4267 = vmatprep.mubr.msk.bf16.mxu1 %vm5033_vm6, %v5032_v8 }
 0x8be   :  { %v881_v3 = vpop.f32.mrf.mxu1 }
 0x8c0   :  { %v4205_v5 = vpop.f32.mrf.mxu1 }
 0x8c2   :  { %v884_v9 = vpop.f32.mrf.mxu1 }
 0x8c3   :  { %v903_v11 = vpack.c.bf16 %v884_v9, %v881_v3 }
 0x8c4   :  { %v4206_v17 = vpop.f32.mrf.mxu1 }
 0x8c5   :  { %4218 = vmatmul.mubr.msk.bf16.vlgmr.msra.gmra.mxu0 %vm469_vm7, %v903_v11 }
 0x8c6   :  { %4244 = vmatpush3.bf16.xpose.msra.mxu0 %v1071_v10  ;;  %v889_v12 = vpop.f32.mrf.mxu1  ;;  %4221 = vmatprep.mubr.msk.bf16.mxu0 %vm5033_vm6, %v5032_v8 }
 0x8c7   :  { %4245 = vmatprep.subr.bf16.mxu0 %v5032_v8 }
 0x8c8   :  { %v4209_v16 = vpop.f32.mrf.mxu1 }
 0x8ca   :  { %v892_v19 = vpop.f32.mrf.mxu1 }
 0x8cb   :  { %v904_v20 = vpack.c.bf16 %v892_v19, %v889_v12 }
 0x8cc   :  { %v4210_v21 = vpop.f32.mrf.mxu1 }
 0x8cd   :  { %4222 = vmatmul.mubr.msk.bf16.gmra.mxu0 %vm469_vm7, %v904_v20 }
 0x8ce   :  { %4246 = vmatpush3.bf16.xpose.msra.mxu0 %v1068_v22  ;;  %v897_v23 = vpop.f32.mrf.mxu1  ;;  %4225 = vmatprep.mubr.msk.bf16.mxu0 %vm5033_vm6, %v5032_v8 }
 0x8cf   :  { %4247 = vmatprep.subr.bf16.mxu0 %v5032_v8  ;;  %v905_v30 = vpack.c.bf16 %v897_v23, %v897_v23 }
 0x8d0   :  { %v4213_v26 = vpop.f32.mrf.mxu1 }
 0x8d2   :  { %v900_v28 = vpop.f32.mrf.mxu1 }
 0x8d4   :  { %v4214_v32 = vpop.f32.mrf.mxu1 }
 0x8d5   :  { %4226 = vmatmul.mubr.msk.bf16.gmra.mxu0 %vm469_vm7, %v905_v30 }
 0x8d6   :  { %4248 = vmatpush3.bf16.xpose.msra.mxu0 %v1065_v34  ;;  %v5471_v35 = vpop.f32.mrf.mxu1  ;;  %4249 = vmatprep.mubr.msk.bf16.mxu0 %vm5033_vm6, %v5032_v8 }
 0x8d7   :  { %4279 = vmatprep.subr.bf16.mxu0 %v5032_v8 }
 0x8d8   :  { %v4233_v39 = vpop.f32.mrf.mxu1 }
 0x8da   :  { %v5476_v40 = vpop.f32.mrf.mxu1 }
 0x8dc   :  { %v4234_v44 = vpop.f32.mrf.mxu1 }
 0x8dd   :  { %4250 = vmatmul.mubr.msk.bf16.vlgmr.msra.gmra.mxu0 %vm469_vm7, %v1044_v42 }
 0x8de   :  { %v5479_v46 = vpop.f32.mrf.mxu1  ;;  %4253 = vmatprep.mubr.msk.bf16.mxu0 %vm5033_vm6, %v5032_v8 }
 0x8e0   :  { %v4237_v47 = vpop.f32.mrf.mxu1 }
 0x8e2   :  { %v5483_v49 = vpop.f32.mrf.mxu1 }
 0x8e4   :  { %v4238_v51 = vpop.f32.mrf.mxu1 }
 0x8e5   :  { %4254 = vmatmul.mubr.msk.bf16.gmra.mxu0 %vm469_vm7, %v1046_v50 }
 0x8e6   :  { %v5486_v52 = vpop.f32.mrf.mxu1  ;;  %4257 = vmatprep.mubr.msk.bf16.mxu0 %vm5033_vm6, %v5032_v8 }
 0x8e8   :  { %v4241_v53 = vpop.f32.mrf.mxu1 }
 0x8ea   :  { %v1040_v54 = vpop.f32.mrf.mxu1 }
 0x8ec   :  { %v4242_v57 = vpop.f32.mrf.mxu1 }
 0x8ed   :  { %4258 = vmatmul.mubr.msk.bf16.gmra.mxu0 %vm469_vm7, %v1048_v55 }
 0x8ee   :  { %4281 = vmatprep.mubr.msk.bf16.mxu0 %vm5033_vm6, %v5032_v8 }
 0x985   :  { %v5493_v56 = vpop.f32.mrf.mxu0 }
 0x987   :  { %v4219_v58 = vpop.f32.mrf.mxu0 }
 0x989   :  { %v5495_v59 = vpop.f32.mrf.mxu0 }
 0x98b   :  { %v4220_v60 = vpop.f32.mrf.mxu0 }
 0x98d   :  { %v5497_v61 = vpop.f32.mrf.mxu0 }
 0x98f   :  { %v4223_v62 = vpop.f32.mrf.mxu0 }
 0x991   :  { %v5499_v63 = vpop.f32.mrf.mxu0 }
 0x993   :  { %v4224_v0 = vpop.f32.mrf.mxu0 }
 0x995   :  { %v5501_v1 = vpop.f32.mrf.mxu0 }
 0x997   :  { %v4227_v2 = vpop.f32.mrf.mxu0 }
 0x999   :  { %v972_v4 = vpop.f32.mrf.mxu0 }
 0x99b   :  { %v4228_v3 = vpop.f32.mrf.mxu0 }
 0x99d   :  { %v1107_v5 = vpop.f32.mrf.mxu0 }
 0x99e   :  { %v1108_v6 = vadd.f32 %v1107_v5, %v5285_v24 }
 0x99f   :  { %v4251_v9 = vpop.f32.mrf.mxu0 }
 0x9a0   :  { %v1129_v11 = vsel %vm544_vm8, %v1108_v6, -inf }
 0x9a1   :  { %1130 = vmax.xlane.f32.xlu1 %v1129_v11  ;;  %v1110_v17 = vpop.f32.mrf.mxu0 }
 0x9a2   :  { %v1111_v10 = vadd.f32 %v1110_v17, %v5291_v29 }
 0x9a3   :  { %v4252_v12 = vpop.f32.mrf.mxu0 }
 0x9a4   :  { %v1132_v16 = vsel %vm544_vm8, %v1111_v10, -inf }
 0x9a5   :  { %1133 = vmax.xlane.f32.xlu0 %v1132_v16  ;;  %v1115_v18 = vpop.f32.mrf.mxu0 }
 0x9a6   :  { %v1116_v19 = vadd.f32 %v1115_v18, %v5298_v36 }
 0x9a7   :  { %v4255_v20 = vpop.f32.mrf.mxu0 }
 0x9a8   :  { %v1135_v21 = vsel %vm544_vm8, %v1116_v19, -inf }
 0x9a9   :  { %1136 = vmax.xlane.f32.xlu0 %v1135_v21  ;;  %v1118_v22 = vpop.f32.mrf.mxu0 }
 0x9aa   :  { %v1119_v23 = vadd.f32 %v1118_v22, %v5305_v45 }
 0x9ab   :  { %v4256_v26 = vpop.f32.mrf.mxu0 }
 0x9ac   :  { %v1138_v27 = vsel %vm544_vm8, %v1119_v23, -inf }
 0x9ad   :  { %1139 = vmax.xlane.f32.xlu0 %v1138_v27  ;;  %v1123_v28 = vpop.f32.mrf.mxu0 }
 0x9ae   :  { %v1124_v30 = vadd.f32 %v1123_v28, %v5312_v48 }
 0x9af   :  { %v4259_v32 = vpop.f32.mrf.mxu0 }
 0x9b0   :  { %v1141_v34 = vsel %vm557_vm9, %v1124_v30, -inf }
 0x9b1   :  { %1142 = vmax.xlane.f32.xlu1 %v1141_v34  ;;  %v1126_v39 = vpop.f32.mrf.mxu0 }
 0x9b3   :  { %v4260_v42 = vpop.f32.mrf.mxu0 }
 0x9c2   :  { %1191 = vrot.lane.b32.xlu1 %v5258_v15, %s5040_s24 }
 0xa2a   :  { %v1131_v44 = vpop.xlane.xlu1 %1130 }
 0xa2b   :  { %v1144_v47 = vsub.f32 %v1108_v6, %v1131_v44 }
 0xa2d   :  { %v1149_v50 = vmul.f32 1.442695, %v1144_v47 }
 0xa2e   :  { %v1134_v51 = vpop.xlane.xlu0 %1133 }
 0xa2f   :  { %4736 = vpow2.f32 %v1149_v50  ;;  %v1145_v53 = vsub.f32 %v1111_v10, %v1134_v51 }
 0xa31   :  { %v1151_v54 = vmul.f32 1.442695, %v1145_v53 }
 0xa32   :  { %v1137_v55 = vpop.xlane.xlu0 %1136 }
 0xa33   :  { %4738 = vpow2.f32 %v1151_v54  ;;  %v1146_v57 = vsub.f32 %v1116_v19, %v1137_v55 }
 0xa35   :  { %v1153_v58 = vmul.f32 1.442695, %v1146_v57 }
 0xa36   :  { %v1140_v11 = vpop.xlane.xlu0 %1139 }
 0xa37   :  { %4740 = vpow2.f32 %v1153_v58  ;;  %v1147_v17 = vsub.f32 %v1119_v23, %v1140_v11 }
 0xa39   :  { %v1155_v12 = vmul.f32 1.442695, %v1147_v17 }
 0xa3a   :  { %v1143_v60 = vpop.xlane.xlu1 %1142 }
 0xa3b   :  { %v1148_v10 = vsub.f32 %v1124_v30, %v1143_v60  ;;  %4742 = vpow2.f32 %v1155_v12 }
 0xa3c   :  { %v4737_v62 = vpop.eup %4736 }
 0xa3d   :  { %v1159_v0 = vsel %vm544_vm8, %v4737_v62, 0.0  ;;  %v1157_v16 = vmul.f32 1.442695, %v1148_v10 }
 0xa3e   :  { %1160 = vadd.xlane.f32.xlu0 %v1159_v0  ;;  %v1192_v2 = vpop.permute.xlu1 %1191 }
 0xa3f   :  { %v1205_v4 = vsel %vm232_vm2, %v1192_v2, 0  ;;  %4744 = vpow2.f32 %v1157_v16 }
 0xa40   :  { %v4739_v3 = vpop.eup %4738  ;;  %4262 = vmatpush3.bf16.msra.mxu1 %v1205_v4 }
 0xa41   :  { %v1162_v5 = vsel %vm544_vm8, %v4739_v3, 0.0  ;;  %4263 = vmatprep.subr.bf16.mxu1 %v5032_v8 }
 0xa42   :  { %1163 = vadd.xlane.f32.xlu1 %v1162_v5 }
 0xa44   :  { %v5519_v6 = vpop.eup %4740 }
 0xa45   :  { %v1165_v9 = vsel %vm544_vm8, %v5519_v6, 0.0 }
 0xa46   :  { %1166 = vadd.xlane.f32.xlu0 %v1165_v9  ;;  %v270_v9 = vld [vmem:[%s6390_s8 + $0x8] sm:$0xf] }
 0xa48   :  { %v4743_v18 = vpop.eup %4742 }
 0xa49   :  { %v1168_v20 = vsel %vm544_vm8, %v4743_v18, 0.0 }
 0xa4c   :  { %v4745_v19 = vpop.eup %4744 }
 0xa4d   :  { %v1171_v21 = vsel %vm557_vm9, %v4745_v19, 0.0 }
 0xa53   :  { %1187 = vrot.lane.b32.xlu1 %v5256_v13, %s5040_s24 }
 0xa57   :  { %1349 = vrot.lane.b32.xlu1 %v5258_v15, %s5041_s7 }
 0xa5c   :  { %1189 = vrot.lane.b32.xlu0 %v5252_v7, %s5040_s24 }
 0xa7b   :  { %1169 = vadd.xlane.f32.xlu1 %v1168_v20  ;;  %1172 = vadd.xlane.f32.xlu0 %v1171_v21 }
 0xa8c   :  { %1347 = vrot.lane.b32.xlu1 %v5252_v7, %s5041_s7 }
 0xa90   :  { %1339 = vrot.lane.b32.xlu1 %v5256_v13, %s5042_s26 }
 0xa91   :  { %1345 = vrot.lane.b32.xlu0 %v5256_v13, %s5041_s7 }
 0xa94   :  { %1343 = vrot.lane.b32.xlu1 %v5258_v15, %s5042_s26 }
 0xa95   :  { %1341 = vrot.lane.b32.xlu0 %v5252_v7, %s5042_s26 }
 0xac7   :  { %v1161_v22 = vpop.xlane.xlu0 %1160 }
 0xac8   :  { %4746 = vrcp.f32 %v1161_v22 }
 0xacb   :  { %v1164_v23 = vpop.xlane.xlu1 %1163 }
 0xacc   :  { %4748 = vrcp.f32 %v1164_v23 }
 0xacf   :  { %v1167_v26 = vpop.xlane.xlu0 %1166  ;;  %v1188_v28 = vpop.permute.xlu1 %1187 }
 0xad0   :  { %4750 = vrcp.f32 %v1167_v26 }
 0xad3   :  { %v1190_v27 = vpop.permute.xlu0 %1189  ;;  %v1350_v42 = vpop.permute.xlu1 %1349 }
 0xad4   :  { %4264 = vmatpush3.bf16.msra.mxu1 %v1190_v27  ;;  %v1367_v47 = vsel %vm469_vm7, %v1350_v42, 0 }
 0xad5   :  { %4265 = vmatprep.subr.bf16.mxu1 %v5032_v8  ;;  %v4747_v30 = vpop.eup %4746 }
 0xad6   :  { %v1179_v34 = vmul.f32 %v4747_v30, %v4737_v62 }
 0xad8   :  { %4266 = vmatpush3.bf16.msra.mxu1 %v1188_v28 }
 0xad9   :  { %v4749_v32 = vpop.eup %4748  ;;  %4293 = vmatprep.subr.bf16.mxu1 %v5032_v8 }
 0xada   :  { %v1180_v39 = vmul.f32 %v4749_v32, %v4739_v3 }
 0xadc   :  { %v1184_v44 = vpack.c.bf16 %v1180_v39, %v1179_v34 }
 0xadd   :  { %v4751_v57 = vpop.eup %4750 }
 0xade   :  { %4268 = vmatmul.mubr.msk.bf16.vlgmr.msra.gmra.mxu1 %vm544_vm8, %v1184_v44  ;;  %v1181_v62 = vmul.f32 %v4751_v57, %v5519_v6  ;;  %v1276_v6 = vsel %vm915_vm10, %v270_v9, 0 }
 0xadf   :  { %4294 = vmatpush3.bf16.xpose.msra.mxu1 %v1367_v47  ;;  %4271 = vmatprep.mubr.msk.bf16.mxu1 %vm5033_vm6, %v5032_v8 }
 0xae0   :  { %4295 = vmatprep.subr.bf16.mxu1 %v5032_v8  ;;  %4280 = vmatpush3.bf16.msra.mxu0 %v1276_v6 }
 0xae1   :  { %4311 = vmatprep.subr.bf16.mxu0 %v5032_v8 }
 0xb04   :  { %v1170_v50 = vpop.xlane.xlu1 %1169  ;;  %v1173_v51 = vpop.xlane.xlu0 %1172 }
 0xb05   :  { %4752 = vrcp.f32 %v1170_v50 }
 0xb06   :  { %4754 = vrcp.f32 %v1173_v51 }
 0xb08   :  { %v1348_v53 = vpop.permute.xlu1 %1347  ;;  %v1346_v55 = vpop.permute.xlu0 %1345 }
 0xb09   :  { %v1364_v54 = vsel %vm469_vm7, %v1348_v53, 0  ;;  %v1361_v58 = vsel %vm469_vm7, %v1346_v55, 0 }
 0xb0a   :  { %4296 = vmatpush3.bf16.xpose.msra.mxu1 %v1364_v54 }
 0xb0b   :  { %4297 = vmatprep.subr.bf16.mxu1 %v5032_v8 }
 0xb0c   :  { %v1340_v11 = vpop.permute.xlu1 %1339  ;;  %v1342_v17 = vpop.permute.xlu0 %1341 }
 0xb10   :  { %v1344_v10 = vpop.permute.xlu1 %1343 }
 0xb12   :  { %4298 = vmatpush3.bf16.xpose.msra.mxu1 %v1361_v58  ;;  %v4753_v60 = vpop.eup %4752 }
 0xb13   :  { %4329 = vmatprep.subr.bf16.mxu1 %v5032_v8  ;;  %v1182_v0 = vmul.f32 %v4753_v60, %v4743_v18  ;;  %v4755_v4 = vpop.eup %4754 }
 0xb14   :  { %v1183_v3 = vmul.f32 %v4755_v4, %v4745_v19 }
 0xb15   :  { %v1185_v2 = vpack.c.bf16 %v1182_v0, %v1181_v62 }
 0xb16   :  { %v1186_v5 = vpack.c.bf16 %v1183_v3, %v1183_v3 }
 0xb17   :  { %4272 = vmatmul.mubr.msk.bf16.gmra.mxu1 %vm544_vm8, %v1185_v2 }
 0xb18   :  { %4275 = vmatprep.mubr.msk.bf16.mxu1 %vm5033_vm6, %v5032_v8 }
 0xb1f   :  { %4276 = vmatmul.mubr.msk.bf16.gmra.mxu1 %vm544_vm8, %v1186_v5 }
 0xb20   :  { %4299 = vmatprep.mubr.msk.bf16.mxu1 %vm5033_vm6, %v5032_v8 }
 0xb27   :  { %4300 = vmatmul.mubr.msk.bf16.vlgmr.msra.gmra.mxu1 %vm469_vm7, %v1340_v11 }
 0xb28   :  { %4303 = vmatprep.mubr.msk.bf16.mxu1 %vm5033_vm6, %v5032_v8 }
 0xb2f   :  { %4304 = vmatmul.mubr.msk.bf16.gmra.mxu1 %vm469_vm7, %v1342_v17 }
 0xb30   :  { %4307 = vmatprep.mubr.msk.bf16.mxu1 %vm5033_vm6, %v5032_v8 }
 0xb37   :  { %4308 = vmatmul.mubr.msk.bf16.gmra.mxu1 %vm469_vm7, %v1344_v10 }
 0xb38   :  { %4331 = vmatprep.mubr.msk.bf16.mxu1 %vm5033_vm6, %v5032_v8 }
 0xb9e   :  { %v1241_v12 = vpop.f32.mrf.mxu1 }
 0xba0   :  { %v4269_v16 = vpop.f32.mrf.mxu1 }
 0xba2   :  { %v1244_v18 = vpop.f32.mrf.mxu1 }
 0xba3   :  { %v1263_v19 = vpack.c.bf16 %v1244_v18, %v1241_v12 }
 0xba4   :  { %v4270_v20 = vpop.f32.mrf.mxu1 }
 0xba5   :  { %4282 = vmatmul.mubr.msk.bf16.vlgmr.msra.gmra.mxu0 %vm469_vm7, %v1263_v19 }
 0xba6   :  { %4285 = vmatprep.mubr.msk.bf16.mxu0 %vm5033_vm6, %v5032_v8 }
 0xbd7   :  { %v1249_v21 = vpop.f32.mrf.mxu1 }
 0xbd9   :  { %v4273_v22 = vpop.f32.mrf.mxu1 }
 0xbdb   :  { %v1252_v23 = vpop.f32.mrf.mxu1 }
 0xbdc   :  { %v1264_v26 = vpack.c.bf16 %v1252_v23, %v1249_v21 }
 0xbdd   :  { %v4274_v27 = vpop.f32.mrf.mxu1 }
 0xbde   :  { %4286 = vmatmul.mubr.msk.bf16.gmra.mxu0 %vm469_vm7, %v1264_v26 }
 0xbdf   :  { %v1257_v28 = vpop.f32.mrf.mxu1  ;;  %4289 = vmatprep.mubr.msk.bf16.mxu0 %vm5033_vm6, %v5032_v8 }
 0xbe0   :  { %v1265_v34 = vpack.c.bf16 %v1257_v28, %v1257_v28 }
 0xbe1   :  { %v4277_v30 = vpop.f32.mrf.mxu1 }
 0xbe3   :  { %v1260_v32 = vpop.f32.mrf.mxu1 }
 0xbe5   :  { %v4278_v39 = vpop.f32.mrf.mxu1 }
 0xbe6   :  { %4290 = vmatmul.mubr.msk.bf16.gmra.mxu0 %vm469_vm7, %v1265_v34 }
 0xbe7   :  { %v1403_v42 = vpop.f32.mrf.mxu1  ;;  %4317 = vmatprep.mubr.msk.bf16.mxu0 %vm5033_vm6, %v5032_v8 }
 0xbe8   :  { %v1404_v44 = vadd.f32 %v1403_v42, %v5285_v24 }
 0xbe9   :  { %v4301_v47 = vpop.f32.mrf.mxu1 }
 0xbea   :  { %v1425_v50 = vsel %vm544_vm8, %v1404_v44, -inf }
 0xbeb   :  { %1426 = vmax.xlane.f32.xlu0 %v1425_v50  ;;  %v1406_v51 = vpop.f32.mrf.mxu1 }
 0xbec   :  { %v1407_v53 = vadd.f32 %v1406_v51, %v5291_v29 }
 0xbed   :  { %v4302_v54 = vpop.f32.mrf.mxu1 }
 0xbee   :  { %v1428_v55 = vsel %vm544_vm8, %v1407_v53, -inf }
 0xbef   :  { %1429 = vmax.xlane.f32.xlu1 %v1428_v55  ;;  %v1411_v57 = vpop.f32.mrf.mxu1 }
 0xbf0   :  { %v1412_v58 = vadd.f32 %v1411_v57, %v5298_v36 }
 0xbf1   :  { %v4305_v60 = vpop.f32.mrf.mxu1 }
 0xbf2   :  { %v1431_v62 = vsel %vm544_vm8, %v1412_v58, -inf }
 0xbf3   :  { %1432 = vmax.xlane.f32.xlu0 %v1431_v62  ;;  %v1414_v0 = vpop.f32.mrf.mxu1 }
 0xbf4   :  { %v1415_v24 = vadd.f32 %v1414_v0, %v5305_v45  ;;  %v1022_v45 = vadd.f32 %v5471_v35, %v5493_v56 }
 0xbf5   :  { %v4306_v2 = vpop.f32.mrf.mxu1 }
 0xbf6   :  { %v1434_v4 = vsel %vm544_vm8, %v1415_v24, -inf }
 0xbf7   :  { %1435 = vmax.xlane.f32.xlu0 %v1434_v4  ;;  %v1419_v3 = vpop.f32.mrf.mxu1 }
 0xbf8   :  { %v5591_v29 = vadd.f32 %v1419_v3, %v5312_v48  ;;  %v1025_v48 = vadd.f32 %v5476_v40, %v5495_v59 }
 0xbf9   :  { %v4309_v5 = vpop.f32.mrf.mxu1 }
 0xbfa   :  { %v1437_v9 = vsel %vm557_vm9, %v5591_v29, -inf }
 0xbfb   :  { %1438 = vmax.xlane.f32.xlu0 %v1437_v9  ;;  %v1422_v36 = vpop.f32.mrf.mxu1 }
 0xbfd   :  { %v4310_v6 = vpop.f32.mrf.mxu1 }
 0xc00   :  { %1487 = vrot.lane.b32.xlu1 %v5258_v15, %s5043_s25 }
 0xc65   :  { %v1312_v11 = vpop.f32.mrf.mxu0 }
 0xc66   :  { %v5599_v17 = vadd.f32 %v1312_v11, %v1022_v45 }
 0xc67   :  { %v4283_v10 = vpop.f32.mrf.mxu0 }
 0xc69   :  { %v1315_v12 = vpop.f32.mrf.mxu0 }
 0xc6a   :  { %v5603_v16 = vadd.f32 %v1315_v12, %v1025_v48 }
 0xc6b   :  { %v4284_v18 = vpop.f32.mrf.mxu0 }
 0xc74   :  { %v1427_v19 = vpop.xlane.xlu0 %1426 }
 0xc75   :  { %v1440_v20 = vsub.f32 %v1404_v44, %v1427_v19 }
 0xc77   :  { %v1445_v21 = vmul.f32 1.442695, %v1440_v20 }
 0xc78   :  { %v1430_v22 = vpop.xlane.xlu1 %1429 }
 0xc79   :  { %4756 = vpow2.f32 %v1445_v21  ;;  %v1441_v15 = vsub.f32 %v1407_v53, %v1430_v22  ;;  %v1030_v53 = vadd.f32 %v5479_v46, %v5497_v61 }
 0xc7b   :  { %v1447_v23 = vmul.f32 1.442695, %v1441_v15 }
 0xc7c   :  { %v1488_v26 = vpop.permute.xlu1 %1487  ;;  %v1433_v35 = vpop.xlane.xlu0 %1432 }
 0xc7d   :  { %4758 = vpow2.f32 %v1447_v23  ;;  %v1501_v56 = vsel %vm232_vm2, %v1488_v26, 0  ;;  %v1442_v27 = vsub.f32 %v1412_v58, %v1433_v35  ;;  %v1033_v58 = vadd.f32 %v5483_v49, %v5499_v63 }
 0xc7e   :  { %4312 = vmatpush3.bf16.msra.mxu0 %v1501_v56  ;;  %v271_v56 = vld [vmem:[%s6390_s8 + $0xc] sm:$0xf] }
 0xc7f   :  { %v1449_v28 = vmul.f32 1.442695, %v1442_v27  ;;  %4313 = vmatprep.subr.bf16.mxu0 %v5032_v8  ;;  %v1572_v27 = vsel %vm915_vm10, %v271_v56, 0 }
 0xc80   :  { %v1436_v40 = vpop.xlane.xlu0 %1435  ;;  %4330 = vmatpush3.bf16.msra.mxu1 %v1572_v27 }
 0xc81   :  { %4760 = vpow2.f32 %v1449_v28  ;;  %v1443_v59 = vsub.f32 %v1415_v24, %v1436_v40  ;;  %v1038_v24 = vadd.f32 %v5486_v52, %v5501_v1  ;;  %4359 = vmatprep.subr.bf16.mxu1 %v5032_v8 }
 0xc83   :  { %v1451_v30 = vmul.f32 1.442695, %v1443_v59 }
 0xc84   :  { %v1439_v61 = vpop.xlane.xlu0 %1438 }
 0xc85   :  { %4762 = vpow2.f32 %v1451_v30  ;;  %v1444_v49 = vsub.f32 %v5591_v29, %v1439_v61 }
 0xc86   :  { %v4757_v32 = vpop.eup %4756 }
 0xc87   :  { %v1455_v34 = vsel %vm544_vm8, %v4757_v32, 0.0 }
 0xc88   :  { %1456 = vadd.xlane.f32.xlu1 %v1455_v34 }
 0xc8a   :  { %v4759_v39 = vpop.eup %4758 }
 0xc8b   :  { %v1458_v42 = vsel %vm544_vm8, %v4759_v39, 0.0 }
 0xc8c   :  { %1459 = vadd.xlane.f32.xlu0 %v1458_v42 }
 0xc8e   :  { %v4761_v44 = vpop.eup %4760 }
 0xc8f   :  { %v1461_v47 = vsel %vm544_vm8, %v4761_v44, 0.0 }
 0xc90   :  { %1462 = vadd.xlane.f32.xlu1 %v1461_v47 }
 0xc92   :  { %v4763_v50 = vpop.eup %4762 }
 0xc93   :  { %v1464_v51 = vsel %vm544_vm8, %v4763_v50, 0.0 }
 0xc94   :  { %1465 = vadd.xlane.f32.xlu0 %v1464_v51 }
 0xc9e   :  { %v1320_v54 = vpop.f32.mrf.mxu0 }
 0xc9f   :  { %v5613_v55 = vadd.f32 %v1320_v54, %v1030_v53 }
 0xca0   :  { %v4287_v57 = vpop.f32.mrf.mxu0 }
 0xca1   :  { %1483 = vrot.lane.b32.xlu1 %v5256_v13, %s5043_s25  ;;  %v1453_v13 = vmul.f32 1.442695, %v1444_v49 }
 0xca2   :  { %v1323_v60 = vpop.f32.mrf.mxu0 }
 0xca3   :  { %v5619_v62 = vadd.f32 %v1323_v60, %v1033_v58  ;;  %4764 = vpow2.f32 %v1453_v13  ;;  %v1642_v58 = vsub.s32 2, %v5167_v14 }
 0xca4   :  { %v4288_v0 = vpop.f32.mrf.mxu0 }
 0xca6   :  { %v1328_v2 = vpop.f32.mrf.mxu0 }
 0xca7   :  { %v5623_v4 = vadd.f32 %v1328_v2, %v1038_v24  ;;  %v5659_v24 = vld [vmem:[%s6391_s9] sm:$0x3f] }
 0xca8   :  { %v4291_v46 = vpop.f32.mrf.mxu0  ;;  %v1643_v2 = vrot.slane %v5659_v24, %v1642_v58 }
 0xcaa   :  { %v1331_v3 = vpop.f32.mrf.mxu0  ;;  %1485 = vrot.lane.b32.xlu0 %v5252_v7, %s5043_s25 }
 0xcac   :  { %v4292_v63 = vpop.f32.mrf.mxu0 }
 0xcb0   :  { %v4765_v5 = vpop.eup %4764 }
 0xcb1   :  { %v1467_v9 = vsel %vm557_vm9, %v4765_v5, 0.0 }
 0xcc5   :  { %1468 = vadd.xlane.f32.xlu1 %v1467_v9 }
 0xd11   :  { %v1457_v36 = vpop.xlane.xlu1 %1456 }
 0xd12   :  { %4766 = vrcp.f32 %v1457_v36 }
 0xd15   :  { %v1460_v52 = vpop.xlane.xlu0 %1459 }
 0xd16   :  { %4768 = vrcp.f32 %v1460_v52 }
 0xd19   :  { %v1463_v1 = vpop.xlane.xlu1 %1462 }
 0xd1a   :  { %4770 = vrcp.f32 %v1463_v1 }
 0xd1d   :  { %v1466_v6 = vpop.xlane.xlu0 %1465  ;;  %v1484_v48 = vpop.permute.xlu1 %1483 }
 0xd1e   :  { %4772 = vrcp.f32 %v1466_v6 }
 0xd1f   :  { %v4767_v45 = vpop.eup %4766 }
 0xd20   :  { %v1475_v29 = vmul.f32 %v4767_v45, %v4757_v32 }
 0xd21   :  { %v1486_v11 = vpop.permute.xlu0 %1485 }
 0xd22   :  { %4314 = vmatpush3.bf16.msra.mxu0 %v1486_v11 }
 0xd23   :  { %v4769_v7 = vpop.eup %4768  ;;  %4315 = vmatprep.subr.bf16.mxu0 %v5032_v8 }
 0xd24   :  { %v1476_v10 = vmul.f32 %v4769_v7, %v4759_v39 }
 0xd26   :  { %4316 = vmatpush3.bf16.msra.mxu0 %v1484_v48  ;;  %v1480_v12 = vpack.c.bf16 %v1476_v10, %v1475_v29 }
 0xd27   :  { %4343 = vmatprep.subr.bf16.mxu0 %v5032_v8  ;;  %v4771_v18 = vpop.eup %4770 }
 0xd28   :  { %v1477_v20 = vmul.f32 %v4771_v18, %v4761_v44 }
 0xd29   :  { %4318 = vmatmul.mubr.msk.bf16.vlgmr.msra.gmra.mxu0 %vm544_vm8, %v1480_v12 }
 0xd2a   :  { %4321 = vmatprep.mubr.msk.bf16.mxu0 %vm5033_vm6, %v5032_v8 }
 0xd2b   :  { %v4773_v19 = vpop.eup %4772 }
 0xd2c   :  { %v1478_v21 = vmul.f32 %v4773_v19, %v4763_v50 }
 0xd2e   :  { %v1481_v22 = vpack.c.bf16 %v1478_v21, %v1477_v20 }
 0xd31   :  { %4322 = vmatmul.mubr.msk.bf16.gmra.mxu0 %vm544_vm8, %v1481_v22 }
 0xd32   :  { %4325 = vmatprep.mubr.msk.bf16.mxu0 %vm5033_vm6, %v5032_v8 }
 0xd4e   :  { %v1469_v15 = vpop.xlane.xlu1 %1468 }
 0xd4f   :  { %4774 = vrcp.f32 %v1469_v15 }
 0xd5c   :  { %v4775_v23 = vpop.eup %4774 }
 0xd5d   :  { %v1479_v26 = vmul.f32 %v4775_v23, %v4765_v5 }
 0xd5f   :  { %v1482_v35 = vpack.c.bf16 %v1479_v26, %v1479_v26 }
 0xd61   :  { %4326 = vmatmul.mubr.msk.bf16.gmra.mxu0 %vm544_vm8, %v1482_v35 }
 0xd62   :  { %4347 = vmatprep.mubr.msk.bf16.mxu0 %vm5033_vm6, %v5032_v8 }
 0xde9   :  { %v1537_v28 = vpop.f32.mrf.mxu0 }
 0xdeb   :  { %v4319_v40 = vpop.f32.mrf.mxu0 }
 0xded   :  { %v1540_v59 = vpop.f32.mrf.mxu0 }
 0xdee   :  { %v1559_v30 = vpack.c.bf16 %v1540_v59, %v1537_v28 }
 0xdef   :  { %v4320_v32 = vpop.f32.mrf.mxu0 }
 0xdf0   :  { %4332 = vmatmul.mubr.msk.bf16.vlgmr.msra.gmra.mxu1 %vm469_vm7, %v1559_v30 }
 0xdf1   :  { %v1545_v34 = vpop.f32.mrf.mxu0  ;;  %4335 = vmatprep.mubr.msk.bf16.mxu1 %vm5033_vm6, %v5032_v8 }
 0xdf3   :  { %v4323_v39 = vpop.f32.mrf.mxu0 }
 0xdf5   :  { %v1548_v42 = vpop.f32.mrf.mxu0 }
 0xdf6   :  { %v1560_v44 = vpack.c.bf16 %v1548_v42, %v1545_v34 }
 0xdf7   :  { %v4324_v47 = vpop.f32.mrf.mxu0 }
 0xdf8   :  { %4336 = vmatmul.mubr.msk.bf16.gmra.mxu1 %vm469_vm7, %v1560_v44 }
 0xdf9   :  { %4339 = vmatprep.mubr.msk.bf16.mxu1 %vm5033_vm6, %v5032_v8 }
 0xe21   :  { %v1553_v50 = vpop.f32.mrf.mxu0 }
 0xe22   :  { %v1561_v51 = vpack.c.bf16 %v1553_v50, %v1553_v50  ;;  %v4672_v50 = vld [vmem:[%s6392_s10 + $0x8] sm:$0xff]  }
 0xe23   :  { %v4327_v53 = vpop.f32.mrf.mxu0  ;;  %4344 = vmatpush3.bf16.msra.mxu0 %v4672_v50  ;;  %v3851_v50 = vld [vmem:[%s6393_s11] ss:$0 sm:$0xff] }
 0xe24   :  { %4340 = vmatmul.mubr.msk.bf16.gmra.mxu1 %vm469_vm7, %v1561_v51  ;;  %4345 = vmatprep.subr.bf16.mxu0 %v5032_v8  ;;  %v4673_v51 = vld [vmem:[%s6392_s10] sm:$0xff]  }
 0xe25   :  { %v1556_v54 = vpop.f32.mrf.mxu0  ;;  %4367 = vmatprep.mubr.msk.bf16.mxu1 %vm5033_vm6, %v5032_v8 }
 0xe27   :  { %v4328_v57 = vpop.f32.mrf.mxu0  ;;  %4346 = vmatpush3.bf16.msra.mxu0 %v4673_v51 }
 0xe28   :  { %4379 = vmatprep.subr.bf16.mxu0 %v5032_v8 }
 0xeb0   :  { %v1608_v60 = vpop.f32.mrf.mxu1 }
 0xeb1   :  { %v1630_v0 = vadd.f32 %v1608_v60, %v5599_v17 }
 0xeb2   :  { %v4333_v46 = vpop.f32.mrf.mxu1 }
 0xeb3   :  { %v1635_v61 = vadd.f32 %v1630_v0, %v5174_v33 }
 0xeb4   :  { %v1611_v3 = vpop.f32.mrf.mxu1 }
 0xeb5   :  { %v5665_v49 = vadd.f32 %v1643_v2, %v1635_v61  ;;  %v1631_v63 = vadd.f32 %v1611_v3, %v5603_v16 }
 0xeb6   :  { %v4334_v13 = vpop.f32.mrf.mxu1 }
 0xeb7   :  { %v1636_v17 = vadd.f32 %v1631_v63, %v5181_v38  ;;  %v1649_v5 = vsel %vm285_vm3, %v5665_v49, 0.0 }
 0xeb8   :  { %1650 = vadd.xlane.f32.xlu0 %v1649_v5  ;;  %v1616_v9 = vpop.f32.mrf.mxu1 }
 0xeb9   :  { %v5671_v36 = vadd.f32 %v1643_v2, %v1636_v17  ;;  %v1632_v52 = vadd.f32 %v1616_v9, %v5613_v55 }
 0xeba   :  { %v4337_v1 = vpop.f32.mrf.mxu1 }
 0xebb   :  { %v1637_v33 = vadd.f32 %v1632_v52, %v5186_v41  ;;  %v1652_v6 = vsel %vm285_vm3, %v5671_v36, 0.0 }
 0xebc   :  { %1653 = vadd.xlane.f32.xlu0 %v1652_v6  ;;  %v1619_v16 = vpop.f32.mrf.mxu1 }
 0xebd   :  { %v5677_v45 = vadd.f32 %v1643_v2, %v1637_v33  ;;  %v1633_v38 = vadd.f32 %v1619_v16, %v5619_v62  ;;  %v1716_v33 = vsub.s32 3, %v5167_v14 }
 0xebe   :  { %v4338_v11 = vpop.f32.mrf.mxu1 }
 0xebf   :  { %v1638_v7 = vadd.f32 %v1633_v38, %v5191_v43  ;;  %v1655_v29 = vsel %vm285_vm3, %v5677_v45, 0.0  ;;  %v1717_v38 = vrot.slane %v5659_v24, %v1716_v33 }
 0xec0   :  { %1656 = vadd.xlane.f32.xlu1 %v1655_v29 }
 0xec1   :  { %v5683_v55 = vadd.f32 %v1643_v2, %v1638_v7  ;;  %v1725_v7 = vsub.s32 4, %v5167_v14 }
 0xec3   :  { %v1658_v41 = vsel %vm285_vm3, %v5683_v55, 0.0 }
 0xec4   :  { %1659 = vadd.xlane.f32.xlu0 %v1658_v41 }
 0xee4   :  { %v1624_v10 = vpop.f32.mrf.mxu1 }
 0xee5   :  { %v1634_v48 = vadd.f32 %v1624_v10, %v5623_v4 }
 0xee6   :  { %v4341_v12 = vpop.f32.mrf.mxu1 }
 0xee7   :  { %v1639_v18 = vadd.f32 %v1634_v48, %v5178_v37  ;;  %v1726_v48 = vrot.slane %v5659_v24, %v1725_v7 }
 0xee8   :  { %v1627_v62 = vpop.f32.mrf.mxu1 }
 0xee9   :  { %v5689_v19 = vadd.f32 %v1643_v2, %v1639_v18 }
 0xeea   :  { %v4342_v43 = vpop.f32.mrf.mxu1 }
 0xeeb   :  { %v1661_v20 = vsel %vm298_vm5, %v5689_v19, 0.0 }
 0xeec   :  { %1662 = vadd.xlane.f32.xlu1 %v1661_v20 }
 0xf41   :  { %v1651_v21 = vpop.xlane.xlu0 %1650 }
 0xf42   :  { %v1664_v22 = vmul.f32 0.03125, %v1651_v21 }
 0xf44   :  { %v1669_v15 = vsub.f32 %v5665_v49, %v1664_v22 }
 0xf45   :  { %v1654_v23 = vpop.xlane.xlu0 %1653 }
 0xf46   :  { %v1665_v26 = vmul.f32 0.03125, %v1654_v23  ;;  %v1674_v35 = vmul.f32 %v1669_v15, %v1669_v15 }
 0xf48   :  { %v1670_v4 = vsub.f32 %v5671_v36, %v1665_v26  ;;  %v1679_v56 = vsel %vm285_vm3, %v1674_v35, 0.0 }
 0xf49   :  { %v1657_v37 = vpop.xlane.xlu1 %1656  ;;  %1680 = vadd.xlane.f32.xlu0 %v1679_v56 }
 0xf4a   :  { %v1666_v27 = vmul.f32 0.03125, %v1657_v37  ;;  %v1675_v28 = vmul.f32 %v1670_v4, %v1670_v4 }
 0xf4c   :  { %v1671_v40 = vsub.f32 %v5677_v45, %v1666_v27  ;;  %v1682_v59 = vsel %vm285_vm3, %v1675_v28, 0.0 }
 0xf4d   :  { %v1660_v30 = vpop.xlane.xlu0 %1659  ;;  %1683 = vadd.xlane.f32.xlu1 %v1682_v59 }
 0xf4e   :  { %v1667_v32 = vmul.f32 0.03125, %v1660_v30  ;;  %v1676_v34 = vmul.f32 %v1671_v40, %v1671_v40 }
 0xf50   :  { %v1672_v39 = vsub.f32 %v5683_v55, %v1667_v32  ;;  %v1685_v42 = vsel %vm285_vm3, %v1676_v34, 0.0 }
 0xf51   :  { %1686 = vadd.xlane.f32.xlu0 %v1685_v42  ;;  %v4675_v42 = vld [vmem:[%s6394_s12 + $0x10] sm:$0xff]  }
 0xf52   :  { %v1677_v44 = vmul.f32 %v1672_v39, %v1672_v39 }
 0xf54   :  { %v1688_v47 = vsel %vm285_vm3, %v1677_v44, 0.0  ;;  %v4676_v44 = vld [vmem:[%s6394_s12 + $0x8] sm:$0xff]  }
 0xf55   :  { %1689 = vadd.xlane.f32.xlu1 %v1688_v47  ;;  %v4677_v47 = vld [vmem:[%s6394_s12] sm:$0xff]  }
 0xf75   :  { %v1663_v53 = vpop.xlane.xlu1 %1662 }
 0xf76   :  { %v1668_v54 = vmul.f32 0.03125, %v1663_v53 }
 0xf78   :  { %v1673_v57 = vsub.f32 %v5689_v19, %v1668_v54 }
 0xf7a   :  { %v1678_v60 = vmul.f32 %v1673_v57, %v1673_v57 }
 0xf7c   :  { %v1691_v0 = vsel %vm298_vm5, %v1678_v60, 0.0 }
 0xf7d   :  { %1692 = vadd.xlane.f32.xlu0 %v1691_v0 }
 0xfd2   :  { %v1681_v2 = vpop.xlane.xlu0 %1680 }
 0xfd3   :  { %v1694_v46 = vmul.f32 0.03125, %v1681_v2 }
 0xfd5   :  { %v1699_v61 = vadd.f32 1e-06, %v1694_v46 }
 0xfd6   :  { %v1684_v3 = vpop.xlane.xlu1 %1683 }
 0xfd7   :  { %4776 = vrsqrt.f32 %v1699_v61  ;;  %v1695_v63 = vmul.f32 0.03125, %v1684_v3 }
 0xfd9   :  { %v1700_v13 = vadd.f32 1e-06, %v1695_v63 }
 0xfda   :  { %v1687_v17 = vpop.xlane.xlu0 %1686 }
 0xfdb   :  { %4778 = vrsqrt.f32 %v1700_v13  ;;  %v1696_v5 = vmul.f32 0.03125, %v1687_v17 }
 0xfdd   :  { %v1701_v9 = vadd.f32 1e-06, %v1696_v5 }
 0xfde   :  { %v1690_v52 = vpop.xlane.xlu1 %1689 }
 0xfdf   :  { %4780 = vrsqrt.f32 %v1701_v9  ;;  %v1697_v1 = vmul.f32 0.03125, %v1690_v52 }
 0xfe1   :  { %v1702_v6 = vadd.f32 1e-06, %v1697_v1 }
 0xfe3   :  { %4782 = vrsqrt.f32 %v1702_v6 }
 0xfe4   :  { %v4777_v16 = vpop.eup %4776 }
 0xfe5   :  { %v1709_v11 = vmul.f32 %v4777_v16, %v1669_v15 }
 0xfe7   :  { %v1718_v41 = vmul.f32 %v1717_v38, %v1709_v11 }
 0xfe8   :  { %v4779_v29 = vpop.eup %4778 }
 0xfe9   :  { %v1710_v10 = vmul.f32 %v4779_v29, %v1670_v4  ;;  %v1727_v62 = vadd.f32 %v1726_v48, %v1718_v41 }
 0xfeb   :  { %v1719_v12 = vmul.f32 %v1717_v38, %v1710_v10 }
 0xfec   :  { %v4781_v18 = vpop.eup %4780 }
 0xfed   :  { %v1728_v43 = vadd.f32 %v1726_v48, %v1719_v12  ;;  %v1711_v20 = vmul.f32 %v4781_v18, %v1671_v40 }
 0xfef   :  { %v1732_v21 = vpack.c.bf16 %v1728_v43, %v1727_v62  ;;  %v1720_v15 = vmul.f32 %v1717_v38, %v1711_v20 }
 0xff0   :  { %v4783_v22 = vpop.eup %4782 }
 0xff1   :  { %4348 = vmatmul.mubr.msk.bf16.vlgmr.msra.gmra.mxu0 %vm285_vm3, %v1732_v21  ;;  %v1712_v23 = vmul.f32 %v4783_v22, %v1672_v39  ;;  %v1729_v35 = vadd.f32 %v1726_v48, %v1720_v15  ;;  %v4674_v39 = vld [vmem:[%s6394_s12 + $0x18] sm:$0xff]  }
 0xff2   :  { %4351 = vmatprep.mubr.msk.bf16.mxu0 %vm5033_vm6, %v5032_v8  ;;  %4360 = vmatpush3.bf16.msra.mxu1 %v4674_v39 }
 0xff3   :  { %v1721_v26 = vmul.f32 %v1717_v38, %v1712_v23  ;;  %4361 = vmatprep.subr.bf16.mxu1 %v5032_v8 }
 0xff5   :  { %v1730_v4 = vadd.f32 %v1726_v48, %v1721_v26 }
 0xff6   :  { %4362 = vmatpush3.bf16.msra.mxu1 %v4675_v42 }
 0xff7   :  { %v1733_v56 = vpack.c.bf16 %v1730_v4, %v1729_v35  ;;  %4363 = vmatprep.subr.bf16.mxu1 %v5032_v8 }
 0xff9   :  { %4352 = vmatmul.mubr.msk.bf16.gmra.mxu0 %vm285_vm3, %v1733_v56 }
 0xffa   :  { %4355 = vmatprep.mubr.msk.bf16.mxu0 %vm5033_vm6, %v5032_v8  ;;  %4364 = vmatpush3.bf16.msra.mxu1 %v4676_v44 }
 0xffb   :  { %4365 = vmatprep.subr.bf16.mxu1 %v5032_v8 }
 0xffe   :  { %4366 = vmatpush3.bf16.msra.mxu1 %v4677_v47 }
 0xfff   :  { %4395 = vmatprep.subr.bf16.mxu1 %v5032_v8 }
0x1006   :  { %v1693_v37 = vpop.xlane.xlu0 %1692 }
0x1007   :  { %v1698_v27 = vmul.f32 0.03125, %v1693_v37 }
0x1009   :  { %v1703_v28 = vadd.f32 1e-06, %v1698_v27 }
0x100b   :  { %4784 = vrsqrt.f32 %v1703_v28 }
0x1018   :  { %v4785_v40 = vpop.eup %4784 }
0x1019   :  { %v1713_v59 = vmul.f32 %v4785_v40, %v1673_v57 }
0x101b   :  { %v1722_v30 = vmul.f32 %v1717_v38, %v1713_v59 }
0x101d   :  { %v1731_v32 = vadd.f32 %v1726_v48, %v1722_v30 }
0x101f   :  { %v1734_v34 = vpack.c.bf16 %v1731_v32, %v1731_v32 }
0x1021   :  { %4356 = vmatmul.mubr.msk.bf16.gmra.mxu0 %vm285_vm3, %v1734_v34 }
0x1022   :  { %4383 = vmatprep.mubr.msk.bf16.mxu0 %vm5033_vm6, %v5032_v8 }
0x10b1   :  { %v1796_v51 = vpop.f32.mrf.mxu0 }
0x10b2   :  { %v1797_v53 = vadd.f32 %v3851_v50, %v1796_v51 }
0x10b3   :  { %v4349_v54 = vpop.f32.mrf.mxu0 }
0x10b4   :  { %v1823_v57 = vmul.f32 0.044715, %v1797_v53  ;;  %v1818_v35 = vmul.f32 0.5, %v1797_v53 }
0x10b5   :  { %v1799_v60 = vpop.f32.mrf.mxu0 }
0x10b6   :  { %v1828_v0 = vmul.f32 %v1823_v57, %v1797_v53  ;;  %v1800_v2 = vadd.f32 %v3851_v50, %v1799_v60 }
0x10b7   :  { %v4350_v46 = vpop.f32.mrf.mxu0 }
0x10b8   :  { %v1833_v61 = vmul.f32 %v1828_v0, %v1797_v53  ;;  %v1824_v3 = vmul.f32 0.044715, %v1800_v2  ;;  %v1819_v4 = vmul.f32 0.5, %v1800_v2 }
0x10b9   :  { %v1804_v63 = vpop.f32.mrf.mxu0 }
0x10ba   :  { %v1838_v13 = vadd.f32 %v1833_v61, %v1797_v53  ;;  %v1829_v17 = vmul.f32 %v1824_v3, %v1800_v2  ;;  %v1805_v5 = vadd.f32 %v3851_v50, %v1804_v63 }
0x10bb   :  { %v4353_v9 = vpop.f32.mrf.mxu0 }
0x10bc   :  { %v1843_v52 = vmul.f32 0.7978846, %v1838_v13  ;;  %v1834_v1 = vmul.f32 %v1829_v17, %v1800_v2  ;;  %v1825_v6 = vmul.f32 0.044715, %v1805_v5  ;;  %v1820_v32 = vmul.f32 0.5, %v1805_v5 }
0x10bd   :  { %v1807_v16 = vpop.f32.mrf.mxu0 }
0x10be   :  { %4786 = vtanh.f32 %v1843_v52  ;;  %v1839_v38 = vadd.f32 %v1834_v1, %v1800_v2  ;;  %v1830_v11 = vmul.f32 %v1825_v6, %v1805_v5  ;;  %v1808_v29 = vadd.f32 %v3851_v50, %v1807_v16 }
0x10bf   :  { %v4354_v41 = vpop.f32.mrf.mxu0 }
0x10c0   :  { %v1844_v10 = vmul.f32 0.7978846, %v1839_v38  ;;  %v1835_v48 = vmul.f32 %v1830_v11, %v1805_v5  ;;  %v1826_v12 = vmul.f32 0.044715, %v1808_v29  ;;  %v1821_v34 = vmul.f32 0.5, %v1808_v29 }
0x10c2   :  { %4788 = vtanh.f32 %v1844_v10  ;;  %v1840_v18 = vadd.f32 %v1835_v48, %v1805_v5  ;;  %v1831_v62 = vmul.f32 %v1826_v12, %v1808_v29 }
0x10c4   :  { %v1845_v43 = vmul.f32 0.7978846, %v1840_v18  ;;  %v1836_v20 = vmul.f32 %v1831_v62, %v1808_v29 }
0x10c6   :  { %4790 = vtanh.f32 %v1845_v43  ;;  %v1841_v21 = vadd.f32 %v1836_v20, %v1808_v29 }
0x10c8   :  { %v1846_v22 = vmul.f32 0.7978846, %v1841_v21 }
0x10ca   :  { %4792 = vtanh.f32 %v1846_v22 }
0x10cb   :  { %v4787_v23 = vpop.eup %4786 }
0x10cc   :  { %v1853_v15 = vadd.f32 1.0, %v4787_v23 }
0x10ce   :  { %v1858_v37 = vmul.f32 %v1853_v15, %v1818_v35 }
0x10cf   :  { %v4789_v26 = vpop.eup %4788 }
0x10d0   :  { %v1854_v56 = vadd.f32 1.0, %v4789_v26 }
0x10d2   :  { %v1859_v27 = vmul.f32 %v1854_v56, %v1819_v4 }
0x10d3   :  { %v4791_v28 = vpop.eup %4790 }
0x10d4   :  { %v1863_v40 = vpack.c.bf16 %v1859_v27, %v1858_v37  ;;  %v1855_v59 = vadd.f32 1.0, %v4791_v28 }
0x10d6   :  { %4368 = vmatmul.mubr.msk.bf16.vlgmr.msra.gmra.mxu1 %vm1890_vm11, %v1863_v40  ;;  %v1860_v42 = vmul.f32 %v1855_v59, %v1820_v32 }
0x10d7   :  { %v4793_v30 = vpop.eup %4792  ;;  %4371 = vmatprep.mubr.msk.bf16.mxu1 %vm5033_vm6, %v5032_v8 }
0x10d8   :  { %v1856_v39 = vadd.f32 1.0, %v4793_v30 }
0x10da   :  { %v1861_v44 = vmul.f32 %v1856_v39, %v1821_v34 }
0x10dc   :  { %v1864_v47 = vpack.c.bf16 %v1861_v44, %v1860_v42 }
0x10de   :  { %4372 = vmatmul.mubr.msk.bf16.gmra.mxu1 %vm1890_vm11, %v1864_v47 }
0x10df   :  { %4375 = vmatprep.mubr.msk.bf16.mxu1 %vm5033_vm6, %v5032_v8 }
0x10e1   :  { %v1812_v51 = vpop.f32.mrf.mxu0 }
0x10e2   :  { %v1813_v53 = vadd.f32 %v3851_v50, %v1812_v51  ;;  %v1963_v50 = vsub.s32 5, %v5167_v14 }
0x10e3   :  { %v4357_v54 = vpop.f32.mrf.mxu0 }
0x10e4   :  { %v1827_v57 = vmul.f32 0.044715, %v1813_v53  ;;  %v1822_v13 = vmul.f32 0.5, %v1813_v53  ;;  %v1964_v52 = vrot.slane %v5659_v24, %v1963_v50 }
0x10e5   :  { %v1815_v60 = vpop.f32.mrf.mxu0 }
0x10e6   :  { %v1832_v0 = vmul.f32 %v1827_v57, %v1813_v53 }
0x10e7   :  { %v4358_v2 = vpop.f32.mrf.mxu0 }
0x10e8   :  { %v1837_v46 = vmul.f32 %v1832_v0, %v1813_v53 }
0x10ea   :  { %v1842_v61 = vadd.f32 %v1837_v46, %v1813_v53  ;;  %v4678_v46 = vld [vmem:[%s6388_s6 + $0x18] sm:$0xff]  }
0x10eb   :  { %4380 = vmatpush3.bf16.msra.mxu0 %v4678_v46 }
0x10ec   :  { %v1847_v3 = vmul.f32 0.7978846, %v1842_v61  ;;  %4381 = vmatprep.subr.bf16.mxu0 %v5032_v8  ;;  %v4679_v61 = vld [vmem:[%s6388_s6 + $0x10] sm:$0xff]  }
0x10ee   :  { %4794 = vtanh.f32 %v1847_v3 }
0x10ef   :  { %4382 = vmatpush3.bf16.msra.mxu0 %v4679_v61  ;;  %v3886_v61 = vld [vmem:[#allocation8 + $0x1] ss:$0 sm:$0xff] }
0x10f0   :  { %4413 = vmatprep.subr.bf16.mxu0 %v5032_v8 }
0x10fb   :  { %v4795_v63 = vpop.eup %4794 }
0x10fc   :  { %v1857_v17 = vadd.f32 1.0, %v4795_v63 }
0x10fe   :  { %v1862_v5 = vmul.f32 %v1857_v17, %v1822_v13 }
0x1100   :  { %v1865_v9 = vpack.c.bf16 %v1862_v5, %v1862_v5 }
0x1102   :  { %4376 = vmatmul.mubr.msk.bf16.gmra.mxu1 %vm1890_vm11, %v1865_v9 }
0x1103   :  { %4401 = vmatprep.mubr.msk.bf16.mxu1 %vm5033_vm6, %v5032_v8 }
0x1196   :  { %v1934_v1 = vpop.f32.mrf.mxu1 }
0x1197   :  { %v1956_v6 = vadd.f32 %v1934_v1, %v5665_v49 }
0x1198   :  { %v4369_v16 = vpop.f32.mrf.mxu1 }
0x1199   :  { %v5761_v38 = vadd.f32 %v1964_v52, %v1956_v6 }
0x119a   :  { %v1937_v11 = vpop.f32.mrf.mxu1 }
0x119b   :  { %v1957_v29 = vadd.f32 %v1937_v11, %v5671_v36  ;;  %v2000_v41 = vsel %vm285_vm3, %v5761_v38, 0.0 }
0x119c   :  { %2001 = vadd.xlane.f32.xlu1 %v2000_v41  ;;  %v4370_v10 = vpop.f32.mrf.mxu1 }
0x119d   :  { %v5766_v48 = vadd.f32 %v1964_v52, %v1957_v29 }
0x119e   :  { %v1942_v12 = vpop.f32.mrf.mxu1 }
0x119f   :  { %v1958_v18 = vadd.f32 %v1942_v12, %v5677_v45  ;;  %v2003_v24 = vsel %vm285_vm3, %v5766_v48, 0.0 }
0x11a0   :  { %2004 = vadd.xlane.f32.xlu0 %v2003_v24  ;;  %v4373_v49 = vpop.f32.mrf.mxu1  ;;  %v3864_v24 = vld [vmem:[%s6391_s9 + $0x8] sm:$0x3f] }
0x11a1   :  { %v5771_v62 = vadd.f32 %v1964_v52, %v1958_v18 }
0x11a2   :  { %v1945_v43 = vpop.f32.mrf.mxu1 }
0x11a3   :  { %v1959_v36 = vadd.f32 %v1945_v43, %v5683_v55  ;;  %v2006_v20 = vsel %vm285_vm3, %v5771_v62, 0.0  ;;  %v2068_v43 = vrot.slane %v3864_v24, %v5170_v25 }
0x11a4   :  { %2007 = vadd.xlane.f32.xlu1 %v2006_v20  ;;  %v4374_v21 = vpop.f32.mrf.mxu1  ;;  %v2077_v20 = vrot.slane %v3864_v24, %v364_v31 }
0x11a5   :  { %v5776_v22 = vadd.f32 %v1964_v52, %v1959_v36 }
0x11a7   :  { %v2009_v45 = vsel %vm285_vm3, %v5776_v22, 0.0 }
0x11a8   :  { %2010 = vadd.xlane.f32.xlu0 %v2009_v45 }
0x11c2   :  { %v1950_v23 = vpop.f32.mrf.mxu1 }
0x11c3   :  { %v1960_v15 = vadd.f32 %v1950_v23, %v5689_v19 }
0x11c4   :  { %v4377_v26 = vpop.f32.mrf.mxu1 }
0x11c5   :  { %v5781_v35 = vadd.f32 %v1964_v52, %v1960_v15 }
0x11c6   :  { %v1953_v4 = vpop.f32.mrf.mxu1 }
0x11c7   :  { %v2012_v55 = vsel %vm298_vm5, %v5781_v35, 0.0 }
0x11c8   :  { %2013 = vadd.xlane.f32.xlu1 %v2012_v55  ;;  %v4378_v56 = vpop.f32.mrf.mxu1 }
0x1225   :  { %v2002_v37 = vpop.xlane.xlu1 %2001 }
0x1226   :  { %v2015_v27 = vmul.f32 0.03125, %v2002_v37 }
0x1228   :  { %v2020_v28 = vsub.f32 %v5761_v38, %v2015_v27 }
0x1229   :  { %v2005_v40 = vpop.xlane.xlu0 %2004 }
0x122a   :  { %v2016_v59 = vmul.f32 0.03125, %v2005_v40  ;;  %v2025_v30 = vmul.f32 %v2020_v28, %v2020_v28 }
0x122c   :  { %v2021_v32 = vsub.f32 %v5766_v48, %v2016_v59  ;;  %v2030_v19 = vsel %vm285_vm3, %v2025_v30, 0.0 }
0x122d   :  { %v2008_v34 = vpop.xlane.xlu1 %2007  ;;  %2031 = vadd.xlane.f32.xlu0 %v2030_v19 }
0x122e   :  { %v2017_v39 = vmul.f32 0.03125, %v2008_v34  ;;  %v2026_v42 = vmul.f32 %v2021_v32, %v2021_v32 }
0x1230   :  { %v2022_v44 = vsub.f32 %v5771_v62, %v2017_v39  ;;  %v2033_v47 = vsel %vm285_vm3, %v2026_v42, 0.0 }
0x1231   :  { %v2011_v51 = vpop.xlane.xlu0 %2010  ;;  %2034 = vadd.xlane.f32.xlu1 %v2033_v47 }
0x1232   :  { %v2018_v53 = vmul.f32 0.03125, %v2011_v51  ;;  %v2027_v54 = vmul.f32 %v2022_v44, %v2022_v44 }
0x1234   :  { %v2023_v57 = vsub.f32 %v5776_v22, %v2018_v53  ;;  %v2036_v60 = vsel %vm285_vm3, %v2027_v54, 0.0 }
0x1235   :  { %2037 = vadd.xlane.f32.xlu0 %v2036_v60 }
0x1236   :  { %v2028_v0 = vmul.f32 %v2023_v57, %v2023_v57 }
0x1238   :  { %v2039_v2 = vsel %vm285_vm3, %v2028_v0, 0.0 }
0x1239   :  { %2040 = vadd.xlane.f32.xlu1 %v2039_v2 }
0x1251   :  { %v2014_v3 = vpop.xlane.xlu1 %2013 }
0x1252   :  { %v2019_v63 = vmul.f32 0.03125, %v2014_v3 }
0x1254   :  { %v2024_v13 = vsub.f32 %v5781_v35, %v2019_v63 }
0x1256   :  { %v2029_v17 = vmul.f32 %v2024_v13, %v2024_v13 }
0x1258   :  { %v2042_v5 = vsel %vm298_vm5, %v2029_v17, 0.0 }
0x1259   :  { %2043 = vadd.xlane.f32.xlu0 %v2042_v5 }
0x12b6   :  { %v2032_v9 = vpop.xlane.xlu0 %2031 }
0x12b7   :  { %v2045_v52 = vmul.f32 0.03125, %v2032_v9 }
0x12b9   :  { %v2050_v1 = vadd.f32 1e-06, %v2045_v52 }
0x12ba   :  { %v2035_v6 = vpop.xlane.xlu1 %2034 }
0x12bb   :  { %4796 = vrsqrt.f32 %v2050_v1  ;;  %v2046_v16 = vmul.f32 0.03125, %v2035_v6 }
0x12bd   :  { %v2051_v11 = vadd.f32 1e-06, %v2046_v16 }
0x12be   :  { %v2038_v29 = vpop.xlane.xlu0 %2037 }
0x12bf   :  { %4798 = vrsqrt.f32 %v2051_v11  ;;  %v2047_v41 = vmul.f32 0.03125, %v2038_v29 }
0x12c1   :  { %v2052_v10 = vadd.f32 1e-06, %v2047_v41 }
0x12c2   :  { %v2041_v12 = vpop.xlane.xlu1 %2040 }
0x12c3   :  { %4800 = vrsqrt.f32 %v2052_v10  ;;  %v2048_v18 = vmul.f32 0.03125, %v2041_v12 }
0x12c5   :  { %v2053_v49 = vadd.f32 1e-06, %v2048_v18 }
0x12c7   :  { %4802 = vrsqrt.f32 %v2053_v49 }
0x12c8   :  { %v4797_v36 = vpop.eup %4796 }
0x12c9   :  { %v2060_v21 = vmul.f32 %v4797_v36, %v2020_v28 }
0x12cb   :  { %v2069_v45 = vmul.f32 %v2068_v43, %v2060_v21 }
0x12cc   :  { %v4799_v23 = vpop.eup %4798 }
0x12cd   :  { %v2061_v15 = vmul.f32 %v4799_v23, %v2021_v32  ;;  %v2078_v26 = vadd.f32 %v2077_v20, %v2069_v45 }
0x12cf   :  { %v2070_v4 = vmul.f32 %v2068_v43, %v2061_v15 }
0x12d0   :  { %v4801_v55 = vpop.eup %4800 }
0x12d1   :  { %v2079_v56 = vadd.f32 %v2077_v20, %v2070_v4  ;;  %v2062_v37 = vmul.f32 %v4801_v55, %v2022_v44 }
0x12d3   :  { %v2083_v27 = vpack.c.bf16 %v2079_v56, %v2078_v26  ;;  %v2071_v40 = vmul.f32 %v2068_v43, %v2062_v37 }
0x12d4   :  { %v4803_v59 = vpop.eup %4802 }
0x12d5   :  { %4384 = vmatmul.mubr.msk.bf16.vlgmr.msra.gmra.mxu0 %vm285_vm3, %v2083_v27  ;;  %v2063_v25 = vmul.f32 %v4803_v59, %v2023_v57  ;;  %v2080_v30 = vadd.f32 %v2077_v20, %v2071_v40  ;;  %v5878_v27 = vld [vmem:[%s6387_s5] sm:$0xff] }
0x12d6   :  { %4387 = vmatprep.mubr.msk.bf16.mxu0 %vm5033_vm6, %v5032_v8 }
0x12d7   :  { %v2072_v31 = vmul.f32 %v2068_v43, %v2063_v25 }
0x12d9   :  { %v2081_v28 = vadd.f32 %v2077_v20, %v2072_v31  ;;  %v5885_v31 = vld [vmem:[%s6387_s5 + $0x8] sm:$0xff] }
0x12db   :  { %v2084_v19 = vpack.c.bf16 %v2081_v28, %v2080_v30 }
0x12dd   :  { %4388 = vmatmul.mubr.msk.bf16.gmra.mxu0 %vm285_vm3, %v2084_v19 }
0x12de   :  { %4391 = vmatprep.mubr.msk.bf16.mxu0 %vm5033_vm6, %v5032_v8 }
0x12e2   :  { %v2044_v32 = vpop.xlane.xlu0 %2043 }
0x12e3   :  { %v2049_v34 = vmul.f32 0.03125, %v2044_v32 }
0x12e5   :  { %v2054_v39 = vadd.f32 1e-06, %v2049_v34 }
0x12e7   :  { %4804 = vrsqrt.f32 %v2054_v39  ;;  %v5892_v39 = vld [vmem:[%s6387_s5 + $0x10] sm:$0xff] }
0x12f4   :  { %v4805_v42 = vpop.eup %4804 }
0x12f5   :  { %v2064_v44 = vmul.f32 %v4805_v42, %v2024_v13 }
0x12f7   :  { %v2073_v47 = vmul.f32 %v2068_v43, %v2064_v44 }
0x12f9   :  { %v2082_v51 = vadd.f32 %v2077_v20, %v2073_v47 }
0x12fb   :  { %v2085_v53 = vpack.c.bf16 %v2082_v51, %v2082_v51 }
0x12fd   :  { %4392 = vmatmul.mubr.msk.bf16.gmra.mxu0 %vm285_vm3, %v2085_v53  ;;  %v5899_v53 = vld [vmem:[%s6387_s5 + $0x18] sm:$0xff] }
0x12fe   :  { %4419 = vmatprep.mubr.msk.bf16.mxu0 %vm5033_vm6, %v5032_v8 }
0x1395   :  { %v2147_v54 = vpop.f32.mrf.mxu0 }
0x1396   :  { %v2148_v52 = vadd.f32 %v3886_v61, %v2147_v54 }
0x1397   :  { %v4385_v57 = vpop.f32.mrf.mxu0 }
0x1399   :  { %v2150_v60 = vpop.f32.mrf.mxu0 }
0x139a   :  { %v2151_v13 = vadd.f32 %v3886_v61, %v2150_v60 }
0x139b   :  { %v4386_v0 = vpop.f32.mrf.mxu0 }
0x139c   :  { %v5822_v1 = vpack.c.bf16 %v2151_v13, %v2148_v52 }
0x139d   :  { %v2155_v2 = vpop.f32.mrf.mxu0 }
0x139e   :  { %v2156_v63 = vadd.f32 %v3886_v61, %v2155_v2  ;;  %v5906_v2 = vld [vmem:[%s6387_s5 + $0x20] sm:$0x3] }
0x139f   :  { %v4389_v46 = vpop.f32.mrf.mxu0 }
0x13a1   :  { %v2158_v3 = vpop.f32.mrf.mxu0 }
0x13a2   :  { %v2159_v17 = vadd.f32 %v3886_v61, %v2158_v3 }
0x13a3   :  { %v4390_v5 = vpop.f32.mrf.mxu0 }
0x13a4   :  { %v5818_v9 = vpack.c.bf16 %v2159_v17, %v2156_v63 }
0x13a6   :  { %2177 = vrot.lane.b32.xlu0 %v5818_v9, %s5034_s21 }
0x13aa   :  { %2398 = vrot.lane.b32.xlu0 %v5822_v1, %s5035_s30 }
0x13ae   :  { %2394 = vrot.lane.b32.xlu0 %v5818_v9, %s5036_s4 }
0x13bd   :  { %v2163_v6 = vpop.f32.mrf.mxu0 }
0x13be   :  { %v2164_v16 = vadd.f32 %v3886_v61, %v2163_v6 }
0x13bf   :  { %v4393_v11 = vpop.f32.mrf.mxu0 }
0x13c0   :  { %v5828_v29 = vpack.c.bf16 %v2164_v16, %v2164_v16 }
0x13c1   :  { %v2166_v41 = vpop.f32.mrf.mxu0 }
0x13c2   :  { %2179 = vrot.lane.b32.xlu1 %v5828_v29, %s5034_s21 }
0x13c3   :  { %v4394_v10 = vpop.f32.mrf.mxu0 }
0x13c6   :  { %2175 = vrot.lane.b32.xlu1 %v5822_v1, %s5034_s21  ;;  %s5044_s21 = smov [#allocation10]  }
0x13ca   :  { %2402 = vrot.lane.b32.xlu1 %v5828_v29, %s5035_s30 }
0x13ce   :  { %2400 = vrot.lane.b32.xlu1 %v5818_v9, %s5035_s30  ;;  %s3790_s30 = sshll.u32 %s5044_s21, 4  ;;  %s3791_s30 = int_to_ptr.vmem [resolvable:$true] %s3790_s30 }
0x13cf   :  { %p5001_p7 = scmp.lt.s32.totalorder %s3791_s30, %s3791_s30 }
0x13d2   :  { %2392 = vrot.lane.b32.xlu1 %v5822_v1, %s5036_s4 }
0x13d6   :  { %2396 = vrot.lane.b32.xlu1 %v5828_v29, %s5036_s4 }
0x1418   :  { %v2178_v24 = vpop.permute.xlu0 %2177 }
0x1419   :  { %v2194_v49 = vsel %vm469_vm7, %v2178_v24, 0 }
0x141c   :  { %v2399_v15 = vpop.permute.xlu0 %2398 }
0x141d   :  { %v2414_v26 = vsel %vm469_vm7, %v2399_v15, 0 }
0x1420   :  { %v2395_v55 = vpop.permute.xlu0 %2394 }
0x1434   :  { %v2180_v12 = vpop.permute.xlu1 %2179 }
0x1435   :  { %v2197_v18 = vsel %vm469_vm7, %v2180_v12, 0 }
0x1436   :  { %4396 = vmatpush3.bf16.xpose.msra.mxu1 %v2197_v18 }
0x1437   :  { %4397 = vmatprep.subr.bf16.mxu1 %v5032_v8 }
0x1438   :  { %v2176_v43 = vpop.permute.xlu1 %2175 }
0x1439   :  { %v2191_v36 = vsel %vm469_vm7, %v2176_v43, 0 }
0x143c   :  { %v2403_v20 = vpop.permute.xlu1 %2402 }
0x143d   :  { %v2420_v21 = vsel %vm469_vm7, %v2403_v20, 0 }
0x143e   :  { %4398 = vmatpush3.bf16.xpose.msra.mxu1 %v2194_v49 }
0x143f   :  { %4399 = vmatprep.subr.bf16.mxu1 %v5032_v8 }
0x1440   :  { %v2401_v45 = vpop.permute.xlu1 %2400 }
0x1441   :  { %v2417_v23 = vsel %vm469_vm7, %v2401_v45, 0 }
0x1444   :  { %v2393_v4 = vpop.permute.xlu1 %2392 }
0x1446   :  { %4400 = vmatpush3.bf16.xpose.msra.mxu1 %v2191_v36 }
0x1447   :  { %4431 = vmatprep.subr.bf16.mxu1 %v5032_v8 }
0x1448   :  { %v2397_v56 = vpop.permute.xlu1 %2396 }
0x144d   :  { %4402 = vmatmul.mubr.msk.bf16.vlgmr.msra.gmra.mxu1 %vm469_vm7, %v5822_v1 }
0x144e   :  { %4432 = vmatpush3.bf16.xpose.msra.mxu1 %v2420_v21  ;;  %4405 = vmatprep.mubr.msk.bf16.mxu1 %vm5033_vm6, %v5032_v8 }
0x144f   :  { %4433 = vmatprep.subr.bf16.mxu1 %v5032_v8 }
0x1455   :  { %4406 = vmatmul.mubr.msk.bf16.gmra.mxu1 %vm469_vm7, %v5818_v9 }
0x1456   :  { %4434 = vmatpush3.bf16.xpose.msra.mxu1 %v2417_v23  ;;  %4409 = vmatprep.mubr.msk.bf16.mxu1 %vm5033_vm6, %v5032_v8 }
0x1457   :  { %4435 = vmatprep.subr.bf16.mxu1 %v5032_v8 }
0x145d   :  { %4410 = vmatmul.mubr.msk.bf16.gmra.mxu1 %vm469_vm7, %v5828_v29 }
0x145e   :  { %4436 = vmatpush3.bf16.xpose.msra.mxu1 %v2414_v26  ;;  %4437 = vmatprep.mubr.msk.bf16.mxu1 %vm5033_vm6, %v5032_v8 }
0x145f   :  { %4467 = vmatprep.subr.bf16.mxu1 %v5032_v8 }
0x1465   :  { %4438 = vmatmul.mubr.msk.bf16.vlgmr.msra.gmra.mxu1 %vm469_vm7, %v2393_v4 }
0x1466   :  { %4441 = vmatprep.mubr.msk.bf16.mxu1 %vm5033_vm6, %v5032_v8 }
0x146d   :  { %4442 = vmatmul.mubr.msk.bf16.gmra.mxu1 %vm469_vm7, %v2395_v55 }
0x146e   :  { %4445 = vmatprep.mubr.msk.bf16.mxu1 %vm5033_vm6, %v5032_v8 }
0x1475   :  { %4446 = vmatmul.mubr.msk.bf16.gmra.mxu1 %vm469_vm7, %v2397_v56 }
0x1476   :  { %4469 = vmatprep.mubr.msk.bf16.mxu1 %vm5033_vm6, %v5032_v8 }
0x150d   :  { %v2233_v37 = vpop.f32.mrf.mxu1 }
0x150e   :  { %v2234_v40 = vadd.f32 %v5878_v27, %v2233_v37 }
0x150f   :  { %v4403_v59 = vpop.f32.mrf.mxu1 }
0x1510   :  { %v2255_v25 = vsel %vm544_vm8, %v2234_v40, -inf }
0x1511   :  { %2256 = vmax.xlane.f32.xlu0 %v2255_v25  ;;  %v2236_v30 = vpop.f32.mrf.mxu1 }
0x1512   :  { %v2237_v28 = vadd.f32 %v5885_v31, %v2236_v30 }
0x1513   :  { %v4404_v19 = vpop.f32.mrf.mxu1 }
0x1514   :  { %v2258_v32 = vsel %vm544_vm8, %v2237_v28, -inf }
0x1515   :  { %2259 = vmax.xlane.f32.xlu1 %v2258_v32  ;;  %v2241_v34 = vpop.f32.mrf.mxu1 }
0x1516   :  { %v2242_v42 = vadd.f32 %v5892_v39, %v2241_v34 }
0x1517   :  { %v4407_v44 = vpop.f32.mrf.mxu1 }
0x1518   :  { %v2261_v47 = vsel %vm544_vm8, %v2242_v42, -inf }
0x1519   :  { %2262 = vmax.xlane.f32.xlu0 %v2261_v47  ;;  %v2244_v51 = vpop.f32.mrf.mxu1 }
0x151a   :  { %v2245_v54 = vadd.f32 %v5899_v53, %v2244_v51 }
0x151b   :  { %v4408_v57 = vpop.f32.mrf.mxu1 }
0x151c   :  { %v2264_v60 = vsel %vm544_vm8, %v2245_v54, -inf }
0x151d   :  { %2265 = vmax.xlane.f32.xlu0 %v2264_v60  ;;  %v2249_v0 = vpop.f32.mrf.mxu1 }
0x151e   :  { %v2250_v46 = vadd.f32 %v5906_v2, %v2249_v0 }
0x151f   :  { %v4411_v61 = vpop.f32.mrf.mxu1 }
0x1520   :  { %v2267_v3 = vsel %vm557_vm9, %v2250_v46, -inf }
0x1521   :  { %2268 = vmax.xlane.f32.xlu0 %v2267_v3  ;;  %v2252_v63 = vpop.f32.mrf.mxu1 }
0x1523   :  { %v4412_v17 = vpop.f32.mrf.mxu1 }
0x1525   :  { %v2456_v5 = vpop.f32.mrf.mxu1 }
0x1526   :  { %v2457_v13 = vadd.f32 %v5878_v27, %v2456_v5 }
0x1527   :  { %v4439_v52 = vpop.f32.mrf.mxu1 }
0x1528   :  { %v2478_v6 = vsel %vm544_vm8, %v2457_v13, -inf }
0x1529   :  { %2479 = vmax.xlane.f32.xlu1 %v2478_v6  ;;  %v2459_v16 = vpop.f32.mrf.mxu1 }
0x152a   :  { %v5913_v11 = vadd.f32 %v5885_v31, %v2459_v16 }
0x152b   :  { %v4440_v41 = vpop.f32.mrf.mxu1 }
0x152c   :  { %v2481_v10 = vsel %vm544_vm8, %v5913_v11, -inf }
0x152d   :  { %2482 = vmax.xlane.f32.xlu0 %v2481_v10  ;;  %v2464_v12 = vpop.f32.mrf.mxu1 }
0x152e   :  { %v5918_v18 = vadd.f32 %v5892_v39, %v2464_v12 }
0x152f   :  { %v4443_v24 = vpop.f32.mrf.mxu1 }
0x1530   :  { %v2484_v49 = vsel %vm544_vm8, %v5918_v18, -inf }
0x1531   :  { %2485 = vmax.xlane.f32.xlu1 %v2484_v49  ;;  %v2467_v43 = vpop.f32.mrf.mxu1 }
0x1532   :  { %v5923_v36 = vadd.f32 %v5899_v53, %v2467_v43 }
0x1533   :  { %v4444_v20 = vpop.f32.mrf.mxu1 }
0x1534   :  { %v2487_v21 = vsel %vm544_vm8, %v5923_v36, -inf }
0x1535   :  { %2488 = vmax.xlane.f32.xlu0 %v2487_v21  ;;  %v2472_v45 = vpop.f32.mrf.mxu1 }
0x1536   :  { %v5928_v23 = vadd.f32 %v5906_v2, %v2472_v45 }
0x1537   :  { %v4447_v15 = vpop.f32.mrf.mxu1 }
0x1538   :  { %v2490_v26 = vsel %vm557_vm9, %v5928_v23, -inf }
0x1539   :  { %2491 = vmax.xlane.f32.xlu1 %v2490_v26  ;;  %v2475_v4 = vpop.f32.mrf.mxu1 }
0x153b   :  { %v4448_v55 = vpop.f32.mrf.mxu1 }
0x154a   :  { %2317 = vrot.lane.b32.xlu1 %v5828_v29, %s5026_s19 }
0x154b   :  { %2315 = vrot.lane.b32.xlu0 %v5818_v9, %s5026_s19 }
0x159a   :  { %v2257_v56 = vpop.xlane.xlu0 %2256 }
0x159b   :  { %v2270_v37 = vsub.f32 %v2234_v40, %v2257_v56 }
0x159d   :  { %v2275_v59 = vmul.f32 1.442695, %v2270_v37 }
0x159e   :  { %v2260_v25 = vpop.xlane.xlu1 %2259 }
0x159f   :  { %4806 = vpow2.f32 %v2275_v59  ;;  %v2271_v30 = vsub.f32 %v2237_v28, %v2260_v25 }
0x15a1   :  { %v2277_v19 = vmul.f32 1.442695, %v2271_v30 }
0x15a2   :  { %v2263_v32 = vpop.xlane.xlu0 %2262 }
0x15a3   :  { %4808 = vpow2.f32 %v2277_v19  ;;  %v2272_v34 = vsub.f32 %v2242_v42, %v2263_v32 }
0x15a5   :  { %v2279_v44 = vmul.f32 1.442695, %v2272_v34 }
0x15a6   :  { %v2266_v47 = vpop.xlane.xlu0 %2265 }
0x15a7   :  { %4810 = vpow2.f32 %v2279_v44  ;;  %v2273_v51 = vsub.f32 %v2245_v54, %v2266_v47 }
0x15a9   :  { %v2281_v57 = vmul.f32 1.442695, %v2273_v51 }
0x15aa   :  { %v2269_v60 = vpop.xlane.xlu0 %2268 }
0x15ab   :  { %4812 = vpow2.f32 %v2281_v57  ;;  %v2274_v0 = vsub.f32 %v2250_v46, %v2269_v60 }
0x15ac   :  { %v5936_v61 = vpop.eup %4806 }
0x15ad   :  { %v2283_v3 = vmul.f32 1.442695, %v2274_v0  ;;  %v2285_v40 = vsel %vm544_vm8, %v5936_v61, 0.0 }
0x15ae   :  { %2286 = vadd.xlane.f32.xlu0 %v2285_v40 }
0x15af   :  { %4814 = vpow2.f32 %v2283_v3 }
0x15b0   :  { %v5940_v28 = vpop.eup %4808 }
0x15b1   :  { %v2288_v42 = vsel %vm544_vm8, %v5940_v28, 0.0 }
0x15b2   :  { %v2480_v63 = vpop.xlane.xlu1 %2479  ;;  %2289 = vadd.xlane.f32.xlu1 %v2288_v42 }
0x15b3   :  { %v2493_v54 = vsub.f32 %v2457_v13, %v2480_v63 }
0x15b4   :  { %v5944_v17 = vpop.eup %4810 }
0x15b5   :  { %v2498_v5 = vmul.f32 1.442695, %v2493_v54  ;;  %v2291_v46 = vsel %vm544_vm8, %v5944_v17, 0.0 }
0x15b6   :  { %2292 = vadd.xlane.f32.xlu0 %v2291_v46  ;;  %v2483_v10 = vpop.xlane.xlu0 %2482 }
0x15b7   :  { %4816 = vpow2.f32 %v2498_v5  ;;  %v2494_v15 = vsub.f32 %v5913_v11, %v2483_v10 }
0x15b8   :  { %v5948_v52 = vpop.eup %4812 }
0x15b9   :  { %v2294_v6 = vsel %vm544_vm8, %v5948_v52, 0.0  ;;  %v2500_v26 = vmul.f32 1.442695, %v2494_v15 }
0x15ba   :  { %2295 = vadd.xlane.f32.xlu1 %v2294_v6  ;;  %v2486_v13 = vpop.xlane.xlu1 %2485 }
0x15bb   :  { %v2495_v4 = vsub.f32 %v5918_v18, %v2486_v13  ;;  %4818 = vpow2.f32 %v2500_v26 }
0x15bc   :  { %v5952_v16 = vpop.eup %4814 }
0x15bd   :  { %v2297_v41 = vsel %vm557_vm9, %v5952_v16, 0.0  ;;  %v2502_v56 = vmul.f32 1.442695, %v2495_v4 }
0x15be   :  { %2298 = vadd.xlane.f32.xlu0 %v2297_v41  ;;  %v2489_v49 = vpop.xlane.xlu0 %2488 }
0x15bf   :  { %v2496_v55 = vsub.f32 %v5923_v36, %v2489_v49  ;;  %4820 = vpow2.f32 %v2502_v56 }
0x15c1   :  { %v2504_v59 = vmul.f32 1.442695, %v2496_v55 }
0x15c2   :  { %v2492_v12 = vpop.xlane.xlu1 %2491  ;;  %v2316_v45 = vpop.permute.xlu0 %2315 }
0x15c3   :  { %v2497_v37 = vsub.f32 %v5928_v23, %v2492_v12  ;;  %4822 = vpow2.f32 %v2504_v59 }
0x15c4   :  { %v5956_v24 = vpop.eup %4816 }
0x15c5   :  { %v2508_v43 = vsel %vm544_vm8, %v5956_v24, 0.0  ;;  %v2506_v25 = vmul.f32 1.442695, %v2497_v37 }
0x15c6   :  { %2509 = vadd.xlane.f32.xlu1 %v2508_v43  ;;  %v2318_v20 = vpop.permute.xlu1 %2317 }
0x15c7   :  { %v2331_v21 = vsel %vm232_vm2, %v2318_v20, 0  ;;  %4824 = vpow2.f32 %v2506_v25 }
0x15c8   :  { %4414 = vmatpush3.bf16.msra.mxu0 %v2331_v21  ;;  %v5971_v30 = vpop.eup %4818 }
0x15c9   :  { %4415 = vmatprep.subr.bf16.mxu0 %v5032_v8  ;;  %v2511_v19 = vsel %vm544_vm8, %v5971_v30, 0.0 }
0x15cc   :  { %4416 = vmatpush3.bf16.msra.mxu0 %v2316_v45  ;;  %v5975_v11 = vpop.eup %4820 }
0x15cd   :  { %4417 = vmatprep.subr.bf16.mxu0 %v5032_v8  ;;  %v2514_v36 = vsel %vm544_vm8, %v5975_v11, 0.0 }
0x15d0   :  { %v5977_v18 = vpop.eup %4822 }
0x15d1   :  { %v2517_v23 = vsel %vm544_vm8, %v5977_v18, 0.0 }
0x15d4   :  { %2540 = vrot.lane.b32.xlu0 %v5828_v29, %s5037_s27  ;;  %v5981_v32 = vpop.eup %4824 }
0x15d5   :  { %v2520_v34 = vsel %vm557_vm9, %v5981_v32, 0.0 }
0x15d7   :  { %2313 = vrot.lane.b32.xlu1 %v5822_v1, %s5026_s19 }
0x15f3   :  { %2512 = vadd.xlane.f32.xlu0 %v2511_v19 }
0x15f7   :  { %2515 = vadd.xlane.f32.xlu0 %v2514_v36 }
0x15fb   :  { %2518 = vadd.xlane.f32.xlu0 %v2517_v23  ;;  %2521 = vadd.xlane.f32.xlu1 %v2520_v34  ;;  %v3869_v23 = vld [vmem:[%s6390_s8 + $0x10] sm:$0xf] }
0x15fc   :  { %v2693_v34 = vsel %vm915_vm10, %v3869_v23, 0 }
0x160c   :  { %2751 = vrot.lane.b32.xlu1 %v5822_v1, %s5039_s1 }
0x1611   :  { %2538 = vrot.lane.b32.xlu0 %v5818_v9, %s5037_s27 }
0x1615   :  { %2536 = vrot.lane.b32.xlu0 %v5822_v1, %s5037_s27 }
0x1619   :  { %2761 = vrot.lane.b32.xlu0 %v5828_v29, %s5038_s18 }
0x161d   :  { %2759 = vrot.lane.b32.xlu0 %v5818_v9, %s5038_s18 }
0x1621   :  { %2757 = vrot.lane.b32.xlu0 %v5822_v1, %s5038_s18 }
0x1625   :  { %2753 = vrot.lane.b32.xlu0 %v5818_v9, %s5039_s1 }
0x1629   :  { %2755 = vrot.lane.b32.xlu0 %v5828_v29, %s5039_s1 }
0x1637   :  { %v2287_v47 = vpop.xlane.xlu0 %2286 }
0x163b   :  { %v2290_v44 = vpop.xlane.xlu1 %2289 }
0x163c   :  { %4826 = vrcp.f32 %v2290_v44 }
0x163d   :  { %4828 = vrcp.f32 %v2287_v47 }
0x163f   :  { %v2293_v57 = vpop.xlane.xlu0 %2292 }
0x1643   :  { %v2296_v51 = vpop.xlane.xlu1 %2295 }
0x1644   :  { %4830 = vrcp.f32 %v2296_v51 }
0x1645   :  { %4832 = vrcp.f32 %v2293_v57 }
0x1647   :  { %v2299_v0 = vpop.xlane.xlu0 %2298 }
0x1648   :  { %4834 = vrcp.f32 %v2299_v0 }
0x1649   :  { %v4827_v60 = vpop.eup %4826 }
0x164a   :  { %v4829_v40 = vpop.eup %4828  ;;  %v2306_v42 = vmul.f32 %v4827_v60, %v5940_v28 }
0x164b   :  { %v2305_v63 = vmul.f32 %v4829_v40, %v5936_v61  ;;  %v2541_v5 = vpop.permute.xlu0 %2540 }
0x164c   :  { %v2554_v41 = vsel %vm232_vm2, %v2541_v5, 0 }
0x164d   :  { %v2310_v46 = vpack.c.bf16 %v2306_v42, %v2305_v63 }
0x164f   :  { %v2510_v3 = vpop.xlane.xlu1 %2509 }
0x1650   :  { %4836 = vrcp.f32 %v2510_v3 }
0x1651   :  { %v4831_v6 = vpop.eup %4830 }
0x1652   :  { %v4833_v13 = vpop.eup %4832  ;;  %v2308_v28 = vmul.f32 %v4831_v6, %v5948_v52 }
0x1653   :  { %v2314_v54 = vpop.permute.xlu1 %2313  ;;  %v2307_v61 = vmul.f32 %v4833_v13, %v5944_v17 }
0x1654   :  { %4418 = vmatpush3.bf16.msra.mxu0 %v2314_v54 }
0x1655   :  { %4449 = vmatprep.subr.bf16.mxu0 %v5032_v8  ;;  %v2311_v10 = vpack.c.bf16 %v2308_v28, %v2307_v61  ;;  %v4835_v12 = vpop.eup %4834 }
0x1656   :  { %v2309_v49 = vmul.f32 %v4835_v12, %v5952_v16 }
0x1657   :  { %4420 = vmatmul.mubr.msk.bf16.vlgmr.msra.gmra.mxu0 %vm544_vm8, %v2310_v46 }
0x1658   :  { %4450 = vmatpush3.bf16.msra.mxu0 %v2554_v41  ;;  %4423 = vmatprep.mubr.msk.bf16.mxu0 %vm5033_vm6, %v5032_v8  ;;  %v2312_v43 = vpack.c.bf16 %v2309_v49, %v2309_v49 }
0x1659   :  { %4451 = vmatprep.subr.bf16.mxu0 %v5032_v8 }
0x165d   :  { %v4837_v45 = vpop.eup %4836 }
0x165e   :  { %v2528_v16 = vmul.f32 %v4837_v45, %v5956_v24 }
0x165f   :  { %4424 = vmatmul.mubr.msk.bf16.gmra.mxu0 %vm544_vm8, %v2311_v10 }
0x1660   :  { %4427 = vmatprep.mubr.msk.bf16.mxu0 %vm5033_vm6, %v5032_v8 }
0x1667   :  { %4428 = vmatmul.mubr.msk.bf16.gmra.mxu0 %vm544_vm8, %v2312_v43 }
0x1668   :  { %4455 = vmatprep.mubr.msk.bf16.mxu0 %vm5033_vm6, %v5032_v8 }
0x167c   :  { %v2513_v52 = vpop.xlane.xlu0 %2512 }
0x167d   :  { %4838 = vrcp.f32 %v2513_v52 }
0x1680   :  { %v2516_v20 = vpop.xlane.xlu0 %2515 }
0x1681   :  { %4840 = vrcp.f32 %v2516_v20 }
0x1684   :  { %v2519_v17 = vpop.xlane.xlu0 %2518  ;;  %v2522_v21 = vpop.xlane.xlu1 %2521 }
0x1685   :  { %4842 = vrcp.f32 %v2519_v17 }
0x1686   :  { %4844 = vrcp.f32 %v2522_v21 }
0x1688   :  { %v2539_v15 = vpop.permute.xlu0 %2538 }
0x1689   :  { %4452 = vmatpush3.bf16.msra.mxu0 %v2539_v15 }
0x168a   :  { %v4839_v26 = vpop.eup %4838  ;;  %4453 = vmatprep.subr.bf16.mxu0 %v5032_v8 }
0x168b   :  { %v2529_v4 = vmul.f32 %v4839_v26, %v5971_v30 }
0x168c   :  { %v2537_v55 = vpop.permute.xlu0 %2536 }
0x168d   :  { %v2533_v56 = vpack.c.bf16 %v2529_v4, %v2528_v16  ;;  %4454 = vmatpush3.bf16.msra.mxu0 %v2537_v55 }
0x168e   :  { %4481 = vmatprep.subr.bf16.mxu0 %v5032_v8  ;;  %v4841_v37 = vpop.eup %4840 }
0x168f   :  { %v2530_v25 = vmul.f32 %v4841_v37, %v5975_v11 }
0x1690   :  { %4456 = vmatmul.mubr.msk.bf16.vlgmr.msra.gmra.mxu0 %vm544_vm8, %v2533_v56  ;;  %v2762_v61 = vpop.permute.xlu0 %2761 }
0x1691   :  { %4459 = vmatprep.mubr.msk.bf16.mxu0 %vm5033_vm6, %v5032_v8  ;;  %4482 = vmatpush3.bf16.msra.mxu0 %v2693_v34  ;;  %v2779_v43 = vsel %vm469_vm7, %v2762_v61, 0 }
0x1692   :  { %v4843_v59 = vpop.eup %4842  ;;  %4513 = vmatprep.subr.bf16.mxu0 %v5032_v8 }
0x1693   :  { %v2531_v19 = vmul.f32 %v4843_v59, %v5977_v18  ;;  %v4845_v24 = vpop.eup %4844  ;;  %v3870_v18 = vld [vmem:[%s6390_s8 + $0x14] sm:$0xf] }
0x1694   :  { %v2532_v30 = vmul.f32 %v4845_v24, %v5981_v32  ;;  %v2625_v32 = vsel %vm915_vm10, %v3870_v18, 0  ;;  %v2760_v17 = vpop.permute.xlu0 %2759 }
0x1695   :  { %v2534_v36 = vpack.c.bf16 %v2531_v19, %v2530_v25  ;;  %4468 = vmatpush3.bf16.msra.mxu1 %v2625_v32  ;;  %v2776_v26 = vsel %vm469_vm7, %v2760_v17, 0  ;;  %v2752_v19 = vpop.permute.xlu1 %2751 }
0x1696   :  { %v2535_v11 = vpack.c.bf16 %v2532_v30, %v2532_v30  ;;  %4495 = vmatprep.subr.bf16.mxu1 %v5032_v8 }
0x1698   :  { %4460 = vmatmul.mubr.msk.bf16.gmra.mxu0 %vm544_vm8, %v2534_v36  ;;  %v2758_v55 = vpop.permute.xlu0 %2757 }
0x1699   :  { %4463 = vmatprep.mubr.msk.bf16.mxu0 %vm5033_vm6, %v5032_v8  ;;  %v2773_v25 = vsel %vm469_vm7, %v2758_v55, 0 }
0x169c   :  { %v2754_v36 = vpop.permute.xlu0 %2753 }
0x16a0   :  { %4464 = vmatmul.mubr.msk.bf16.gmra.mxu0 %vm544_vm8, %v2535_v11  ;;  %v2756_v24 = vpop.permute.xlu0 %2755 }
0x16a1   :  { %4483 = vmatprep.mubr.msk.bf16.mxu0 %vm5033_vm6, %v5032_v8 }
0x1717   :  { %v2367_v44 = vpop.f32.mrf.mxu0 }
0x1719   :  { %v4421_v47 = vpop.f32.mrf.mxu0 }
0x171b   :  { %v2370_v51 = vpop.f32.mrf.mxu0 }
0x171c   :  { %v2389_v57 = vpack.c.bf16 %v2370_v51, %v2367_v44 }
0x171d   :  { %v4422_v60 = vpop.f32.mrf.mxu0 }
0x171e   :  { %4484 = vmatmul.mubr.msk.bf16.vlgmr.msra.gmra.mxu0 %vm469_vm7, %v2389_v57 }
0x171f   :  { %v2375_v0 = vpop.f32.mrf.mxu0  ;;  %4487 = vmatprep.mubr.msk.bf16.mxu0 %vm5033_vm6, %v5032_v8 }
0x1721   :  { %v4425_v3 = vpop.f32.mrf.mxu0 }
0x1723   :  { %v2378_v40 = vpop.f32.mrf.mxu0 }
0x1724   :  { %v2390_v42 = vpack.c.bf16 %v2378_v40, %v2375_v0 }
0x1725   :  { %v4426_v63 = vpop.f32.mrf.mxu0 }
0x1726   :  { %4488 = vmatmul.mubr.msk.bf16.gmra.mxu0 %vm469_vm7, %v2390_v42 }
0x1727   :  { %v2383_v54 = vpop.f32.mrf.mxu0  ;;  %4491 = vmatprep.mubr.msk.bf16.mxu0 %vm5033_vm6, %v5032_v8 }
0x1728   :  { %v2391_v6 = vpack.c.bf16 %v2383_v54, %v2383_v54 }
0x1729   :  { %v4429_v5 = vpop.f32.mrf.mxu0 }
0x172b   :  { %v2386_v46 = vpop.f32.mrf.mxu0 }
0x172d   :  { %v4430_v41 = vpop.f32.mrf.mxu0 }
0x172e   :  { %4492 = vmatmul.mubr.msk.bf16.gmra.mxu0 %vm469_vm7, %v2391_v6 }
0x172f   :  { %4519 = vmatprep.mubr.msk.bf16.mxu0 %vm5033_vm6, %v5032_v8 }
0x1750   :  { %v2590_v13 = vpop.f32.mrf.mxu0 }
0x1752   :  { %v4457_v28 = vpop.f32.mrf.mxu0 }
0x1754   :  { %v2593_v10 = vpop.f32.mrf.mxu0 }
0x1755   :  { %v2612_v12 = vpack.c.bf16 %v2593_v10, %v2590_v13 }
0x1756   :  { %v4458_v49 = vpop.f32.mrf.mxu0 }
0x1757   :  { %4470 = vmatmul.mubr.msk.bf16.vlgmr.msra.gmra.mxu1 %vm469_vm7, %v2612_v12 }
0x1758   :  { %4496 = vmatpush3.bf16.xpose.msra.mxu1 %v2779_v43  ;;  %v2598_v52 = vpop.f32.mrf.mxu0  ;;  %4473 = vmatprep.mubr.msk.bf16.mxu1 %vm5033_vm6, %v5032_v8 }
0x1759   :  { %4497 = vmatprep.subr.bf16.mxu1 %v5032_v8 }
0x175a   :  { %v4461_v20 = vpop.f32.mrf.mxu0 }
0x175c   :  { %v2601_v21 = vpop.f32.mrf.mxu0 }
0x175d   :  { %v2613_v45 = vpack.c.bf16 %v2601_v21, %v2598_v52 }
0x175e   :  { %v4462_v15 = vpop.f32.mrf.mxu0 }
0x175f   :  { %4474 = vmatmul.mubr.msk.bf16.gmra.mxu1 %vm469_vm7, %v2613_v45 }
0x1760   :  { %4498 = vmatpush3.bf16.xpose.msra.mxu1 %v2776_v26  ;;  %v2606_v16 = vpop.f32.mrf.mxu0  ;;  %4477 = vmatprep.mubr.msk.bf16.mxu1 %vm5033_vm6, %v5032_v8 }
0x1761   :  { %4499 = vmatprep.subr.bf16.mxu1 %v5032_v8  ;;  %v2614_v37 = vpack.c.bf16 %v2606_v16, %v2606_v16 }
0x1762   :  { %v4465_v4 = vpop.f32.mrf.mxu0 }
0x1764   :  { %v2609_v56 = vpop.f32.mrf.mxu0 }
0x1766   :  { %v4466_v59 = vpop.f32.mrf.mxu0 }
0x1767   :  { %4478 = vmatmul.mubr.msk.bf16.gmra.mxu1 %vm469_vm7, %v2614_v37 }
0x1768   :  { %4500 = vmatpush3.bf16.xpose.msra.mxu1 %v2773_v25  ;;  %4501 = vmatprep.mubr.msk.bf16.mxu1 %vm5033_vm6, %v5032_v8 }
0x1769   :  { %4531 = vmatprep.subr.bf16.mxu1 %v5032_v8 }
0x176f   :  { %4502 = vmatmul.mubr.msk.bf16.vlgmr.msra.gmra.mxu1 %vm469_vm7, %v2752_v19 }
0x1770   :  { %4505 = vmatprep.mubr.msk.bf16.mxu1 %vm5033_vm6, %v5032_v8 }
0x1777   :  { %4506 = vmatmul.mubr.msk.bf16.gmra.mxu1 %vm469_vm7, %v2754_v36 }
0x1778   :  { %4509 = vmatprep.mubr.msk.bf16.mxu1 %vm5033_vm6, %v5032_v8 }
0x177f   :  { %4510 = vmatmul.mubr.msk.bf16.gmra.mxu1 %vm469_vm7, %v2756_v24 }
0x1780   :  { %4533 = vmatprep.mubr.msk.bf16.mxu1 %vm5033_vm6, %v5032_v8 }
0x17de   :  { %v2729_v30 = vpop.f32.mrf.mxu0 }
0x17e0   :  { %v4485_v23 = vpop.f32.mrf.mxu0 }
0x17e2   :  { %v2732_v34 = vpop.f32.mrf.mxu0 }
0x17e4   :  { %v4486_v11 = vpop.f32.mrf.mxu0 }
0x17e6   :  { %v2737_v18 = vpop.f32.mrf.mxu0 }
0x17e8   :  { %v4489_v32 = vpop.f32.mrf.mxu0 }
0x17ea   :  { %v2740_v44 = vpop.f32.mrf.mxu0 }
0x17ec   :  { %v4490_v47 = vpop.f32.mrf.mxu0 }
0x17ee   :  { %v2745_v51 = vpop.f32.mrf.mxu0 }
0x17f0   :  { %v4493_v57 = vpop.f32.mrf.mxu0 }
0x17f2   :  { %v2748_v60 = vpop.f32.mrf.mxu0 }
0x17f4   :  { %v4494_v0 = vpop.f32.mrf.mxu0 }
0x1817   :  { %v2661_v3 = vpop.f32.mrf.mxu1 }
0x1818   :  { %v6079_v40 = vadd.f32 %v2729_v30, %v2661_v3 }
0x1819   :  { %v4471_v42 = vpop.f32.mrf.mxu1 }
0x181b   :  { %v2664_v63 = vpop.f32.mrf.mxu1 }
0x181c   :  { %v6081_v54 = vadd.f32 %v2732_v34, %v2664_v63 }
0x181d   :  { %v4472_v5 = vpop.f32.mrf.mxu1 }
0x181f   :  { %v2669_v46 = vpop.f32.mrf.mxu1 }
0x1820   :  { %v6083_v6 = vadd.f32 %v2737_v18, %v2669_v46 }
0x1821   :  { %v4475_v41 = vpop.f32.mrf.mxu1 }
0x1823   :  { %v2672_v13 = vpop.f32.mrf.mxu1 }
0x1824   :  { %v6085_v28 = vadd.f32 %v2740_v44, %v2672_v13 }
0x1825   :  { %v4476_v61 = vpop.f32.mrf.mxu1 }
0x1827   :  { %v2677_v10 = vpop.f32.mrf.mxu1 }
0x1828   :  { %v6087_v12 = vadd.f32 %v2745_v51, %v2677_v10 }
0x1829   :  { %v4479_v49 = vpop.f32.mrf.mxu1 }
0x182b   :  { %v2680_v43 = vpop.f32.mrf.mxu1 }
0x182d   :  { %v4480_v52 = vpop.f32.mrf.mxu1 }
0x182f   :  { %v2815_v20 = vpop.f32.mrf.mxu1 }
0x1830   :  { %v2816_v17 = vadd.f32 %v5878_v27, %v2815_v20 }
0x1831   :  { %v4503_v21 = vpop.f32.mrf.mxu1 }
0x1832   :  { %v2837_v45 = vsel %vm544_vm8, %v2816_v17, -inf }
0x1833   :  { %2838 = vmax.xlane.f32.xlu0 %v2837_v45  ;;  %v2818_v15 = vpop.f32.mrf.mxu1 }
0x1834   :  { %v2819_v26 = vadd.f32 %v5885_v31, %v2818_v15 }
0x1835   :  { %v4504_v16 = vpop.f32.mrf.mxu1 }
0x1836   :  { %v2840_v4 = vsel %vm544_vm8, %v2819_v26, -inf }
0x1837   :  { %2841 = vmax.xlane.f32.xlu1 %v2840_v4  ;;  %v2823_v55 = vpop.f32.mrf.mxu1 }
0x1838   :  { %v2824_v56 = vadd.f32 %v5892_v39, %v2823_v55 }
0x1839   :  { %v4507_v37 = vpop.f32.mrf.mxu1 }
0x183a   :  { %v2843_v59 = vsel %vm544_vm8, %v2824_v56, -inf }
0x183b   :  { %2844 = vmax.xlane.f32.xlu0 %v2843_v59  ;;  %v2826_v25 = vpop.f32.mrf.mxu1 }
0x183c   :  { %v2827_v19 = vadd.f32 %v5899_v53, %v2826_v25 }
0x183d   :  { %v4508_v36 = vpop.f32.mrf.mxu1 }
0x183e   :  { %v2846_v24 = vsel %vm544_vm8, %v2827_v19, -inf }
0x183f   :  { %2847 = vmax.xlane.f32.xlu0 %v2846_v24  ;;  %v2831_v30 = vpop.f32.mrf.mxu1 }
0x1840   :  { %v2832_v23 = vadd.f32 %v5906_v2, %v2831_v30 }
0x1841   :  { %v4511_v34 = vpop.f32.mrf.mxu1 }
0x1842   :  { %v2849_v11 = vsel %vm557_vm9, %v2832_v23, -inf }
0x1843   :  { %2850 = vmax.xlane.f32.xlu0 %v2849_v11  ;;  %v2834_v18 = vpop.f32.mrf.mxu1 }
0x1845   :  { %v4512_v32 = vpop.f32.mrf.mxu1 }
0x1848   :  { %2899 = vrot.lane.b32.xlu1 %v5828_v29, %s5040_s24 }
0x184c   :  { %2895 = vrot.lane.b32.xlu1 %v5822_v1, %s5040_s24 }
0x1859   :  { %2897 = vrot.lane.b32.xlu0 %v5818_v9, %s5040_s24 }
0x18bc   :  { %v2839_v44 = vpop.xlane.xlu0 %2838 }
0x18bd   :  { %v2852_v47 = vsub.f32 %v2816_v17, %v2839_v44 }
0x18bf   :  { %v2857_v51 = vmul.f32 1.442695, %v2852_v47 }
0x18c0   :  { %v2842_v57 = vpop.xlane.xlu1 %2841 }
0x18c1   :  { %4846 = vpow2.f32 %v2857_v51  ;;  %v2853_v2 = vsub.f32 %v2819_v26, %v2842_v57 }
0x18c3   :  { %v2859_v60 = vmul.f32 1.442695, %v2853_v2 }
0x18c4   :  { %v2900_v0 = vpop.permute.xlu1 %2899  ;;  %v2845_v3 = vpop.xlane.xlu0 %2844 }
0x18c5   :  { %4848 = vpow2.f32 %v2859_v60  ;;  %v2913_v42 = vsel %vm232_vm2, %v2900_v0, 0  ;;  %v2854_v63 = vsub.f32 %v2824_v56, %v2845_v3 }
0x18c6   :  { %4514 = vmatpush3.bf16.msra.mxu0 %v2913_v42 }
0x18c7   :  { %v2861_v5 = vmul.f32 1.442695, %v2854_v63  ;;  %4515 = vmatprep.subr.bf16.mxu0 %v5032_v8 }
0x18c8   :  { %v2848_v46 = vpop.xlane.xlu0 %2847  ;;  %v2896_v45 = vpop.permute.xlu1 %2895 }
0x18c9   :  { %4850 = vpow2.f32 %v2861_v5  ;;  %v2855_v41 = vsub.f32 %v2827_v19, %v2848_v46 }
0x18cb   :  { %v2863_v13 = vmul.f32 1.442695, %v2855_v41 }
0x18cc   :  { %v2851_v61 = vpop.xlane.xlu0 %2850 }
0x18cd   :  { %4852 = vpow2.f32 %v2863_v13  ;;  %v2856_v10 = vsub.f32 %v2832_v23, %v2851_v61  ;;  %v3871_v61 = vld [vmem:[%s6390_s8 + $0x18] sm:$0xf] }
0x18ce   :  { %v4847_v49 = vpop.eup %4846 }
0x18cf   :  { %v2865_v43 = vmul.f32 1.442695, %v2856_v10  ;;  %v2867_v52 = vsel %vm544_vm8, %v4847_v49, 0.0  ;;  %v2984_v10 = vsel %vm915_vm10, %v3871_v61, 0 }
0x18d0   :  { %2868 = vadd.xlane.f32.xlu0 %v2867_v52  ;;  %v2898_v20 = vpop.permute.xlu0 %2897  ;;  %4532 = vmatpush3.bf16.msra.mxu1 %v2984_v10 }
0x18d1   :  { %4854 = vpow2.f32 %v2865_v43  ;;  %4516 = vmatpush3.bf16.msra.mxu0 %v2898_v20  ;;  %4563 = vmatprep.subr.bf16.mxu1 %v5032_v8 }
0x18d2   :  { %v4849_v17 = vpop.eup %4848  ;;  %4517 = vmatprep.subr.bf16.mxu0 %v5032_v8 }
0x18d3   :  { %v2870_v21 = vsel %vm544_vm8, %v4849_v17, 0.0 }
0x18d4   :  { %2871 = vadd.xlane.f32.xlu1 %v2870_v21 }
0x18d5   :  { %4518 = vmatpush3.bf16.msra.mxu0 %v2896_v45 }
0x18d6   :  { %v4851_v15 = vpop.eup %4850  ;;  %4545 = vmatprep.subr.bf16.mxu0 %v5032_v8 }
0x18d7   :  { %v2873_v26 = vsel %vm544_vm8, %v4851_v15, 0.0 }
0x18d8   :  { %2874 = vadd.xlane.f32.xlu0 %v2873_v26 }
0x18da   :  { %v4853_v16 = vpop.eup %4852 }
0x18db   :  { %v2876_v4 = vsel %vm544_vm8, %v4853_v16, 0.0 }
0x18dc   :  { %2877 = vadd.xlane.f32.xlu1 %v2876_v4 }
0x18de   :  { %v4855_v55 = vpop.eup %4854 }
0x18df   :  { %v2879_v56 = vsel %vm557_vm9, %v4855_v55, 0.0 }
0x18e0   :  { %2880 = vadd.xlane.f32.xlu0 %v2879_v56 }
0x18ed   :  { %3057 = vrot.lane.b32.xlu1 %v5828_v29, %s5041_s7 }
0x18f1   :  { %3053 = vrot.lane.b32.xlu1 %v5822_v1, %s5041_s7 }
0x18f5   :  { %3049 = vrot.lane.b32.xlu1 %v5818_v9, %s5042_s26 }
0x18f6   :  { %3055 = vrot.lane.b32.xlu0 %v5818_v9, %s5041_s7 }
0x18fa   :  { %3047 = vrot.lane.b32.xlu0 %v5822_v1, %s5042_s26 }
0x1959   :  { %v2869_v37 = vpop.xlane.xlu0 %2868 }
0x195a   :  { %4856 = vrcp.f32 %v2869_v37 }
0x195d   :  { %v2872_v59 = vpop.xlane.xlu1 %2871 }
0x195e   :  { %4858 = vrcp.f32 %v2872_v59 }
0x1961   :  { %v2875_v25 = vpop.xlane.xlu0 %2874 }
0x1962   :  { %4860 = vrcp.f32 %v2875_v25 }
0x1965   :  { %v2878_v19 = vpop.xlane.xlu1 %2877 }
0x1966   :  { %4862 = vrcp.f32 %v2878_v19 }
0x1967   :  { %v4857_v36 = vpop.eup %4856 }
0x1968   :  { %v2887_v23 = vmul.f32 %v4857_v36, %v4847_v49 }
0x1969   :  { %v2881_v24 = vpop.xlane.xlu0 %2880  ;;  %v3058_v11 = vpop.permute.xlu1 %3057 }
0x196a   :  { %4864 = vrcp.f32 %v2881_v24  ;;  %v3075_v32 = vsel %vm469_vm7, %v3058_v11, 0 }
0x196b   :  { %v4859_v30 = vpop.eup %4858 }
0x196c   :  { %v2888_v34 = vmul.f32 %v4859_v30, %v4849_v17 }
0x196d   :  { %v3056_v2 = vpop.permute.xlu0 %3055  ;;  %v3054_v63 = vpop.permute.xlu1 %3053 }
0x196e   :  { %v2892_v18 = vpack.c.bf16 %v2888_v34, %v2887_v23  ;;  %v3072_v3 = vsel %vm469_vm7, %v3056_v2, 0  ;;  %v3069_v46 = vsel %vm469_vm7, %v3054_v63, 0 }
0x196f   :  { %v4861_v44 = vpop.eup %4860 }
0x1970   :  { %4520 = vmatmul.mubr.msk.bf16.vlgmr.msra.gmra.mxu0 %vm544_vm8, %v2892_v18  ;;  %v2889_v51 = vmul.f32 %v4861_v44, %v4851_v15 }
0x1971   :  { %4546 = vmatpush3.bf16.xpose.msra.mxu0 %v3075_v32  ;;  %4523 = vmatprep.mubr.msk.bf16.mxu0 %vm5033_vm6, %v5032_v8  ;;  %v3048_v41 = vpop.permute.xlu0 %3047  ;;  %v3050_v13 = vpop.permute.xlu1 %3049 }
0x1972   :  { %4547 = vmatprep.subr.bf16.mxu0 %v5032_v8 }
0x1973   :  { %v4863_v47 = vpop.eup %4862 }
0x1974   :  { %v2890_v57 = vmul.f32 %v4863_v47, %v4853_v16 }
0x1976   :  { %v2893_v60 = vpack.c.bf16 %v2890_v57, %v2889_v51 }
0x1977   :  { %v4865_v0 = vpop.eup %4864 }
0x1978   :  { %4524 = vmatmul.mubr.msk.bf16.gmra.mxu0 %vm544_vm8, %v2893_v60  ;;  %v2891_v42 = vmul.f32 %v4865_v0, %v4855_v55 }
0x1979   :  { %4548 = vmatpush3.bf16.xpose.msra.mxu0 %v3072_v3  ;;  %4527 = vmatprep.mubr.msk.bf16.mxu0 %vm5033_vm6, %v5032_v8 }
0x197a   :  { %4549 = vmatprep.subr.bf16.mxu0 %v5032_v8  ;;  %v2894_v5 = vpack.c.bf16 %v2891_v42, %v2891_v42 }
0x1980   :  { %4528 = vmatmul.mubr.msk.bf16.gmra.mxu0 %vm544_vm8, %v2894_v5 }
0x1981   :  { %4550 = vmatpush3.bf16.xpose.msra.mxu0 %v3069_v46  ;;  %4551 = vmatprep.mubr.msk.bf16.mxu0 %vm5033_vm6, %v5032_v8 }
0x1982   :  { %4581 = vmatprep.subr.bf16.mxu0 %v5032_v8 }
0x1988   :  { %4552 = vmatmul.mubr.msk.bf16.vlgmr.msra.gmra.mxu0 %vm469_vm7, %v3048_v41 }
0x1989   :  { %4555 = vmatprep.mubr.msk.bf16.mxu0 %vm5033_vm6, %v5032_v8 }
0x1990   :  { %4556 = vmatmul.mubr.msk.bf16.gmra.mxu0 %vm469_vm7, %v3050_v13 }
0x1991   :  { %4559 = vmatprep.mubr.msk.bf16.mxu0 %vm5033_vm6, %v5032_v8 }
0x1a30   :  { %v2949_v49 = vpop.f32.mrf.mxu0 }
0x1a32   :  { %v4521_v43 = vpop.f32.mrf.mxu0 }
0x1a34   :  { %v2952_v52 = vpop.f32.mrf.mxu0 }
0x1a35   :  { %v2971_v20 = vpack.c.bf16 %v2952_v52, %v2949_v49 }
0x1a36   :  { %v4522_v17 = vpop.f32.mrf.mxu0 }
0x1a37   :  { %4534 = vmatmul.mubr.msk.bf16.vlgmr.msra.gmra.mxu1 %vm469_vm7, %v2971_v20 }
0x1a38   :  { %v2957_v21 = vpop.f32.mrf.mxu0  ;;  %4537 = vmatprep.mubr.msk.bf16.mxu1 %vm5033_vm6, %v5032_v8 }
0x1a3a   :  { %v4525_v45 = vpop.f32.mrf.mxu0 }
0x1a3c   :  { %v2960_v15 = vpop.f32.mrf.mxu0 }
0x1a3d   :  { %v2972_v26 = vpack.c.bf16 %v2960_v15, %v2957_v21 }
0x1a3e   :  { %v4526_v16 = vpop.f32.mrf.mxu0 }
0x1a3f   :  { %4538 = vmatmul.mubr.msk.bf16.gmra.mxu1 %vm469_vm7, %v2972_v26 }
0x1a40   :  { %v2965_v4 = vpop.f32.mrf.mxu0  ;;  %4541 = vmatprep.mubr.msk.bf16.mxu1 %vm5033_vm6, %v5032_v8 }
0x1a41   :  { %v2973_v37 = vpack.c.bf16 %v2965_v4, %v2965_v4 }
0x1a42   :  { %v4529_v55 = vpop.f32.mrf.mxu0 }
0x1a44   :  { %v2968_v56 = vpop.f32.mrf.mxu0 }
0x1a46   :  { %v4530_v59 = vpop.f32.mrf.mxu0 }
0x1a47   :  { %4542 = vmatmul.mubr.msk.bf16.gmra.mxu1 %vm469_vm7, %v2973_v37 }
0x1a48   :  { %v3111_v25 = vpop.f32.mrf.mxu0  ;;  %4569 = vmatprep.mubr.msk.bf16.mxu1 %vm5033_vm6, %v5032_v8 }
0x1a49   :  { %v3112_v19 = vadd.f32 %v5878_v27, %v3111_v25 }
0x1a4a   :  { %v4553_v36 = vpop.f32.mrf.mxu0 }
0x1a4b   :  { %v3133_v24 = vsel %vm544_vm8, %v3112_v19, -inf }
0x1a4c   :  { %3134 = vmax.xlane.f32.xlu0 %v3133_v24  ;;  %v3114_v30 = vpop.f32.mrf.mxu0 }
0x1a4d   :  { %v3115_v23 = vadd.f32 %v5885_v31, %v3114_v30 }
0x1a4e   :  { %v4554_v34 = vpop.f32.mrf.mxu0 }
0x1a4f   :  { %v3136_v11 = vsel %vm544_vm8, %v3115_v23, -inf }
0x1a50   :  { %3137 = vmax.xlane.f32.xlu1 %v3136_v11  ;;  %v3119_v18 = vpop.f32.mrf.mxu0 }
0x1a51   :  { %v3120_v32 = vadd.f32 %v5892_v39, %v3119_v18 }
0x1a52   :  { %v4557_v44 = vpop.f32.mrf.mxu0 }
0x1a53   :  { %v3139_v47 = vsel %vm544_vm8, %v3120_v32, -inf }
0x1a54   :  { %3140 = vmax.xlane.f32.xlu0 %v3139_v47  ;;  %v3122_v51 = vpop.f32.mrf.mxu0 }
0x1a55   :  { %v3123_v27 = vadd.f32 %v5899_v53, %v3122_v51 }
0x1a56   :  { %v4558_v57 = vpop.f32.mrf.mxu0 }
0x1a57   :  { %v3142_v2 = vsel %vm544_vm8, %v3123_v27, -inf }
0x1a58   :  { %3143 = vmax.xlane.f32.xlu0 %v3142_v2 }
0x1a61   :  { %3195 = vrot.lane.b32.xlu1 %v5828_v29, %s5043_s25 }
0x1ad5   :  { %v3135_v31 = vpop.xlane.xlu0 %3134 }
0x1ad6   :  { %v3148_v60 = vsub.f32 %v3112_v19, %v3135_v31 }
0x1ad8   :  { %v3153_v0 = vmul.f32 1.442695, %v3148_v60 }
0x1ad9   :  { %v3138_v3 = vpop.xlane.xlu1 %3137 }
0x1ada   :  { %4866 = vpow2.f32 %v3153_v0  ;;  %v3149_v39 = vsub.f32 %v3115_v23, %v3138_v3 }
0x1adc   :  { %v3155_v42 = vmul.f32 1.442695, %v3149_v39 }
0x1add   :  { %v3196_v63 = vpop.permute.xlu1 %3195  ;;  %v3141_v5 = vpop.xlane.xlu0 %3140 }
0x1ade   :  { %4868 = vpow2.f32 %v3155_v42  ;;  %v3209_v46 = vsel %vm232_vm2, %v3196_v63, 0  ;;  %v3150_v53 = vsub.f32 %v3120_v32, %v3141_v5  ;;  %v4914_v63 = vld [vmem:[%s6387_s5 + $0x20] sm:$0x3] }
0x1adf   :  { %4564 = vmatpush3.bf16.msra.mxu1 %v3209_v46 }
0x1ae0   :  { %v3157_v41 = vmul.f32 1.442695, %v3150_v53  ;;  %4565 = vmatprep.subr.bf16.mxu1 %v5032_v8 }
0x1ae1   :  { %v3144_v13 = vpop.xlane.xlu0 %3143 }
0x1ae2   :  { %4870 = vpow2.f32 %v3157_v41  ;;  %v3151_v61 = vsub.f32 %v3123_v27, %v3144_v13 }
0x1ae4   :  { %v3159_v10 = vmul.f32 1.442695, %v3151_v61 }
0x1ae6   :  { %4872 = vpow2.f32 %v3159_v10 }
0x1ae7   :  { %v4867_v49 = vpop.eup %4866 }
0x1ae8   :  { %v3163_v43 = vsel %vm544_vm8, %v4867_v49, 0.0 }
0x1ae9   :  { %3164 = vadd.xlane.f32.xlu1 %v3163_v43 }
0x1aeb   :  { %v4869_v52 = vpop.eup %4868 }
0x1aec   :  { %v3166_v20 = vsel %vm544_vm8, %v4869_v52, 0.0 }
0x1aed   :  { %3167 = vadd.xlane.f32.xlu0 %v3166_v20 }
0x1aef   :  { %v4871_v17 = vpop.eup %4870 }
0x1af0   :  { %v3169_v21 = vsel %vm544_vm8, %v4871_v17, 0.0 }
0x1af1   :  { %3170 = vadd.xlane.f32.xlu1 %v3169_v21 }
0x1af3   :  { %v4873_v45 = vpop.eup %4872 }
0x1af4   :  { %v3172_v15 = vsel %vm544_vm8, %v4873_v45, 0.0 }
0x1af5   :  { %3173 = vadd.xlane.f32.xlu0 %v3172_v15 }
0x1af7   :  { %v3020_v26 = vpop.f32.mrf.mxu1 }
0x1af8   :  { %v6176_v16 = vadd.f32 %v3020_v26, %v6079_v40 }
0x1af9   :  { %v4535_v4 = vpop.f32.mrf.mxu1 }
0x1afb   :  { %v3023_v55 = vpop.f32.mrf.mxu1 }
0x1afc   :  { %v6179_v56 = vadd.f32 %v3023_v55, %v6081_v54 }
0x1afd   :  { %v4536_v37 = vpop.f32.mrf.mxu1 }
0x1aff   :  { %v3028_v59 = vpop.f32.mrf.mxu1 }
0x1b00   :  { %v6182_v25 = vadd.f32 %v3028_v59, %v6083_v6 }
0x1b01   :  { %v4539_v19 = vpop.f32.mrf.mxu1 }
0x1b02   :  { %3191 = vrot.lane.b32.xlu1 %v5822_v1, %s5043_s25  ;;  %v3872_v1 = vld [vmem:[%s6390_s8 + $0x1c] sm:$0xf] }
0x1b03   :  { %v3031_v36 = vpop.f32.mrf.mxu1 }
0x1b04   :  { %v6187_v24 = vadd.f32 %v3031_v36, %v6085_v28  ;;  %v3280_v28 = vsel %vm915_vm10, %v3872_v1, 0 }
0x1b05   :  { %v4540_v40 = vpop.f32.mrf.mxu1  ;;  %4582 = vmatpush3.bf16.msra.mxu0 %v3280_v28 }
0x1b06   :  { %3051 = vrot.lane.b32.xlu1 %v5828_v29, %s5042_s26  ;;  %4611 = vmatprep.subr.bf16.mxu0 %v5032_v8  ;;  %v6228_v40 = vld [vmem:[%s6391_s9 + $0x8] sm:$0x3f] }
0x1b07   :  { %v3036_v30 = vpop.f32.mrf.mxu1 }
0x1b08   :  { %v6192_v54 = vadd.f32 %v3036_v30, %v6087_v12  ;;  %v6233_v30 = vrot.slane %v6228_v40, %v1642_v58 }
0x1b09   :  { %v4543_v23 = vpop.f32.mrf.mxu1 }
0x1b0b   :  { %3193 = vrot.lane.b32.xlu0 %v5818_v9, %s5043_s25  ;;  %v3039_v6 = vpop.f32.mrf.mxu1 }
0x1b0d   :  { %v4544_v34 = vpop.f32.mrf.mxu1 }
0x1b72   :  { %v3165_v29 = vpop.xlane.xlu1 %3164 }
0x1b73   :  { %4874 = vrcp.f32 %v3165_v29 }
0x1b76   :  { %v3168_v11 = vpop.xlane.xlu0 %3167 }
0x1b77   :  { %4876 = vrcp.f32 %v3168_v11 }
0x1b7a   :  { %v3171_v12 = vpop.xlane.xlu1 %3170 }
0x1b7b   :  { %4878 = vrcp.f32 %v3171_v12 }
0x1b7e   :  { %v3192_v18 = vpop.permute.xlu1 %3191  ;;  %v3174_v32 = vpop.xlane.xlu0 %3173 }
0x1b7f   :  { %4880 = vrcp.f32 %v3174_v32 }
0x1b80   :  { %v4875_v9 = vpop.eup %4874 }
0x1b81   :  { %v3183_v27 = vmul.f32 %v4875_v9, %v4867_v49 }
0x1b82   :  { %v3052_v44 = vpop.permute.xlu1 %3051  ;;  %v3194_v47 = vpop.permute.xlu0 %3193 }
0x1b83   :  { %4560 = vmatmul.mubr.msk.bf16.gmra.mxu0 %vm469_vm7, %v3052_v44  ;;  %4566 = vmatpush3.bf16.msra.mxu1 %v3194_v47 }
0x1b84   :  { %v4877_v51 = vpop.eup %4876  ;;  %4567 = vmatprep.subr.bf16.mxu1 %v5032_v8  ;;  %4583 = vmatprep.mubr.msk.bf16.mxu0 %vm5033_vm6, %v5032_v8 }
0x1b85   :  { %v3184_v57 = vmul.f32 %v4877_v51, %v4869_v52 }
0x1b87   :  { %v3188_v2 = vpack.c.bf16 %v3184_v57, %v3183_v27  ;;  %4568 = vmatpush3.bf16.msra.mxu1 %v3192_v18 }
0x1b88   :  { %4642 = vmatprep.subr.bf16.mxu1 %v5032_v8  ;;  %v4879_v31 = vpop.eup %4878 }
0x1b89   :  { %v3185_v0 = vmul.f32 %v4879_v31, %v4871_v17 }
0x1b8a   :  { %4570 = vmatmul.mubr.msk.bf16.vlgmr.msra.gmra.mxu1 %vm544_vm8, %v3188_v2 }
0x1b8b   :  { %4573 = vmatprep.mubr.msk.bf16.mxu1 %vm5033_vm6, %v5032_v8  ;;  %4643 = vmatpush3.bf16.msra.mxu1 %v3280_v28 }
0x1b8c   :  { %v4881_v60 = vpop.eup %4880  ;;  %4595 = vmatprep.subr.bf16.mxu1 %v5032_v8 }
0x1b8d   :  { %v3186_v3 = vmul.f32 %v4881_v60, %v4873_v45 }
0x1b8f   :  { %v3189_v39 = vpack.c.bf16 %v3186_v3, %v3185_v0 }
0x1b92   :  { %4574 = vmatmul.mubr.msk.bf16.gmra.mxu1 %vm544_vm8, %v3189_v39 }
0x1b93   :  { %4577 = vmatprep.mubr.msk.bf16.mxu1 %vm5033_vm6, %v5032_v8 }
0x1c43   :  { %v3127_v42 = vpop.f32.mrf.mxu0 }
0x1c44   :  { %v3128_v5 = vadd.f32 %v4914_v63, %v3127_v42 }
0x1c45   :  { %v4561_v46 = vpop.f32.mrf.mxu0 }
0x1c46   :  { %v3145_v53 = vsel %vm557_vm9, %v3128_v5, -inf }
0x1c47   :  { %3146 = vmax.xlane.f32.xlu0 %v3145_v53  ;;  %v3130_v41 = vpop.f32.mrf.mxu0 }
0x1c49   :  { %v4562_v13 = vpop.f32.mrf.mxu0 }
0x1c4a   :  { %v3245_v61 = vpop.f32.mrf.mxu1 }
0x1c4c   :  { %v4571_v10 = vpop.f32.mrf.mxu1 }
0x1c4e   :  { %v3248_v49 = vpop.f32.mrf.mxu1 }
0x1c4f   :  { %v3267_v43 = vpack.c.bf16 %v3248_v49, %v3245_v61 }
0x1c50   :  { %v4572_v52 = vpop.f32.mrf.mxu1 }
0x1c51   :  { %4584 = vmatmul.mubr.msk.bf16.vlgmr.msra.gmra.mxu0 %vm469_vm7, %v3267_v43 }
0x1c52   :  { %v3253_v20 = vpop.f32.mrf.mxu1  ;;  %4587 = vmatprep.mubr.msk.bf16.mxu0 %vm5033_vm6, %v5032_v8 }
0x1c54   :  { %v4575_v17 = vpop.f32.mrf.mxu1 }
0x1c56   :  { %v3256_v21 = vpop.f32.mrf.mxu1 }
0x1c57   :  { %v3268_v45 = vpack.c.bf16 %v3256_v21, %v3253_v20 }
0x1c58   :  { %v4576_v15 = vpop.f32.mrf.mxu1 }
0x1c59   :  { %4588 = vmatmul.mubr.msk.bf16.gmra.mxu0 %vm469_vm7, %v3268_v45 }
0x1c5a   :  { %4619 = vmatprep.mubr.msk.bf16.mxu0 %vm5033_vm6, %v5032_v8 }
0x1cd0   :  { %v3147_v26 = vpop.xlane.xlu0 %3146 }
0x1cd1   :  { %v3152_v4 = vsub.f32 %v3128_v5, %v3147_v26 }
0x1cd3   :  { %v3161_v55 = vmul.f32 1.442695, %v3152_v4 }
0x1cd5   :  { %4882 = vpow2.f32 %v3161_v55 }
0x1ce2   :  { %v4883_v37 = vpop.eup %4882 }
0x1ce3   :  { %v3175_v59 = vsel %vm557_vm9, %v4883_v37, 0.0 }
0x1ce4   :  { %3176 = vadd.xlane.f32.xlu1 %v3175_v59 }
0x1d11   :  { %v3316_v19 = vpop.f32.mrf.mxu0 }
0x1d12   :  { %v3338_v36 = vadd.f32 %v3316_v19, %v6176_v16 }
0x1d13   :  { %v4585_v23 = vpop.f32.mrf.mxu0 }
0x1d14   :  { %v3343_v6 = vadd.f32 %v3338_v36, %v5761_v38 }
0x1d15   :  { %v3319_v34 = vpop.f32.mrf.mxu0 }
0x1d16   :  { %v6237_v1 = vadd.f32 %v6233_v30, %v3343_v6  ;;  %v3339_v28 = vadd.f32 %v3319_v34, %v6179_v56 }
0x1d17   :  { %v4586_v16 = vpop.f32.mrf.mxu0 }
0x1d18   :  { %v3344_v29 = vadd.f32 %v3339_v28, %v5766_v48  ;;  %v3357_v11 = vsel %vm285_vm3, %v6237_v1, 0.0  ;;  %v4680_v28 = vld [vmem:[%s6392_s10 + $0x18] sm:$0xff]  }
0x1d19   :  { %3358 = vadd.xlane.f32.xlu0 %v3357_v11  ;;  %v3324_v12 = vpop.f32.mrf.mxu0 }
0x1d1a   :  { %v3340_v58 = vadd.f32 %v3324_v12, %v6182_v25  ;;  %v3353_v18 = vadd.f32 %v6233_v30, %v3344_v29 }
0x1d1b   :  { %v4589_v32 = vpop.f32.mrf.mxu0 }
0x1d1c   :  { %v3345_v38 = vadd.f32 %v3340_v58, %v5771_v62  ;;  %v3360_v9 = vsel %vm285_vm3, %v3353_v18, 0.0  ;;  %v4681_v58 = vld [vmem:[%s6392_s10 + $0x10] sm:$0xff]   ;;  %v6278_v32 = vrot.slane %v6228_v40, %v1716_v33 }
0x1d1d   :  { %3361 = vadd.xlane.f32.xlu0 %v3360_v9  ;;  %v3327_v44 = vpop.f32.mrf.mxu0 }
0x1d1e   :  { %v6248_v56 = vadd.f32 %v6233_v30, %v3345_v38  ;;  %v3341_v48 = vadd.f32 %v3327_v44, %v6187_v24 }
0x1d1f   :  { %v4590_v47 = vpop.f32.mrf.mxu0 }
0x1d20   :  { %v3346_v51 = vadd.f32 %v3341_v48, %v5776_v22  ;;  %v3363_v25 = vsel %vm285_vm3, %v6248_v56, 0.0 }
0x1d21   :  { %3364 = vadd.xlane.f32.xlu1 %v3363_v25 }
0x1d22   :  { %v3355_v27 = vadd.f32 %v6233_v30, %v3346_v51  ;;  %v6285_v51 = vrot.slane %v6228_v40, %v1725_v7 }
0x1d24   :  { %v3366_v62 = vsel %vm285_vm3, %v3355_v27, 0.0 }
0x1d25   :  { %3367 = vadd.xlane.f32.xlu0 %v3366_v62 }
0x1d6d   :  { %v3177_v57 = vpop.xlane.xlu1 %3176 }
0x1d6e   :  { %4884 = vrcp.f32 %v3177_v57 }
0x1d7b   :  { %v4885_v2 = vpop.eup %4884 }
0x1d7c   :  { %v3187_v31 = vmul.f32 %v4885_v2, %v4883_v37 }
0x1d7e   :  { %v3190_v60 = vpack.c.bf16 %v3187_v31, %v3187_v31 }
0x1d80   :  { %4578 = vmatmul.mubr.msk.bf16.gmra.mxu1 %vm544_vm8, %v3190_v60 }
0x1d81   :  { %4591 = vmatprep.mubr.msk.bf16.mxu1 %vm5033_vm6, %v5032_v8 }
0x1da2   :  { %v3359_v22 = vpop.xlane.xlu0 %3358 }
0x1da3   :  { %v3372_v24 = vmul.f32 0.03125, %v3359_v22 }
0x1da5   :  { %v3377_v0 = vsub.f32 %v6237_v1, %v3372_v24 }
0x1da6   :  { %v3362_v3 = vpop.xlane.xlu0 %3361 }
0x1da7   :  { %v3373_v39 = vmul.f32 0.03125, %v3362_v3  ;;  %v3382_v42 = vmul.f32 %v3377_v0, %v3377_v0 }
0x1da9   :  { %v3378_v63 = vsub.f32 %v3353_v18, %v3373_v39  ;;  %v3387_v5 = vsel %vm285_vm3, %v3382_v42, 0.0  ;;  %v4682_v39 = vld [vmem:[%s6394_s12 + $0x38] sm:$0xff]   ;;  %v4683_v42 = vld [vmem:[%s6394_s12 + $0x30] sm:$0xff]  }
0x1daa   :  { %3388 = vadd.xlane.f32.xlu1 %v3387_v5  ;;  %v3365_v46 = vpop.xlane.xlu1 %3364  ;;  %4612 = vmatpush3.bf16.msra.mxu0 %v4682_v39  ;;  %v4685_v5 = vld [vmem:[%s6394_s12 + $0x20] sm:$0xff]  }
0x1dab   :  { %v3374_v53 = vmul.f32 0.03125, %v3365_v46  ;;  %v3383_v41 = vmul.f32 %v3378_v63, %v3378_v63  ;;  %4613 = vmatprep.subr.bf16.mxu0 %v5032_v8 }
0x1dad   :  { %v3379_v13 = vsub.f32 %v6248_v56, %v3374_v53  ;;  %v3390_v61 = vsel %vm285_vm3, %v3383_v41, 0.0 }
0x1dae   :  { %3391 = vadd.xlane.f32.xlu0 %v3390_v61  ;;  %v3368_v10 = vpop.xlane.xlu0 %3367  ;;  %4614 = vmatpush3.bf16.msra.mxu0 %v4683_v42 }
0x1daf   :  { %v3375_v49 = vmul.f32 0.03125, %v3368_v10  ;;  %v3384_v43 = vmul.f32 %v3379_v13, %v3379_v13  ;;  %4615 = vmatprep.subr.bf16.mxu0 %v5032_v8 }
0x1db1   :  { %v3380_v52 = vsub.f32 %v3355_v27, %v3375_v49  ;;  %v3393_v20 = vsel %vm285_vm3, %v3384_v43, 0.0 }
0x1db2   :  { %3394 = vadd.xlane.f32.xlu1 %v3393_v20 }
0x1db3   :  { %v3385_v17 = vmul.f32 %v3380_v52, %v3380_v52 }
0x1db5   :  { %v3396_v21 = vsel %vm285_vm3, %v3385_v17, 0.0 }
0x1db6   :  { %3397 = vadd.xlane.f32.xlu0 %v3396_v21 }
0x1e33   :  { %v3389_v45 = vpop.xlane.xlu1 %3388 }
0x1e34   :  { %v3402_v15 = vmul.f32 0.03125, %v3389_v45 }
0x1e36   :  { %v3407_v26 = vadd.f32 1e-06, %v3402_v15 }
0x1e37   :  { %v3392_v4 = vpop.xlane.xlu0 %3391 }
0x1e38   :  { %4886 = vrsqrt.f32 %v3407_v26  ;;  %v3403_v55 = vmul.f32 0.03125, %v3392_v4 }
0x1e3a   :  { %v3408_v37 = vadd.f32 1e-06, %v3403_v55 }
0x1e3b   :  { %v3395_v59 = vpop.xlane.xlu1 %3394 }
0x1e3c   :  { %4888 = vrsqrt.f32 %v3408_v37  ;;  %v3404_v19 = vmul.f32 0.03125, %v3395_v59 }
0x1e3e   :  { %v3409_v36 = vadd.f32 1e-06, %v3404_v19 }
0x1e3f   :  { %v3398_v23 = vpop.xlane.xlu0 %3397 }
0x1e40   :  { %4890 = vrsqrt.f32 %v3409_v36  ;;  %v3405_v6 = vmul.f32 0.03125, %v3398_v23  ;;  %v3261_v34 = vpop.f32.mrf.mxu1 }
0x1e41   :  { %v3269_v16 = vpack.c.bf16 %v3261_v34, %v3261_v34 }
0x1e42   :  { %v3410_v29 = vadd.f32 1e-06, %v3405_v6  ;;  %v4579_v11 = vpop.f32.mrf.mxu1 }
0x1e43   :  { %4592 = vmatmul.mubr.msk.bf16.vlgmr.msra.gmra.mxu1 %vm469_vm7, %v3269_v16 }
0x1e44   :  { %4892 = vrsqrt.f32 %v3410_v29  ;;  %v3264_v12 = vpop.f32.mrf.mxu1  ;;  %4596 = vmatpush3.bf16.msra.mxu1 %v4680_v28  ;;  %4599 = vmatprep.mubr.msk.bf16.mxu1 %vm5033_vm6, %v5032_v8 }
0x1e45   :  { %v4887_v18 = vpop.eup %4886  ;;  %4597 = vmatprep.subr.bf16.mxu1 %v5032_v8 }
0x1e46   :  { %v3417_v38 = vmul.f32 %v4887_v18, %v3377_v0  ;;  %v4580_v9 = vpop.f32.mrf.mxu1 }
0x1e48   :  { %4598 = vmatpush3.bf16.msra.mxu1 %v4681_v58  ;;  %v3426_v48 = vmul.f32 %v6278_v32, %v3417_v38 }
0x1e49   :  { %v4889_v44 = vpop.eup %4888  ;;  %4631 = vmatprep.subr.mxu1 %v5032_v8 }
0x1e4a   :  { %v3418_v47 = vmul.f32 %v4889_v44, %v3378_v63  ;;  %v3435_v33 = vadd.f32 %v6285_v51, %v3426_v48  ;;  %v4684_v63 = vld [vmem:[%s6394_s12 + $0x28] sm:$0xff]  }
0x1e4b   :  { %4616 = vmatpush3.bf16.msra.mxu0 %v4684_v63 }
0x1e4c   :  { %v3427_v25 = vmul.f32 %v6278_v32, %v3418_v47  ;;  %4617 = vmatprep.subr.bf16.mxu0 %v5032_v8 }
0x1e4d   :  { %v4891_v27 = vpop.eup %4890 }
0x1e4e   :  { %v3419_v62 = vmul.f32 %v4891_v27, %v3379_v13  ;;  %v3436_v57 = vadd.f32 %v6285_v51, %v3427_v25 }
0x1e4f   :  { %4618 = vmatpush3.bf16.msra.mxu0 %v4685_v5 }
0x1e50   :  { %v3440_v2 = vpack.c.bf16 %v3436_v57, %v3435_v33  ;;  %v3428_v22 = vmul.f32 %v6278_v32, %v3419_v62 }
0x1e51   :  { %v4893_v31 = vpop.eup %4892 }
0x1e52   :  { %v3420_v60 = vmul.f32 %v4893_v31, %v3380_v52  ;;  %4600 = vmatmul.mubr.msk.bf16.vlgmr.msra.gmra.mxu1 %vm285_vm3, %v3440_v2  ;;  %v3437_v24 = vadd.f32 %v6285_v51, %v3428_v22  ;;  %v6325_v52 = vld [vmem:[%s6393_s11 + $0x1] ss:$0 sm:$0xff] }
0x1e53   :  { %4603 = vmatprep.mubr.msk.bf16.mxu1 %vm5033_vm6, %v5032_v8 }
0x1e54   :  { %v3429_v7 = vmul.f32 %v6278_v32, %v3420_v60 }
0x1e56   :  { %v3438_v0 = vadd.f32 %v6285_v51, %v3429_v7 }
0x1e58   :  { %v3441_v3 = vpack.c.bf16 %v3438_v0, %v3437_v24 }
0x1e5a   :  { %4604 = vmatmul.mubr.msk.bf16.gmra.mxu1 %vm285_vm3, %v3441_v3 }
0x1e5b   :  { %4607 = vmatprep.mubr.msk.bf16.mxu1 %vm5033_vm6, %v5032_v8 }
0x1f03   :  { %v3332_v46 = vpop.f32.mrf.mxu1 }
0x1f04   :  { %v3342_v53 = vadd.f32 %v3332_v46, %v6192_v54 }
0x1f05   :  { %v4593_v41 = vpop.f32.mrf.mxu1 }
0x1f06   :  { %v3347_v13 = vadd.f32 %v3342_v53, %v5781_v35 }
0x1f07   :  { %v3335_v61 = vpop.f32.mrf.mxu1 }
0x1f08   :  { %v6318_v10 = vadd.f32 %v6233_v30, %v3347_v13 }
0x1f09   :  { %v4594_v49 = vpop.f32.mrf.mxu1 }
0x1f0a   :  { %v3369_v43 = vsel %vm298_vm5, %v6318_v10, 0.0 }
0x1f0b   :  { %3370 = vadd.xlane.f32.xlu1 %v3369_v43 }
0x1f12   :  { %v3504_v20 = vpop.f32.mrf.mxu1 }
0x1f13   :  { %v3505_v54 = vadd.f32 %v6325_v52, %v3504_v20 }
0x1f14   :  { %v4601_v17 = vpop.f32.mrf.mxu1 }
0x1f15   :  { %v3531_v21 = vmul.f32 0.044715, %v3505_v54  ;;  %v3526_v2 = vmul.f32 0.5, %v3505_v54 }
0x1f16   :  { %v3507_v35 = vpop.f32.mrf.mxu1 }
0x1f17   :  { %v3536_v45 = vmul.f32 %v3531_v21, %v3505_v54  ;;  %v3508_v30 = vadd.f32 %v6325_v52, %v3507_v35 }
0x1f18   :  { %v4602_v15 = vpop.f32.mrf.mxu1 }
0x1f19   :  { %v3541_v26 = vmul.f32 %v3536_v45, %v3505_v54  ;;  %v3532_v4 = vmul.f32 0.044715, %v3508_v30  ;;  %v3527_v31 = vmul.f32 0.5, %v3508_v30 }
0x1f1a   :  { %v3512_v55 = vpop.f32.mrf.mxu1 }
0x1f1b   :  { %v3546_v37 = vadd.f32 %v3541_v26, %v3505_v54  ;;  %v3537_v59 = vmul.f32 %v3532_v4, %v3508_v30  ;;  %v3513_v19 = vadd.f32 %v6325_v52, %v3512_v55 }
0x1f1c   :  { %v4605_v36 = vpop.f32.mrf.mxu1 }
0x1f1d   :  { %v3551_v23 = vmul.f32 0.7978846, %v3546_v37  ;;  %v3542_v6 = vmul.f32 %v3537_v59, %v3508_v30  ;;  %v3533_v34 = vmul.f32 0.044715, %v3513_v19  ;;  %v3528_v42 = vmul.f32 0.5, %v3513_v19 }
0x1f1e   :  { %v3515_v28 = vpop.f32.mrf.mxu1 }
0x1f1f   :  { %4894 = vtanh.f32 %v3551_v23  ;;  %v3547_v16 = vadd.f32 %v3542_v6, %v3508_v30  ;;  %v3538_v29 = vmul.f32 %v3533_v34, %v3513_v19  ;;  %v3516_v11 = vadd.f32 %v6325_v52, %v3515_v28 }
0x1f20   :  { %v4606_v12 = vpop.f32.mrf.mxu1  ;;  %v3665_v30 = vrot.slane %v6228_v40, %v1963_v50 }
0x1f21   :  { %v3552_v58 = vmul.f32 0.7978846, %v3547_v16  ;;  %v3543_v18 = vmul.f32 %v3538_v29, %v3513_v19  ;;  %v3534_v38 = vmul.f32 0.044715, %v3516_v11  ;;  %v3529_v63 = vmul.f32 0.5, %v3516_v11 }
0x1f23   :  { %4896 = vtanh.f32 %v3552_v58  ;;  %v3548_v9 = vadd.f32 %v3543_v18, %v3513_v19  ;;  %v3539_v44 = vmul.f32 %v3534_v38, %v3516_v11  ;;  %v3701_v58 = vld [vmem:[%s6397_s15 + $0x18] sm:$0xff]  ;;  %v3698_v18 = vld [vmem:[%s6397_s15] sm:$0xff] }
0x1f24   :  { %4632 = vmatpush3.msra.mxu1 %v3701_v58 }
0x1f25   :  { %v3553_v48 = vmul.f32 0.7978846, %v3548_v9  ;;  %v3544_v47 = vmul.f32 %v3539_v44, %v3516_v11  ;;  %4633 = vmatprep.subr.mxu1 %v5032_v8 }
0x1f27   :  { %4898 = vtanh.f32 %v3553_v48  ;;  %v3549_v25 = vadd.f32 %v3544_v47, %v3516_v11 }
0x1f29   :  { %v3554_v27 = vmul.f32 0.7978846, %v3549_v25 }
0x1f2b   :  { %4900 = vtanh.f32 %v3554_v27 }
0x1f2c   :  { %v4895_v62 = vpop.eup %4894 }
0x1f2d   :  { %v3561_v33 = vadd.f32 1.0, %v4895_v62 }
0x1f2f   :  { %v3566_v22 = vmul.f32 %v3561_v33, %v3526_v2 }
0x1f30   :  { %v4897_v57 = vpop.eup %4896 }
0x1f31   :  { %v3562_v60 = vadd.f32 1.0, %v4897_v57 }
0x1f33   :  { %v3567_v7 = vmul.f32 %v3562_v60, %v3527_v31 }
0x1f34   :  { %v4899_v24 = vpop.eup %4898 }
0x1f35   :  { %v3571_v0 = vpack.c.bf16 %v3567_v7, %v3566_v22  ;;  %v3563_v3 = vadd.f32 1.0, %v4899_v24 }
0x1f37   :  { %4620 = vmatmul.mubr.msk.bf16.vlgmr.msra.gmra.mxu0 %vm1890_vm11, %v3571_v0  ;;  %v3568_v46 = vmul.f32 %v3563_v3, %v3528_v42  ;;  %v3941_v3 = vld [vmem:[%s6395_s13] ss:$0 sm:$0xff]  ;;  %s4996_s13 = scalar_lea.vmem %s3791_s30, 32 }
0x1f38   :  { %v4901_v39 = vpop.eup %4900  ;;  %4623 = vmatprep.mubr.msk.bf16.mxu0 %vm5033_vm6, %v5032_v8  ;;  %v3942_v42 = vld [vmem:[%s6396_s14] ss:$0 sm:$0xff]  ;;  %p4997_p6 = scmp.ne.s32.totalorder %s3791_s30, %s4996_s13  ;;  %p5002_p8 = scmp.lt.s32.totalorder %s4996_s13, %s4996_s13 }
0x1f39   :  { %v3564_v5 = vadd.f32 1.0, %v4901_v39 }
0x1f3a   :  { %p5003_p9 = por %p5002_p8, %p5001_p7 }
0x1f3b   :  { %v3569_v53 = vmul.f32 %v3564_v5, %v3529_v63 }
0x1f3c   :  { %p5004_p10 = pnand %p5003_p9, %p4997_p6 }
0x1f3d   :  { %v3572_v41 = vpack.c.bf16 %v3569_v53, %v3568_v46 }
0x1f3f   :  { %4624 = vmatmul.mubr.msk.bf16.gmra.mxu0 %vm1890_vm11, %v3572_v41 }
0x1f40   :  { %4627 = vmatprep.mubr.msk.bf16.mxu0 %vm5033_vm6, %v5032_v8 }
0x1f94   :  { %v3371_v13 = vpop.xlane.xlu1 %3370 }
0x1f95   :  { %v3376_v61 = vmul.f32 0.03125, %v3371_v13 }
0x1f97   :  { %v3381_v49 = vsub.f32 %v6318_v10, %v3376_v61  ;;  %v3943_v61 = vld [vmem:[%s6398_s16] ss:$0 sm:$0xff] }
0x1f99   :  { %v3386_v43 = vmul.f32 %v3381_v49, %v3381_v49 }
0x1f9b   :  { %v3399_v20 = vsel %vm298_vm5, %v3386_v43, 0.0 }
0x1f9c   :  { %3400 = vadd.xlane.f32.xlu0 %v3399_v20 }
0x1ff7   :  { %v3641_v54 = vpop.f32.mrf.mxu0 }
0x1ff8   :  { %v3660_v45 = vadd.f32 %v3641_v54, %v6237_v1 }
0x1ff9   :  { %v4621_v17 = vpop.f32.mrf.mxu0 }
0x1ffa   :  { %v3666_v55 = vadd.f32 %v3665_v30, %v3660_v45 }
0x1ffb   :  { %v3644_v21 = vpop.f32.mrf.mxu0 }
0x1ffd   :  { %v4622_v35 = vpop.f32.mrf.mxu0 }
0x1fff   :  { %v3648_v15 = vpop.f32.mrf.mxu0 }
0x2000   :  { %v3661_v26 = vadd.f32 %v3648_v15, %v6248_v56 }
0x2001   :  { %v4625_v4 = vpop.f32.mrf.mxu0 }
0x2002   :  { %v3667_v10 = vadd.f32 %v3665_v30, %v3661_v26 }
0x2003   :  { %v3651_v37 = vpop.f32.mrf.mxu0 }
0x2004   :  { %v3668_v59 = vsel %vm232_vm2, %v3666_v55, %v3667_v10 }
0x2005   :  { %v4626_v19 = vpop.f32.mrf.mxu0  ;;  %v3671_v36 = vsel %vm298_vm5, %v3668_v59, 0.0 }
0x2006   :  { %3672 = vadd.xlane.f32.xlu1 %v3671_v36 }
0x2025   :  { %v3401_v23 = vpop.xlane.xlu0 %3400 }
0x2026   :  { %v3406_v6 = vmul.f32 0.03125, %v3401_v23 }
0x2028   :  { %v3411_v1 = vadd.f32 1e-06, %v3406_v6 }
0x202a   :  { %4902 = vrsqrt.f32 %v3411_v1 }
0x2037   :  { %v4903_v14 = vpop.eup %4902 }
0x2038   :  { %v3421_v34 = vmul.f32 %v4903_v14, %v3381_v49 }
0x203a   :  { %v3430_v50 = vmul.f32 %v6278_v32, %v3421_v34  ;;  %v3700_v32 = vld [vmem:[%s6397_s15 + $0x10] sm:$0xff] }
0x203b   :  { %4634 = vmatpush3.msra.mxu1 %v3700_v32 }
0x203c   :  { %v3439_v40 = vadd.f32 %v6285_v51, %v3430_v50  ;;  %4635 = vmatprep.subr.mxu1 %v5032_v8  ;;  %v3699_v51 = vld [vmem:[%s6397_s15 + $0x8] sm:$0xff] }
0x203d   :  { %4636 = vmatpush3.msra.mxu1 %v3699_v51 }
0x203e   :  { %v3442_v56 = vpack.c.bf16 %v3439_v40, %v3439_v40  ;;  %4637 = vmatprep.subr.mxu1 %v5032_v8 }
0x203f   :  { %4638 = vmatpush3.msra.mxu1 %v3698_v18 }
0x2040   :  { %4608 = vmatmul.mubr.msk.bf16.gmra.mxu1 %vm285_vm3, %v3442_v56 }
0x2041   :  { %4639 = vmatprep.mubr.msk.f32.mxu1 %vm5033_vm6, %v5032_v8 }
0x208f   :  { %v3673_v28 = vpop.xlane.xlu1 %3672 }
0x2090   :  { %v3674_v16 = vmul.f32 0.03125, %v3673_v28 }
0x2092   :  { %v3675_v29 = vsub.f32 %v3668_v59, %v3674_v16 }
0x2094   :  { %v3676_v11 = vmul.f32 %v3675_v29, %v3675_v29 }
0x2096   :  { %v3677_v12 = vsel %vm298_vm5, %v3676_v11, 0.0 }
0x2097   :  { %3678 = vadd.xlane.f32.xlu0 %v3677_v12 }
0x2100   :  { %v3520_v38 = vpop.f32.mrf.mxu1 }
0x2101   :  { %v3521_v9 = vadd.f32 %v6325_v52, %v3520_v38 }
0x2102   :  { %v4609_v44 = vpop.f32.mrf.mxu1 }
0x2103   :  { %v3535_v48 = vmul.f32 0.044715, %v3521_v9  ;;  %v3530_v31 = vmul.f32 0.5, %v3521_v9 }
0x2104   :  { %v3523_v47 = vpop.f32.mrf.mxu1 }
0x2105   :  { %v3540_v25 = vmul.f32 %v3535_v48, %v3521_v9 }
0x2106   :  { %v4610_v27 = vpop.f32.mrf.mxu1 }
0x2107   :  { %v3545_v62 = vmul.f32 %v3540_v25, %v3521_v9 }
0x2109   :  { %v3550_v33 = vadd.f32 %v3545_v62, %v3521_v9 }
0x210b   :  { %v3555_v57 = vmul.f32 0.7978846, %v3550_v33 }
0x210d   :  { %4904 = vtanh.f32 %v3555_v57 }
0x211a   :  { %v4905_v2 = vpop.eup %4904 }
0x211b   :  { %v3565_v60 = vadd.f32 1.0, %v4905_v2 }
0x211d   :  { %v3570_v22 = vmul.f32 %v3565_v60, %v3530_v31 }
0x211f   :  { %v3573_v7 = vpack.c.bf16 %v3570_v22, %v3570_v22 }
0x2120   :  { %v3679_v24 = vpop.xlane.xlu0 %3678 }
0x2121   :  { %v3680_v8 = vmul.f32 0.03125, %v3679_v24  ;;  %4628 = vmatmul.mubr.msk.bf16.gmra.mxu0 %vm1890_vm11, %v3573_v7 }
0x2123   :  { %v3681_v0 = vadd.f32 1e-06, %v3680_v8 }
0x2125   :  { %4906 = vrsqrt.f32 %v3681_v0 }
0x2132   :  { %v4907_v52 = vpop.eup %4906 }
0x2133   :  { %v3683_v39 = vmul.f32 %v4907_v52, %v3675_v29 }
0x2135   :  { %v3690_v63 = vmul.f32 %v3941_v3, %v3683_v39 }
0x2137   :  { %v3697_v5 = vadd.f32 %v3942_v42, %v3690_v63 }
0x2139   :  { %4640 = vmatmul.mubr.msk.f32.vlgmr.msra.gmra.mxu1 %vm285_vm3, %v3697_v5 }
0x21e1   :  { %v3655_v46 = vpop.f32.mrf.mxu0 }
0x21e3   :  { %v4629_v53 = vpop.f32.mrf.mxu0 }
0x21e5   :  { %v3657_v41 = vpop.f32.mrf.mxu0 }
0x21e7   :  { %v4630_v13 = vpop.f32.mrf.mxu0 }
0x21f9   :  { %v3778_v49 = vpop.f32.mrf.mxu1 }
0x21fa   :  { %v3779_v43 = vadd.f32 %v3943_v61, %v3778_v49 }
0x21fb   :  { %v4641_v20 = vpop.f32.mrf.mxu1 }
0x21fc   :  { %3783 = vst.msk [vmem:[#allocation10] sm:$0x3] %vm3782_vm12, %v3779_v43 }
0x21fd   :  { %5007 = shalt.err (!%p5004_p10)
}
0x21fe   :  { %3793 = dma.vmem_to_hbm [thread:$0]  %s3791_s30, 32, %s6399_s17, [#allocation4]  }
0x21ff   :  { %5022 = dma.done.wait [#allocation4], 32  }
0x2200   :  { %5023 = vsyncadd [#allocation4], 4294967264 }
0x2201   :  { %3797 = vsyncpa [#allocation3], 1 }
0x2202   :  { %3798 = vsyncpa [#allocation6], 1 }
0x2203   :  { %3799 = vsyncpa [#allocation9], 1 }
0x2204   :  { %3800 = vsyncpa [#allocation4], 1 }

</bundles_post_ra>
